<compile_context>
chip_gen: v7x
topology: tpu7x:2x2x1
jax: 0.10.0
libtpu: 0.0.40
codegen_flags: <defaults>
</compile_context>

<pallas_src>
import jax
import jax.numpy as jnp
from jax.experimental import pallas as pl
from jax.experimental.pallas import tpu as pltpu

BN_EPS = 1e-5


# ------------------------------ fused kernel -------------------------------

def _isonet_kernel(
    # data
    x_g_ref, adj_g_ref, x_p_ref, adj_p_ref, mean_mat_ref, ext_mat_ref,
    # shared node embedding
    w_emb_ref, b_emb_ref,
    # GIN stacks, data-graph path (BN folded into w/b; bn_node as scale/shift)
    g_w0_ref, g_b0_ref, g_w1_ref, g_b1_ref, g_nsc_ref, g_nsh_ref,
    # GIN stacks, pattern-graph path
    p_w0_ref, p_b0_ref, p_w1_ref, p_b1_ref, p_nsc_ref, p_nsh_ref,
    # readout MLPs (stacked hidden layers, BN folded)
    mg_wh_ref, mg_bh_ref, mg_wo_ref, mg_bo_ref,
    mp_wh_ref, mp_bh_ref, mp_wo_ref, mp_bo_ref,
    # predict MLP (first layer split top/bot to avoid concat; BN folded)
    pr_w1t_ref, pr_w1b_ref, pr_b1_ref, pr_wh_ref, pr_bh_ref, pr_wo_ref, pr_bo_ref,
    # output
    o_ref,
):
    def mm(a, b):
        return jnp.dot(a, b, preferred_element_type=jnp.float32)

    def relu(x):
        return jnp.maximum(x, 0.0)

    def forward_graph(x, adj_ref, w0, b0, w1, b1, nsc, nsh, wh, bh, wo, bo):
        # embedding_h (plain linear)
        h = mm(x, w_emb_ref[...]) + b_emb_ref[...]
        # GIN layers (eval): adjacency already contains (1+eps)*I
        for l in range(adj_ref.shape[0]):
            h_in = h
            h_agg = mm(adj_ref[l], h)                      # (1+eps)*h + sum_nbrs
            t = relu(mm(h_agg, w0[l]) + b0[l])             # MLP layer0 + BN + ReLU
            t = relu(mm(t, w1[l]) + b1[l])                 # MLP layer1 + ApplyNodeFunc BN + ReLU
            h = h_in + relu(t * nsc[l] + nsh[l])           # bn_node_h + ReLU + residual (+dropout=id)
        # readout MLP: stacked hidden (Linear+BN+ReLU), then final Linear
        for l in range(wh.shape[0]):
            h = relu(mm(h, wh[l]) + bh[l])
        return mm(h, wo[...]) + bo[...]

    h_g = forward_graph(x_g_ref[...], adj_g_ref,
                        g_w0_ref, g_b0_ref, g_w1_ref, g_b1_ref, g_nsc_ref, g_nsh_ref,
                        mg_wh_ref, mg_bh_ref, mg_wo_ref, mg_bo_ref)
    h_p = forward_graph(x_p_ref[...], adj_p_ref,
                        p_w0_ref, p_b0_ref, p_w1_ref, p_b1_ref, p_nsc_ref, p_nsh_ref,
                        mp_wh_ref, mp_bh_ref, mp_wo_ref, mp_bo_ref)

    # dgl.mean_nodes over the pattern graph, then broadcast via extension matrix
    p_repr = mm(mean_mat_ref[...], h_p)
    extension = mm(ext_mat_ref[...], p_repr)

    # predict MLP, first hidden layer concat-free (split weight), then the rest
    h = relu(mm(h_g, pr_w1t_ref[...]) + mm(extension, pr_w1b_ref[...]) + pr_b1_ref[...])
    for l in range(pr_wh_ref.shape[0]):
        h = relu(mm(h, pr_wh_ref[l]) + pr_bh_ref[l])
    pred = mm(h, pr_wo_ref[...]) + pr_bo_ref[...]
    o_ref[...] = jax.nn.sigmoid(pred).astype(o_ref.dtype)


# --------------------------- parameters (host glue) -------------------------

def init_linear(key, fan_in, fan_out):
    kw, kb = jax.random.split(key)
    bound = 1.0 / (fan_in ** 0.5)
    w = jax.random.uniform(kw, (fan_in, fan_out), jnp.float32, -bound, bound)
    b = jax.random.uniform(kb, (1, fan_out), jnp.float32, -bound, bound)
    return w, b


def bn_eval_scale_shift(dim):
    # eval-mode BN at init: gamma=1, beta=0, running_mean=0, running_var=1
    scale = jnp.full((1, dim), 1.0 / jnp.sqrt(1.0 + BN_EPS), jnp.float32)
    shift = jnp.zeros((1, dim), jnp.float32)
    return scale, shift


def fold_bn(w, b, scale, shift):
    # y = (x@w + b)*scale + shift  ==  x@(w*scale) + (b*scale + shift)
    return w * scale, b * scale + shift


def init_gin_stack(key, num_layers, hidden_dim):
    keys = jax.random.split(key, num_layers)
    w0s, b0s, w1s, b1s, nscs, nshs = [], [], [], [], [], []
    for l in range(num_layers):
        k0, k1 = jax.random.split(keys[l])
        sc, sh = bn_eval_scale_shift(hidden_dim)
        w0, b0 = fold_bn(*init_linear(k0, hidden_dim, hidden_dim), sc, sh)   # MLP layer0 + BN0
        w1, b1 = fold_bn(*init_linear(k1, hidden_dim, hidden_dim), sc, sh)   # MLP layer1 + ApplyNodeFunc BN
        w0s.append(w0); b0s.append(b0); w1s.append(w1); b1s.append(b1)
        nscs.append(sc); nshs.append(sh)                                     # bn_node_h (post-ReLU, not foldable)
    return {
        "eps": jnp.zeros((num_layers,), jnp.float32),  # init_eps=0, learn_eps=True
        "w0": jnp.stack(w0s), "b0": jnp.stack(b0s),
        "w1": jnp.stack(w1s), "b1": jnp.stack(b1s),
        "nsc": jnp.stack(nscs), "nsh": jnp.stack(nshs),
    }


def init_mlp_stacked(key, num_layers, input_dim, hidden_dim, output_dim):
    # hidden: Linear -> BN -> ReLU -> Dropout(id); last: Linear.  BN folded.
    assert input_dim == hidden_dim, "stacked hidden layers require input_dim == hidden_dim"
    keys = jax.random.split(key, num_layers)
    whs, bhs = [], []
    for i in range(num_layers - 1):
        w, b = fold_bn(*init_linear(keys[i], hidden_dim, hidden_dim),
                       *bn_eval_scale_shift(hidden_dim))
        whs.append(w); bhs.append(b)
    wo, bo = init_linear(keys[-1], hidden_dim, output_dim)
    return {"wh": jnp.stack(whs), "bh": jnp.stack(bhs), "wo": wo, "bo": bo}


def init_predict_mlp(key, num_layers, input_dim, hidden_dim, output_dim, split_at):
    keys = jax.random.split(key, num_layers)
    sc, sh = bn_eval_scale_shift(hidden_dim)
    w1, b1 = fold_bn(*init_linear(keys[0], input_dim, hidden_dim), sc, sh)
    whs, bhs = [], []
    for i in range(1, num_layers - 1):
        w, b = fold_bn(*init_linear(keys[i], hidden_dim, hidden_dim),
                       *bn_eval_scale_shift(hidden_dim))
        whs.append(w); bhs.append(b)
    wo, bo = init_linear(keys[-1], hidden_dim, output_dim)
    return {"w1_top": w1[:split_at], "w1_bot": w1[split_at:], "b1": b1,
            "wh": jnp.stack(whs), "bh": jnp.stack(bhs), "wo": wo, "bo": bo}


def fold_eps_into_adj(adj, eps):
    # adj_l' = adj + (1 + eps_l) * I  -> GIN aggregation becomes one matmul
    n = adj.shape[0]
    eye = jnp.eye(n, dtype=jnp.float32)
    return adj[None, :, :] + (1.0 + eps)[:, None, None] * eye[None, :, :]


# -------------------------------- forward ----------------------------------

def iso_net_forward(params, adj_g, X_g, adj_p, X_p, ext_mat, mean_mat):
    adj_g_stack = fold_eps_into_adj(adj_g, params["gnn_g"]["eps"])
    adj_p_stack = fold_eps_into_adj(adj_p, params["gnn_p"]["eps"])

    gg, gp = params["gnn_g"], params["gnn_p"]
    mg, mp = params["mlp_g"], params["mlp_p"]
    pr = params["predict"]
    w_emb, b_emb = params["embedding_h"]

    args = [
        X_g, adj_g_stack, X_p, adj_p_stack, mean_mat, ext_mat,
        w_emb, b_emb,
        gg["w0"], gg["b0"], gg["w1"], gg["b1"], gg["nsc"], gg["nsh"],
        gp["w0"], gp["b0"], gp["w1"], gp["b1"], gp["nsc"], gp["nsh"],
        mg["wh"], mg["bh"], mg["wo"], mg["bo"],
        mp["wh"], mp["bh"], mp["wo"], mp["bo"],
        pr["w1_top"], pr["w1_bot"], pr["b1"], pr["wh"], pr["bh"], pr["wo"], pr["bo"],
    ]

    n_g = X_g.shape[0]
    vmem = pltpu.MemorySpace.VMEM
    return pl.pallas_call(
        _isonet_kernel,
        out_shape=jax.ShapeDtypeStruct((n_g, 1), jnp.float32),
        in_specs=[pl.BlockSpec(memory_space=vmem)] * len(args),
        out_specs=pl.BlockSpec(memory_space=vmem),
    )(*args)


# TODO(synk): embedding_e (nn.Linear(1, hidden)) is never used in IsoNet.forward, so it is omitted.

# --------------------------------- main ------------------------------------

if __name__ == "__main__":
    key = jax.random.PRNGKey(0)
    input_dim, hidden_dim, output_dim, L = 8, 32, 16, 2
    N_g, N_p, P_pad = 16, 8, 8   # data-graph nodes / pattern-graph nodes / padded graph-count axis

    keys = jax.random.split(key, 16)
    params = {
        "embedding_h": init_linear(keys[0], input_dim, hidden_dim),  # shared for g and p
        "gnn_g": init_gin_stack(keys[1], L, hidden_dim),
        "gnn_p": init_gin_stack(keys[2], L, hidden_dim),
        "mlp_g": init_mlp_stacked(keys[7], 8, hidden_dim, hidden_dim, output_dim),
        "mlp_p": init_mlp_stacked(keys[8], 8, hidden_dim, hidden_dim, output_dim),
        "predict": init_predict_mlp(keys[9], 16, 2 * output_dim, hidden_dim, 1,
                                    split_at=output_dim),
    }

    X_g = jax.random.normal(keys[10], (N_g, input_dim), jnp.float32)
    X_p = jax.random.normal(keys[11], (N_p, input_dim), jnp.float32)

    def rand_adj(k, n):
        a = (jax.random.uniform(k, (n, n)) < 0.3).astype(jnp.float32)
        a = jnp.triu(a, 1)
        return a + a.T  # symmetric, no self loops

    adj_g = rand_adj(keys[12], N_g)
    adj_p = rand_adj(keys[13], N_p)

    # single pattern graph in the batch; graph-count axis padded to 8
    mean_mat = jnp.zeros((P_pad, N_p), jnp.float32).at[0, :].set(1.0 / N_p)   # dgl.mean_nodes
    ext_mat = jnp.zeros((N_g, P_pad), jnp.float32).at[:, 0].set(1.0)          # g.extension_matrix

    run = jax.jit(iso_net_forward)
    pred = run(params, adj_g, X_g, adj_p, X_p, ext_mat, mean_mat)
    pred = jax.block_until_ready(pred)

    assert pred.shape == (N_g, 1), pred.shape
    assert bool(jnp.all(jnp.isfinite(pred)))
    assert bool(jnp.all((pred >= 0.0) & (pred <= 1.0)))
    print("KERNEL_OK")
</pallas_src>

<mosaic_0001>
module attributes {stable_mosaic.version = 11 : i64} {
  func.func @_isonet_kernel(%arg0: memref<16x8xf32, #tpu.memory_space<vmem>>, %arg1: memref<2x16x16xf32, #tpu.memory_space<vmem>>, %arg2: memref<8x8xf32, #tpu.memory_space<vmem>>, %arg3: memref<2x8x8xf32, #tpu.memory_space<vmem>>, %arg4: memref<8x8xf32, #tpu.memory_space<vmem>>, %arg5: memref<16x8xf32, #tpu.memory_space<vmem>>, %arg6: memref<8x32xf32, #tpu.memory_space<vmem>>, %arg7: memref<1x32xf32, #tpu.memory_space<vmem>>, %arg8: memref<2x32x32xf32, #tpu.memory_space<vmem>>, %arg9: memref<2x1x32xf32, #tpu.memory_space<vmem>>, %arg10: memref<2x32x32xf32, #tpu.memory_space<vmem>>, %arg11: memref<2x1x32xf32, #tpu.memory_space<vmem>>, %arg12: memref<2x1x32xf32, #tpu.memory_space<vmem>>, %arg13: memref<2x1x32xf32, #tpu.memory_space<vmem>>, %arg14: memref<2x32x32xf32, #tpu.memory_space<vmem>>, %arg15: memref<2x1x32xf32, #tpu.memory_space<vmem>>, %arg16: memref<2x32x32xf32, #tpu.memory_space<vmem>>, %arg17: memref<2x1x32xf32, #tpu.memory_space<vmem>>, %arg18: memref<2x1x32xf32, #tpu.memory_space<vmem>>, %arg19: memref<2x1x32xf32, #tpu.memory_space<vmem>>, %arg20: memref<7x32x32xf32, #tpu.memory_space<vmem>>, %arg21: memref<7x1x32xf32, #tpu.memory_space<vmem>>, %arg22: memref<32x16xf32, #tpu.memory_space<vmem>>, %arg23: memref<1x16xf32, #tpu.memory_space<vmem>>, %arg24: memref<7x32x32xf32, #tpu.memory_space<vmem>>, %arg25: memref<7x1x32xf32, #tpu.memory_space<vmem>>, %arg26: memref<32x16xf32, #tpu.memory_space<vmem>>, %arg27: memref<1x16xf32, #tpu.memory_space<vmem>>, %arg28: memref<16x32xf32, #tpu.memory_space<vmem>>, %arg29: memref<16x32xf32, #tpu.memory_space<vmem>>, %arg30: memref<1x32xf32, #tpu.memory_space<vmem>>, %arg31: memref<14x32x32xf32, #tpu.memory_space<vmem>>, %arg32: memref<14x1x32xf32, #tpu.memory_space<vmem>>, %arg33: memref<32x1xf32, #tpu.memory_space<vmem>>, %arg34: memref<1x1xf32, #tpu.memory_space<vmem>>, %arg35: memref<16x1xf32, #tpu.memory_space<vmem>>) attributes {dimension_semantics = [], scalar_prefetch = 0 : i64, scratch_operands = 0 : i64, tpu.core_type = #tpu.core_type<tc>} {
    %c0 = arith.constant 0 : index
    %c0_0 = arith.constant 0 : index
    %0 = vector.load %arg0[%c0, %c0_0] : memref<16x8xf32, #tpu.memory_space<vmem>>, vector<16x8xf32>
    %c0_1 = arith.constant 0 : index
    %c0_2 = arith.constant 0 : index
    %1 = vector.load %arg6[%c0_1, %c0_2] : memref<8x32xf32, #tpu.memory_space<vmem>>, vector<8x32xf32>
    %cst = arith.constant dense<0.000000e+00> : vector<16x32xf32>
    %2 = tpu.matmul %0, %1, %cst {dimension_numbers = #tpu.dot_dimension_numbers<[1], [0], [0], [1], [0, 0, 1, 1], [], []>} : vector<16x8xf32>, vector<8x32xf32>, vector<16x32xf32> -> vector<16x32xf32>
    %c0_3 = arith.constant 0 : index
    %c0_4 = arith.constant 0 : index
    %3 = vector.load %arg7[%c0_3, %c0_4] : memref<1x32xf32, #tpu.memory_space<vmem>>, vector<1x32xf32>
    %4 = vector.broadcast %3 : vector<1x32xf32> to vector<16x32xf32>
    %5 = arith.addf %2, %4 : vector<16x32xf32>
    %c0_5 = arith.constant 0 : index
    %c0_6 = arith.constant 0 : index
    %c0_7 = arith.constant 0 : index
    %6 = vector.load %arg1[%c0_5, %c0_6, %c0_7] : memref<2x16x16xf32, #tpu.memory_space<vmem>>, vector<1x16x16xf32>
    %7 = vector.shape_cast %6 : vector<1x16x16xf32> to vector<16x16xf32>
    %cst_8 = arith.constant dense<0.000000e+00> : vector<16x32xf32>
    %8 = tpu.matmul %7, %5, %cst_8 {dimension_numbers = #tpu.dot_dimension_numbers<[1], [0], [0], [1], [0, 0, 1, 1], [], []>} : vector<16x16xf32>, vector<16x32xf32>, vector<16x32xf32> -> vector<16x32xf32>
    %c0_9 = arith.constant 0 : index
    %c0_10 = arith.constant 0 : index
    %c0_11 = arith.constant 0 : index
    %9 = vector.load %arg8[%c0_9, %c0_10, %c0_11] : memref<2x32x32xf32, #tpu.memory_space<vmem>>, vector<1x32x32xf32>
    %10 = vector.shape_cast %9 : vector<1x32x32xf32> to vector<32x32xf32>
    %cst_12 = arith.constant dense<0.000000e+00> : vector<16x32xf32>
    %11 = tpu.matmul %8, %10, %cst_12 {dimension_numbers = #tpu.dot_dimension_numbers<[1], [0], [0], [1], [0, 0, 1, 1], [], []>} : vector<16x32xf32>, vector<32x32xf32>, vector<16x32xf32> -> vector<16x32xf32>
    %c0_13 = arith.constant 0 : index
    %c0_14 = arith.constant 0 : index
    %c0_15 = arith.constant 0 : index
    %12 = vector.load %arg9[%c0_13, %c0_14, %c0_15] : memref<2x1x32xf32, #tpu.memory_space<vmem>>, vector<1x1x32xf32>
    %13 = vector.shape_cast %12 : vector<1x1x32xf32> to vector<1x32xf32>
    %14 = vector.broadcast %13 : vector<1x32xf32> to vector<16x32xf32>
    %15 = arith.addf %11, %14 : vector<16x32xf32>
    %cst_16 = arith.constant 0.000000e+00 : f32
    %16 = vector.broadcast %cst_16 : f32 to vector<16x32xf32>
    %17 = arith.maximumf %15, %16 : vector<16x32xf32>
    %c0_17 = arith.constant 0 : index
    %c0_18 = arith.constant 0 : index
    %c0_19 = arith.constant 0 : index
    %18 = vector.load %arg10[%c0_17, %c0_18, %c0_19] : memref<2x32x32xf32, #tpu.memory_space<vmem>>, vector<1x32x32xf32>
    %19 = vector.shape_cast %18 : vector<1x32x32xf32> to vector<32x32xf32>
    %cst_20 = arith.constant dense<0.000000e+00> : vector<16x32xf32>
    %20 = tpu.matmul %17, %19, %cst_20 {dimension_numbers = #tpu.dot_dimension_numbers<[1], [0], [0], [1], [0, 0, 1, 1], [], []>} : vector<16x32xf32>, vector<32x32xf32>, vector<16x32xf32> -> vector<16x32xf32>
    %c0_21 = arith.constant 0 : index
    %c0_22 = arith.constant 0 : index
    %c0_23 = arith.constant 0 : index
    %21 = vector.load %arg11[%c0_21, %c0_22, %c0_23] : memref<2x1x32xf32, #tpu.memory_space<vmem>>, vector<1x1x32xf32>
    %22 = vector.shape_cast %21 : vector<1x1x32xf32> to vector<1x32xf32>
    %23 = vector.broadcast %22 : vector<1x32xf32> to vector<16x32xf32>
    %24 = arith.addf %20, %23 : vector<16x32xf32>
    %cst_24 = arith.constant 0.000000e+00 : f32
    %25 = vector.broadcast %cst_24 : f32 to vector<16x32xf32>
    %26 = arith.maximumf %24, %25 : vector<16x32xf32>
    %c0_25 = arith.constant 0 : index
    %c0_26 = arith.constant 0 : index
    %c0_27 = arith.constant 0 : index
    %27 = vector.load %arg12[%c0_25, %c0_26, %c0_27] : memref<2x1x32xf32, #tpu.memory_space<vmem>>, vector<1x1x32xf32>
    %28 = vector.shape_cast %27 : vector<1x1x32xf32> to vector<1x32xf32>
    %29 = vector.broadcast %28 : vector<1x32xf32> to vector<16x32xf32>
    %30 = arith.mulf %26, %29 : vector<16x32xf32>
    %c0_28 = arith.constant 0 : index
    %c0_29 = arith.constant 0 : index
    %c0_30 = arith.constant 0 : index
    %31 = vector.load %arg13[%c0_28, %c0_29, %c0_30] : memref<2x1x32xf32, #tpu.memory_space<vmem>>, vector<1x1x32xf32>
    %32 = vector.shape_cast %31 : vector<1x1x32xf32> to vector<1x32xf32>
    %33 = vector.broadcast %32 : vector<1x32xf32> to vector<16x32xf32>
    %34 = arith.addf %30, %33 : vector<16x32xf32>
    %cst_31 = arith.constant 0.000000e+00 : f32
    %35 = vector.broadcast %cst_31 : f32 to vector<16x32xf32>
    %36 = arith.maximumf %34, %35 : vector<16x32xf32>
    %37 = arith.addf %5, %36 : vector<16x32xf32>
    %c1 = arith.constant 1 : index
    %c0_32 = arith.constant 0 : index
    %c0_33 = arith.constant 0 : index
    %38 = vector.load %arg1[%c1, %c0_32, %c0_33] : memref<2x16x16xf32, #tpu.memory_space<vmem>>, vector<1x16x16xf32>
    %39 = vector.shape_cast %38 : vector<1x16x16xf32> to vector<16x16xf32>
    %cst_34 = arith.constant dense<0.000000e+00> : vector<16x32xf32>
    %40 = tpu.matmul %39, %37, %cst_34 {dimension_numbers = #tpu.dot_dimension_numbers<[1], [0], [0], [1], [0, 0, 1, 1], [], []>} : vector<16x16xf32>, vector<16x32xf32>, vector<16x32xf32> -> vector<16x32xf32>
    %c1_35 = arith.constant 1 : index
    %c0_36 = arith.constant 0 : index
    %c0_37 = arith.constant 0 : index
    %41 = vector.load %arg8[%c1_35, %c0_36, %c0_37] : memref<2x32x32xf32, #tpu.memory_space<vmem>>, vector<1x32x32xf32>
    %42 = vector.shape_cast %41 : vector<1x32x32xf32> to vector<32x32xf32>
    %cst_38 = arith.constant dense<0.000000e+00> : vector<16x32xf32>
    %43 = tpu.matmul %40, %42, %cst_38 {dimension_numbers = #tpu.dot_dimension_numbers<[1], [0], [0], [1], [0, 0, 1, 1], [], []>} : vector<16x32xf32>, vector<32x32xf32>, vector<16x32xf32> -> vector<16x32xf32>
    %c1_39 = arith.constant 1 : index
    %c0_40 = arith.constant 0 : index
    %c0_41 = arith.constant 0 : index
    %44 = vector.load %arg9[%c1_39, %c0_40, %c0_41] : memref<2x1x32xf32, #tpu.memory_space<vmem>>, vector<1x1x32xf32>
    %45 = vector.shape_cast %44 : vector<1x1x32xf32> to vector<1x32xf32>
    %46 = vector.broadcast %45 : vector<1x32xf32> to vector<16x32xf32>
    %47 = arith.addf %43, %46 : vector<16x32xf32>
    %cst_42 = arith.constant 0.000000e+00 : f32
    %48 = vector.broadcast %cst_42 : f32 to vector<16x32xf32>
    %49 = arith.maximumf %47, %48 : vector<16x32xf32>
    %c1_43 = arith.constant 1 : index
    %c0_44 = arith.constant 0 : index
    %c0_45 = arith.constant 0 : index
    %50 = vector.load %arg10[%c1_43, %c0_44, %c0_45] : memref<2x32x32xf32, #tpu.memory_space<vmem>>, vector<1x32x32xf32>
    %51 = vector.shape_cast %50 : vector<1x32x32xf32> to vector<32x32xf32>
    %cst_46 = arith.constant dense<0.000000e+00> : vector<16x32xf32>
    %52 = tpu.matmul %49, %51, %cst_46 {dimension_numbers = #tpu.dot_dimension_numbers<[1], [0], [0], [1], [0, 0, 1, 1], [], []>} : vector<16x32xf32>, vector<32x32xf32>, vector<16x32xf32> -> vector<16x32xf32>
    %c1_47 = arith.constant 1 : index
    %c0_48 = arith.constant 0 : index
    %c0_49 = arith.constant 0 : index
    %53 = vector.load %arg11[%c1_47, %c0_48, %c0_49] : memref<2x1x32xf32, #tpu.memory_space<vmem>>, vector<1x1x32xf32>
    %54 = vector.shape_cast %53 : vector<1x1x32xf32> to vector<1x32xf32>
    %55 = vector.broadcast %54 : vector<1x32xf32> to vector<16x32xf32>
    %56 = arith.addf %52, %55 : vector<16x32xf32>
    %cst_50 = arith.constant 0.000000e+00 : f32
    %57 = vector.broadcast %cst_50 : f32 to vector<16x32xf32>
    %58 = arith.maximumf %56, %57 : vector<16x32xf32>
    %c1_51 = arith.constant 1 : index
    %c0_52 = arith.constant 0 : index
    %c0_53 = arith.constant 0 : index
    %59 = vector.load %arg12[%c1_51, %c0_52, %c0_53] : memref<2x1x32xf32, #tpu.memory_space<vmem>>, vector<1x1x32xf32>
    %60 = vector.shape_cast %59 : vector<1x1x32xf32> to vector<1x32xf32>
    %61 = vector.broadcast %60 : vector<1x32xf32> to vector<16x32xf32>
    %62 = arith.mulf %58, %61 : vector<16x32xf32>
    %c1_54 = arith.constant 1 : index
    %c0_55 = arith.constant 0 : index
    %c0_56 = arith.constant 0 : index
    %63 = vector.load %arg13[%c1_54, %c0_55, %c0_56] : memref<2x1x32xf32, #tpu.memory_space<vmem>>, vector<1x1x32xf32>
    %64 = vector.shape_cast %63 : vector<1x1x32xf32> to vector<1x32xf32>
    %65 = vector.broadcast %64 : vector<1x32xf32> to vector<16x32xf32>
    %66 = arith.addf %62, %65 : vector<16x32xf32>
    %cst_57 = arith.constant 0.000000e+00 : f32
    %67 = vector.broadcast %cst_57 : f32 to vector<16x32xf32>
    %68 = arith.maximumf %66, %67 : vector<16x32xf32>
    %69 = arith.addf %37, %68 : vector<16x32xf32>
    %c0_58 = arith.constant 0 : index
    %c0_59 = arith.constant 0 : index
    %c0_60 = arith.constant 0 : index
    %70 = vector.load %arg20[%c0_58, %c0_59, %c0_60] : memref<7x32x32xf32, #tpu.memory_space<vmem>>, vector<1x32x32xf32>
    %71 = vector.shape_cast %70 : vector<1x32x32xf32> to vector<32x32xf32>
    %cst_61 = arith.constant dense<0.000000e+00> : vector<16x32xf32>
    %72 = tpu.matmul %69, %71, %cst_61 {dimension_numbers = #tpu.dot_dimension_numbers<[1], [0], [0], [1], [0, 0, 1, 1], [], []>} : vector<16x32xf32>, vector<32x32xf32>, vector<16x32xf32> -> vector<16x32xf32>
    %c0_62 = arith.constant 0 : index
    %c0_63 = arith.constant 0 : index
    %c0_64 = arith.constant 0 : index
    %73 = vector.load %arg21[%c0_62, %c0_63, %c0_64] : memref<7x1x32xf32, #tpu.memory_space<vmem>>, vector<1x1x32xf32>
    %74 = vector.shape_cast %73 : vector<1x1x32xf32> to vector<1x32xf32>
    %75 = vector.broadcast %74 : vector<1x32xf32> to vector<16x32xf32>
    %76 = arith.addf %72, %75 : vector<16x32xf32>
    %cst_65 = arith.constant 0.000000e+00 : f32
    %77 = vector.broadcast %cst_65 : f32 to vector<16x32xf32>
    %78 = arith.maximumf %76, %77 : vector<16x32xf32>
    %c1_66 = arith.constant 1 : index
    %c0_67 = arith.constant 0 : index
    %c0_68 = arith.constant 0 : index
    %79 = vector.load %arg20[%c1_66, %c0_67, %c0_68] : memref<7x32x32xf32, #tpu.memory_space<vmem>>, vector<1x32x32xf32>
    %80 = vector.shape_cast %79 : vector<1x32x32xf32> to vector<32x32xf32>
    %cst_69 = arith.constant dense<0.000000e+00> : vector<16x32xf32>
    %81 = tpu.matmul %78, %80, %cst_69 {dimension_numbers = #tpu.dot_dimension_numbers<[1], [0], [0], [1], [0, 0, 1, 1], [], []>} : vector<16x32xf32>, vector<32x32xf32>, vector<16x32xf32> -> vector<16x32xf32>
    %c1_70 = arith.constant 1 : index
    %c0_71 = arith.constant 0 : index
    %c0_72 = arith.constant 0 : index
    %82 = vector.load %arg21[%c1_70, %c0_71, %c0_72] : memref<7x1x32xf32, #tpu.memory_space<vmem>>, vector<1x1x32xf32>
    %83 = vector.shape_cast %82 : vector<1x1x32xf32> to vector<1x32xf32>
    %84 = vector.broadcast %83 : vector<1x32xf32> to vector<16x32xf32>
    %85 = arith.addf %81, %84 : vector<16x32xf32>
    %cst_73 = arith.constant 0.000000e+00 : f32
    %86 = vector.broadcast %cst_73 : f32 to vector<16x32xf32>
    %87 = arith.maximumf %85, %86 : vector<16x32xf32>
    %c2 = arith.constant 2 : index
    %c0_74 = arith.constant 0 : index
    %c0_75 = arith.constant 0 : index
    %88 = vector.load %arg20[%c2, %c0_74, %c0_75] : memref<7x32x32xf32, #tpu.memory_space<vmem>>, vector<1x32x32xf32>
    %89 = vector.shape_cast %88 : vector<1x32x32xf32> to vector<32x32xf32>
    %cst_76 = arith.constant dense<0.000000e+00> : vector<16x32xf32>
    %90 = tpu.matmul %87, %89, %cst_76 {dimension_numbers = #tpu.dot_dimension_numbers<[1], [0], [0], [1], [0, 0, 1, 1], [], []>} : vector<16x32xf32>, vector<32x32xf32>, vector<16x32xf32> -> vector<16x32xf32>
    %c2_77 = arith.constant 2 : index
    %c0_78 = arith.constant 0 : index
    %c0_79 = arith.constant 0 : index
    %91 = vector.load %arg21[%c2_77, %c0_78, %c0_79] : memref<7x1x32xf32, #tpu.memory_space<vmem>>, vector<1x1x32xf32>
    %92 = vector.shape_cast %91 : vector<1x1x32xf32> to vector<1x32xf32>
    %93 = vector.broadcast %92 : vector<1x32xf32> to vector<16x32xf32>
    %94 = arith.addf %90, %93 : vector<16x32xf32>
    %cst_80 = arith.constant 0.000000e+00 : f32
    %95 = vector.broadcast %cst_80 : f32 to vector<16x32xf32>
    %96 = arith.maximumf %94, %95 : vector<16x32xf32>
    %c3 = arith.constant 3 : index
    %c0_81 = arith.constant 0 : index
    %c0_82 = arith.constant 0 : index
    %97 = vector.load %arg20[%c3, %c0_81, %c0_82] : memref<7x32x32xf32, #tpu.memory_space<vmem>>, vector<1x32x32xf32>
    %98 = vector.shape_cast %97 : vector<1x32x32xf32> to vector<32x32xf32>
    %cst_83 = arith.constant dense<0.000000e+00> : vector<16x32xf32>
    %99 = tpu.matmul %96, %98, %cst_83 {dimension_numbers = #tpu.dot_dimension_numbers<[1], [0], [0], [1], [0, 0, 1, 1], [], []>} : vector<16x32xf32>, vector<32x32xf32>, vector<16x32xf32> -> vector<16x32xf32>
    %c3_84 = arith.constant 3 : index
    %c0_85 = arith.constant 0 : index
    %c0_86 = arith.constant 0 : index
    %100 = vector.load %arg21[%c3_84, %c0_85, %c0_86] : memref<7x1x32xf32, #tpu.memory_space<vmem>>, vector<1x1x32xf32>
    %101 = vector.shape_cast %100 : vector<1x1x32xf32> to vector<1x32xf32>
    %102 = vector.broadcast %101 : vector<1x32xf32> to vector<16x32xf32>
    %103 = arith.addf %99, %102 : vector<16x32xf32>
    %cst_87 = arith.constant 0.000000e+00 : f32
    %104 = vector.broadcast %cst_87 : f32 to vector<16x32xf32>
    %105 = arith.maximumf %103, %104 : vector<16x32xf32>
    %c4 = arith.constant 4 : index
    %c0_88 = arith.constant 0 : index
    %c0_89 = arith.constant 0 : index
    %106 = vector.load %arg20[%c4, %c0_88, %c0_89] : memref<7x32x32xf32, #tpu.memory_space<vmem>>, vector<1x32x32xf32>
    %107 = vector.shape_cast %106 : vector<1x32x32xf32> to vector<32x32xf32>
    %cst_90 = arith.constant dense<0.000000e+00> : vector<16x32xf32>
    %108 = tpu.matmul %105, %107, %cst_90 {dimension_numbers = #tpu.dot_dimension_numbers<[1], [0], [0], [1], [0, 0, 1, 1], [], []>} : vector<16x32xf32>, vector<32x32xf32>, vector<16x32xf32> -> vector<16x32xf32>
    %c4_91 = arith.constant 4 : index
    %c0_92 = arith.constant 0 : index
    %c0_93 = arith.constant 0 : index
    %109 = vector.load %arg21[%c4_91, %c0_92, %c0_93] : memref<7x1x32xf32, #tpu.memory_space<vmem>>, vector<1x1x32xf32>
    %110 = vector.shape_cast %109 : vector<1x1x32xf32> to vector<1x32xf32>
    %111 = vector.broadcast %110 : vector<1x32xf32> to vector<16x32xf32>
    %112 = arith.addf %108, %111 : vector<16x32xf32>
    %cst_94 = arith.constant 0.000000e+00 : f32
    %113 = vector.broadcast %cst_94 : f32 to vector<16x32xf32>
    %114 = arith.maximumf %112, %113 : vector<16x32xf32>
    %c5 = arith.constant 5 : index
    %c0_95 = arith.constant 0 : index
    %c0_96 = arith.constant 0 : index
    %115 = vector.load %arg20[%c5, %c0_95, %c0_96] : memref<7x32x32xf32, #tpu.memory_space<vmem>>, vector<1x32x32xf32>
    %116 = vector.shape_cast %115 : vector<1x32x32xf32> to vector<32x32xf32>
    %cst_97 = arith.constant dense<0.000000e+00> : vector<16x32xf32>
    %117 = tpu.matmul %114, %116, %cst_97 {dimension_numbers = #tpu.dot_dimension_numbers<[1], [0], [0], [1], [0, 0, 1, 1], [], []>} : vector<16x32xf32>, vector<32x32xf32>, vector<16x32xf32> -> vector<16x32xf32>
    %c5_98 = arith.constant 5 : index
    %c0_99 = arith.constant 0 : index
    %c0_100 = arith.constant 0 : index
    %118 = vector.load %arg21[%c5_98, %c0_99, %c0_100] : memref<7x1x32xf32, #tpu.memory_space<vmem>>, vector<1x1x32xf32>
    %119 = vector.shape_cast %118 : vector<1x1x32xf32> to vector<1x32xf32>
    %120 = vector.broadcast %119 : vector<1x32xf32> to vector<16x32xf32>
    %121 = arith.addf %117, %120 : vector<16x32xf32>
    %cst_101 = arith.constant 0.000000e+00 : f32
    %122 = vector.broadcast %cst_101 : f32 to vector<16x32xf32>
    %123 = arith.maximumf %121, %122 : vector<16x32xf32>
    %c6 = arith.constant 6 : index
    %c0_102 = arith.constant 0 : index
    %c0_103 = arith.constant 0 : index
    %124 = vector.load %arg20[%c6, %c0_102, %c0_103] : memref<7x32x32xf32, #tpu.memory_space<vmem>>, vector<1x32x32xf32>
    %125 = vector.shape_cast %124 : vector<1x32x32xf32> to vector<32x32xf32>
    %cst_104 = arith.constant dense<0.000000e+00> : vector<16x32xf32>
    %126 = tpu.matmul %123, %125, %cst_104 {dimension_numbers = #tpu.dot_dimension_numbers<[1], [0], [0], [1], [0, 0, 1, 1], [], []>} : vector<16x32xf32>, vector<32x32xf32>, vector<16x32xf32> -> vector<16x32xf32>
    %c6_105 = arith.constant 6 : index
    %c0_106 = arith.constant 0 : index
    %c0_107 = arith.constant 0 : index
    %127 = vector.load %arg21[%c6_105, %c0_106, %c0_107] : memref<7x1x32xf32, #tpu.memory_space<vmem>>, vector<1x1x32xf32>
    %128 = vector.shape_cast %127 : vector<1x1x32xf32> to vector<1x32xf32>
    %129 = vector.broadcast %128 : vector<1x32xf32> to vector<16x32xf32>
    %130 = arith.addf %126, %129 : vector<16x32xf32>
    %cst_108 = arith.constant 0.000000e+00 : f32
    %131 = vector.broadcast %cst_108 : f32 to vector<16x32xf32>
    %132 = arith.maximumf %130, %131 : vector<16x32xf32>
    %c0_109 = arith.constant 0 : index
    %c0_110 = arith.constant 0 : index
    %133 = vector.load %arg22[%c0_109, %c0_110] : memref<32x16xf32, #tpu.memory_space<vmem>>, vector<32x16xf32>
    %cst_111 = arith.constant dense<0.000000e+00> : vector<16x16xf32>
    %134 = tpu.matmul %132, %133, %cst_111 {dimension_numbers = #tpu.dot_dimension_numbers<[1], [0], [0], [1], [0, 0, 1, 1], [], []>} : vector<16x32xf32>, vector<32x16xf32>, vector<16x16xf32> -> vector<16x16xf32>
    %c0_112 = arith.constant 0 : index
    %c0_113 = arith.constant 0 : index
    %135 = vector.load %arg23[%c0_112, %c0_113] : memref<1x16xf32, #tpu.memory_space<vmem>>, vector<1x16xf32>
    %136 = vector.broadcast %135 : vector<1x16xf32> to vector<16x16xf32>
    %137 = arith.addf %134, %136 : vector<16x16xf32>
    %c0_114 = arith.constant 0 : index
    %c0_115 = arith.constant 0 : index
    %138 = vector.load %arg2[%c0_114, %c0_115] : memref<8x8xf32, #tpu.memory_space<vmem>>, vector<8x8xf32>
    %c0_116 = arith.constant 0 : index
    %c0_117 = arith.constant 0 : index
    %139 = vector.load %arg6[%c0_116, %c0_117] : memref<8x32xf32, #tpu.memory_space<vmem>>, vector<8x32xf32>
    %cst_118 = arith.constant dense<0.000000e+00> : vector<8x32xf32>
    %140 = tpu.matmul %138, %139, %cst_118 {dimension_numbers = #tpu.dot_dimension_numbers<[1], [0], [0], [1], [0, 0, 1, 1], [], []>} : vector<8x8xf32>, vector<8x32xf32>, vector<8x32xf32> -> vector<8x32xf32>
    %c0_119 = arith.constant 0 : index
    %c0_120 = arith.constant 0 : index
    %141 = vector.load %arg7[%c0_119, %c0_120] : memref<1x32xf32, #tpu.memory_space<vmem>>, vector<1x32xf32>
    %142 = vector.broadcast %141 : vector<1x32xf32> to vector<8x32xf32>
    %143 = arith.addf %140, %142 : vector<8x32xf32>
    %c0_121 = arith.constant 0 : index
    %c0_122 = arith.constant 0 : index
    %c0_123 = arith.constant 0 : index
    %144 = vector.load %arg3[%c0_121, %c0_122, %c0_123] : memref<2x8x8xf32, #tpu.memory_space<vmem>>, vector<1x8x8xf32>
    %145 = vector.shape_cast %144 : vector<1x8x8xf32> to vector<8x8xf32>
    %cst_124 = arith.constant dense<0.000000e+00> : vector<8x32xf32>
    %146 = tpu.matmul %145, %143, %cst_124 {dimension_numbers = #tpu.dot_dimension_numbers<[1], [0], [0], [1], [0, 0, 1, 1], [], []>} : vector<8x8xf32>, vector<8x32xf32>, vector<8x32xf32> -> vector<8x32xf32>
    %c0_125 = arith.constant 0 : index
    %c0_126 = arith.constant 0 : index
    %c0_127 = arith.constant 0 : index
    %147 = vector.load %arg14[%c0_125, %c0_126, %c0_127] : memref<2x32x32xf32, #tpu.memory_space<vmem>>, vector<1x32x32xf32>
    %148 = vector.shape_cast %147 : vector<1x32x32xf32> to vector<32x32xf32>
    %cst_128 = arith.constant dense<0.000000e+00> : vector<8x32xf32>
    %149 = tpu.matmul %146, %148, %cst_128 {dimension_numbers = #tpu.dot_dimension_numbers<[1], [0], [0], [1], [0, 0, 1, 1], [], []>} : vector<8x32xf32>, vector<32x32xf32>, vector<8x32xf32> -> vector<8x32xf32>
    %c0_129 = arith.constant 0 : index
    %c0_130 = arith.constant 0 : index
    %c0_131 = arith.constant 0 : index
    %150 = vector.load %arg15[%c0_129, %c0_130, %c0_131] : memref<2x1x32xf32, #tpu.memory_space<vmem>>, vector<1x1x32xf32>
    %151 = vector.shape_cast %150 : vector<1x1x32xf32> to vector<1x32xf32>
    %152 = vector.broadcast %151 : vector<1x32xf32> to vector<8x32xf32>
    %153 = arith.addf %149, %152 : vector<8x32xf32>
    %cst_132 = arith.constant 0.000000e+00 : f32
    %154 = vector.broadcast %cst_132 : f32 to vector<8x32xf32>
    %155 = arith.maximumf %153, %154 : vector<8x32xf32>
    %c0_133 = arith.constant 0 : index
    %c0_134 = arith.constant 0 : index
    %c0_135 = arith.constant 0 : index
    %156 = vector.load %arg16[%c0_133, %c0_134, %c0_135] : memref<2x32x32xf32, #tpu.memory_space<vmem>>, vector<1x32x32xf32>
    %157 = vector.shape_cast %156 : vector<1x32x32xf32> to vector<32x32xf32>
    %cst_136 = arith.constant dense<0.000000e+00> : vector<8x32xf32>
    %158 = tpu.matmul %155, %157, %cst_136 {dimension_numbers = #tpu.dot_dimension_numbers<[1], [0], [0], [1], [0, 0, 1, 1], [], []>} : vector<8x32xf32>, vector<32x32xf32>, vector<8x32xf32> -> vector<8x32xf32>
    %c0_137 = arith.constant 0 : index
    %c0_138 = arith.constant 0 : index
    %c0_139 = arith.constant 0 : index
    %159 = vector.load %arg17[%c0_137, %c0_138, %c0_139] : memref<2x1x32xf32, #tpu.memory_space<vmem>>, vector<1x1x32xf32>
    %160 = vector.shape_cast %159 : vector<1x1x32xf32> to vector<1x32xf32>
    %161 = vector.broadcast %160 : vector<1x32xf32> to vector<8x32xf32>
    %162 = arith.addf %158, %161 : vector<8x32xf32>
    %cst_140 = arith.constant 0.000000e+00 : f32
    %163 = vector.broadcast %cst_140 : f32 to vector<8x32xf32>
    %164 = arith.maximumf %162, %163 : vector<8x32xf32>
    %c0_141 = arith.constant 0 : index
    %c0_142 = arith.constant 0 : index
    %c0_143 = arith.constant 0 : index
    %165 = vector.load %arg18[%c0_141, %c0_142, %c0_143] : memref<2x1x32xf32, #tpu.memory_space<vmem>>, vector<1x1x32xf32>
    %166 = vector.shape_cast %165 : vector<1x1x32xf32> to vector<1x32xf32>
    %167 = vector.broadcast %166 : vector<1x32xf32> to vector<8x32xf32>
    %168 = arith.mulf %164, %167 : vector<8x32xf32>
    %c0_144 = arith.constant 0 : index
    %c0_145 = arith.constant 0 : index
    %c0_146 = arith.constant 0 : index
    %169 = vector.load %arg19[%c0_144, %c0_145, %c0_146] : memref<2x1x32xf32, #tpu.memory_space<vmem>>, vector<1x1x32xf32>
    %170 = vector.shape_cast %169 : vector<1x1x32xf32> to vector<1x32xf32>
    %171 = vector.broadcast %170 : vector<1x32xf32> to vector<8x32xf32>
    %172 = arith.addf %168, %171 : vector<8x32xf32>
    %cst_147 = arith.constant 0.000000e+00 : f32
    %173 = vector.broadcast %cst_147 : f32 to vector<8x32xf32>
    %174 = arith.maximumf %172, %173 : vector<8x32xf32>
    %175 = arith.addf %143, %174 : vector<8x32xf32>
    %c1_148 = arith.constant 1 : index
    %c0_149 = arith.constant 0 : index
    %c0_150 = arith.constant 0 : index
    %176 = vector.load %arg3[%c1_148, %c0_149, %c0_150] : memref<2x8x8xf32, #tpu.memory_space<vmem>>, vector<1x8x8xf32>
    %177 = vector.shape_cast %176 : vector<1x8x8xf32> to vector<8x8xf32>
    %cst_151 = arith.constant dense<0.000000e+00> : vector<8x32xf32>
    %178 = tpu.matmul %177, %175, %cst_151 {dimension_numbers = #tpu.dot_dimension_numbers<[1], [0], [0], [1], [0, 0, 1, 1], [], []>} : vector<8x8xf32>, vector<8x32xf32>, vector<8x32xf32> -> vector<8x32xf32>
    %c1_152 = arith.constant 1 : index
    %c0_153 = arith.constant 0 : index
    %c0_154 = arith.constant 0 : index
    %179 = vector.load %arg14[%c1_152, %c0_153, %c0_154] : memref<2x32x32xf32, #tpu.memory_space<vmem>>, vector<1x32x32xf32>
    %180 = vector.shape_cast %179 : vector<1x32x32xf32> to vector<32x32xf32>
    %cst_155 = arith.constant dense<0.000000e+00> : vector<8x32xf32>
    %181 = tpu.matmul %178, %180, %cst_155 {dimension_numbers = #tpu.dot_dimension_numbers<[1], [0], [0], [1], [0, 0, 1, 1], [], []>} : vector<8x32xf32>, vector<32x32xf32>, vector<8x32xf32> -> vector<8x32xf32>
    %c1_156 = arith.constant 1 : index
    %c0_157 = arith.constant 0 : index
    %c0_158 = arith.constant 0 : index
    %182 = vector.load %arg15[%c1_156, %c0_157, %c0_158] : memref<2x1x32xf32, #tpu.memory_space<vmem>>, vector<1x1x32xf32>
    %183 = vector.shape_cast %182 : vector<1x1x32xf32> to vector<1x32xf32>
    %184 = vector.broadcast %183 : vector<1x32xf32> to vector<8x32xf32>
    %185 = arith.addf %181, %184 : vector<8x32xf32>
    %cst_159 = arith.constant 0.000000e+00 : f32
    %186 = vector.broadcast %cst_159 : f32 to vector<8x32xf32>
    %187 = arith.maximumf %185, %186 : vector<8x32xf32>
    %c1_160 = arith.constant 1 : index
    %c0_161 = arith.constant 0 : index
    %c0_162 = arith.constant 0 : index
    %188 = vector.load %arg16[%c1_160, %c0_161, %c0_162] : memref<2x32x32xf32, #tpu.memory_space<vmem>>, vector<1x32x32xf32>
    %189 = vector.shape_cast %188 : vector<1x32x32xf32> to vector<32x32xf32>
    %cst_163 = arith.constant dense<0.000000e+00> : vector<8x32xf32>
    %190 = tpu.matmul %187, %189, %cst_163 {dimension_numbers = #tpu.dot_dimension_numbers<[1], [0], [0], [1], [0, 0, 1, 1], [], []>} : vector<8x32xf32>, vector<32x32xf32>, vector<8x32xf32> -> vector<8x32xf32>
    %c1_164 = arith.constant 1 : index
    %c0_165 = arith.constant 0 : index
    %c0_166 = arith.constant 0 : index
    %191 = vector.load %arg17[%c1_164, %c0_165, %c0_166] : memref<2x1x32xf32, #tpu.memory_space<vmem>>, vector<1x1x32xf32>
    %192 = vector.shape_cast %191 : vector<1x1x32xf32> to vector<1x32xf32>
    %193 = vector.broadcast %192 : vector<1x32xf32> to vector<8x32xf32>
    %194 = arith.addf %190, %193 : vector<8x32xf32>
    %cst_167 = arith.constant 0.000000e+00 : f32
    %195 = vector.broadcast %cst_167 : f32 to vector<8x32xf32>
    %196 = arith.maximumf %194, %195 : vector<8x32xf32>
    %c1_168 = arith.constant 1 : index
    %c0_169 = arith.constant 0 : index
    %c0_170 = arith.constant 0 : index
    %197 = vector.load %arg18[%c1_168, %c0_169, %c0_170] : memref<2x1x32xf32, #tpu.memory_space<vmem>>, vector<1x1x32xf32>
    %198 = vector.shape_cast %197 : vector<1x1x32xf32> to vector<1x32xf32>
    %199 = vector.broadcast %198 : vector<1x32xf32> to vector<8x32xf32>
    %200 = arith.mulf %196, %199 : vector<8x32xf32>
    %c1_171 = arith.constant 1 : index
    %c0_172 = arith.constant 0 : index
    %c0_173 = arith.constant 0 : index
    %201 = vector.load %arg19[%c1_171, %c0_172, %c0_173] : memref<2x1x32xf32, #tpu.memory_space<vmem>>, vector<1x1x32xf32>
    %202 = vector.shape_cast %201 : vector<1x1x32xf32> to vector<1x32xf32>
    %203 = vector.broadcast %202 : vector<1x32xf32> to vector<8x32xf32>
    %204 = arith.addf %200, %203 : vector<8x32xf32>
    %cst_174 = arith.constant 0.000000e+00 : f32
    %205 = vector.broadcast %cst_174 : f32 to vector<8x32xf32>
    %206 = arith.maximumf %204, %205 : vector<8x32xf32>
    %207 = arith.addf %175, %206 : vector<8x32xf32>
    %c0_175 = arith.constant 0 : index
    %c0_176 = arith.constant 0 : index
    %c0_177 = arith.constant 0 : index
    %208 = vector.load %arg24[%c0_175, %c0_176, %c0_177] : memref<7x32x32xf32, #tpu.memory_space<vmem>>, vector<1x32x32xf32>
    %209 = vector.shape_cast %208 : vector<1x32x32xf32> to vector<32x32xf32>
    %cst_178 = arith.constant dense<0.000000e+00> : vector<8x32xf32>
    %210 = tpu.matmul %207, %209, %cst_178 {dimension_numbers = #tpu.dot_dimension_numbers<[1], [0], [0], [1], [0, 0, 1, 1], [], []>} : vector<8x32xf32>, vector<32x32xf32>, vector<8x32xf32> -> vector<8x32xf32>
    %c0_179 = arith.constant 0 : index
    %c0_180 = arith.constant 0 : index
    %c0_181 = arith.constant 0 : index
    %211 = vector.load %arg25[%c0_179, %c0_180, %c0_181] : memref<7x1x32xf32, #tpu.memory_space<vmem>>, vector<1x1x32xf32>
    %212 = vector.shape_cast %211 : vector<1x1x32xf32> to vector<1x32xf32>
    %213 = vector.broadcast %212 : vector<1x32xf32> to vector<8x32xf32>
    %214 = arith.addf %210, %213 : vector<8x32xf32>
    %cst_182 = arith.constant 0.000000e+00 : f32
    %215 = vector.broadcast %cst_182 : f32 to vector<8x32xf32>
    %216 = arith.maximumf %214, %215 : vector<8x32xf32>
    %c1_183 = arith.constant 1 : index
    %c0_184 = arith.constant 0 : index
    %c0_185 = arith.constant 0 : index
    %217 = vector.load %arg24[%c1_183, %c0_184, %c0_185] : memref<7x32x32xf32, #tpu.memory_space<vmem>>, vector<1x32x32xf32>
    %218 = vector.shape_cast %217 : vector<1x32x32xf32> to vector<32x32xf32>
    %cst_186 = arith.constant dense<0.000000e+00> : vector<8x32xf32>
    %219 = tpu.matmul %216, %218, %cst_186 {dimension_numbers = #tpu.dot_dimension_numbers<[1], [0], [0], [1], [0, 0, 1, 1], [], []>} : vector<8x32xf32>, vector<32x32xf32>, vector<8x32xf32> -> vector<8x32xf32>
    %c1_187 = arith.constant 1 : index
    %c0_188 = arith.constant 0 : index
    %c0_189 = arith.constant 0 : index
    %220 = vector.load %arg25[%c1_187, %c0_188, %c0_189] : memref<7x1x32xf32, #tpu.memory_space<vmem>>, vector<1x1x32xf32>
    %221 = vector.shape_cast %220 : vector<1x1x32xf32> to vector<1x32xf32>
    %222 = vector.broadcast %221 : vector<1x32xf32> to vector<8x32xf32>
    %223 = arith.addf %219, %222 : vector<8x32xf32>
    %cst_190 = arith.constant 0.000000e+00 : f32
    %224 = vector.broadcast %cst_190 : f32 to vector<8x32xf32>
    %225 = arith.maximumf %223, %224 : vector<8x32xf32>
    %c2_191 = arith.constant 2 : index
    %c0_192 = arith.constant 0 : index
    %c0_193 = arith.constant 0 : index
    %226 = vector.load %arg24[%c2_191, %c0_192, %c0_193] : memref<7x32x32xf32, #tpu.memory_space<vmem>>, vector<1x32x32xf32>
    %227 = vector.shape_cast %226 : vector<1x32x32xf32> to vector<32x32xf32>
    %cst_194 = arith.constant dense<0.000000e+00> : vector<8x32xf32>
    %228 = tpu.matmul %225, %227, %cst_194 {dimension_numbers = #tpu.dot_dimension_numbers<[1], [0], [0], [1], [0, 0, 1, 1], [], []>} : vector<8x32xf32>, vector<32x32xf32>, vector<8x32xf32> -> vector<8x32xf32>
    %c2_195 = arith.constant 2 : index
    %c0_196 = arith.constant 0 : index
    %c0_197 = arith.constant 0 : index
    %229 = vector.load %arg25[%c2_195, %c0_196, %c0_197] : memref<7x1x32xf32, #tpu.memory_space<vmem>>, vector<1x1x32xf32>
    %230 = vector.shape_cast %229 : vector<1x1x32xf32> to vector<1x32xf32>
    %231 = vector.broadcast %230 : vector<1x32xf32> to vector<8x32xf32>
    %232 = arith.addf %228, %231 : vector<8x32xf32>
    %cst_198 = arith.constant 0.000000e+00 : f32
    %233 = vector.broadcast %cst_198 : f32 to vector<8x32xf32>
    %234 = arith.maximumf %232, %233 : vector<8x32xf32>
    %c3_199 = arith.constant 3 : index
    %c0_200 = arith.constant 0 : index
    %c0_201 = arith.constant 0 : index
    %235 = vector.load %arg24[%c3_199, %c0_200, %c0_201] : memref<7x32x32xf32, #tpu.memory_space<vmem>>, vector<1x32x32xf32>
    %236 = vector.shape_cast %235 : vector<1x32x32xf32> to vector<32x32xf32>
    %cst_202 = arith.constant dense<0.000000e+00> : vector<8x32xf32>
    %237 = tpu.matmul %234, %236, %cst_202 {dimension_numbers = #tpu.dot_dimension_numbers<[1], [0], [0], [1], [0, 0, 1, 1], [], []>} : vector<8x32xf32>, vector<32x32xf32>, vector<8x32xf32> -> vector<8x32xf32>
    %c3_203 = arith.constant 3 : index
    %c0_204 = arith.constant 0 : index
    %c0_205 = arith.constant 0 : index
    %238 = vector.load %arg25[%c3_203, %c0_204, %c0_205] : memref<7x1x32xf32, #tpu.memory_space<vmem>>, vector<1x1x32xf32>
    %239 = vector.shape_cast %238 : vector<1x1x32xf32> to vector<1x32xf32>
    %240 = vector.broadcast %239 : vector<1x32xf32> to vector<8x32xf32>
    %241 = arith.addf %237, %240 : vector<8x32xf32>
    %cst_206 = arith.constant 0.000000e+00 : f32
    %242 = vector.broadcast %cst_206 : f32 to vector<8x32xf32>
    %243 = arith.maximumf %241, %242 : vector<8x32xf32>
    %c4_207 = arith.constant 4 : index
    %c0_208 = arith.constant 0 : index
    %c0_209 = arith.constant 0 : index
    %244 = vector.load %arg24[%c4_207, %c0_208, %c0_209] : memref<7x32x32xf32, #tpu.memory_space<vmem>>, vector<1x32x32xf32>
    %245 = vector.shape_cast %244 : vector<1x32x32xf32> to vector<32x32xf32>
    %cst_210 = arith.constant dense<0.000000e+00> : vector<8x32xf32>
    %246 = tpu.matmul %243, %245, %cst_210 {dimension_numbers = #tpu.dot_dimension_numbers<[1], [0], [0], [1], [0, 0, 1, 1], [], []>} : vector<8x32xf32>, vector<32x32xf32>, vector<8x32xf32> -> vector<8x32xf32>
    %c4_211 = arith.constant 4 : index
    %c0_212 = arith.constant 0 : index
    %c0_213 = arith.constant 0 : index
    %247 = vector.load %arg25[%c4_211, %c0_212, %c0_213] : memref<7x1x32xf32, #tpu.memory_space<vmem>>, vector<1x1x32xf32>
    %248 = vector.shape_cast %247 : vector<1x1x32xf32> to vector<1x32xf32>
    %249 = vector.broadcast %248 : vector<1x32xf32> to vector<8x32xf32>
    %250 = arith.addf %246, %249 : vector<8x32xf32>
    %cst_214 = arith.constant 0.000000e+00 : f32
    %251 = vector.broadcast %cst_214 : f32 to vector<8x32xf32>
    %252 = arith.maximumf %250, %251 : vector<8x32xf32>
    %c5_215 = arith.constant 5 : index
    %c0_216 = arith.constant 0 : index
    %c0_217 = arith.constant 0 : index
    %253 = vector.load %arg24[%c5_215, %c0_216, %c0_217] : memref<7x32x32xf32, #tpu.memory_space<vmem>>, vector<1x32x32xf32>
    %254 = vector.shape_cast %253 : vector<1x32x32xf32> to vector<32x32xf32>
    %cst_218 = arith.constant dense<0.000000e+00> : vector<8x32xf32>
    %255 = tpu.matmul %252, %254, %cst_218 {dimension_numbers = #tpu.dot_dimension_numbers<[1], [0], [0], [1], [0, 0, 1, 1], [], []>} : vector<8x32xf32>, vector<32x32xf32>, vector<8x32xf32> -> vector<8x32xf32>
    %c5_219 = arith.constant 5 : index
    %c0_220 = arith.constant 0 : index
    %c0_221 = arith.constant 0 : index
    %256 = vector.load %arg25[%c5_219, %c0_220, %c0_221] : memref<7x1x32xf32, #tpu.memory_space<vmem>>, vector<1x1x32xf32>
    %257 = vector.shape_cast %256 : vector<1x1x32xf32> to vector<1x32xf32>
    %258 = vector.broadcast %257 : vector<1x32xf32> to vector<8x32xf32>
    %259 = arith.addf %255, %258 : vector<8x32xf32>
    %cst_222 = arith.constant 0.000000e+00 : f32
    %260 = vector.broadcast %cst_222 : f32 to vector<8x32xf32>
    %261 = arith.maximumf %259, %260 : vector<8x32xf32>
    %c6_223 = arith.constant 6 : index
    %c0_224 = arith.constant 0 : index
    %c0_225 = arith.constant 0 : index
    %262 = vector.load %arg24[%c6_223, %c0_224, %c0_225] : memref<7x32x32xf32, #tpu.memory_space<vmem>>, vector<1x32x32xf32>
    %263 = vector.shape_cast %262 : vector<1x32x32xf32> to vector<32x32xf32>
    %cst_226 = arith.constant dense<0.000000e+00> : vector<8x32xf32>
    %264 = tpu.matmul %261, %263, %cst_226 {dimension_numbers = #tpu.dot_dimension_numbers<[1], [0], [0], [1], [0, 0, 1, 1], [], []>} : vector<8x32xf32>, vector<32x32xf32>, vector<8x32xf32> -> vector<8x32xf32>
    %c6_227 = arith.constant 6 : index
    %c0_228 = arith.constant 0 : index
    %c0_229 = arith.constant 0 : index
    %265 = vector.load %arg25[%c6_227, %c0_228, %c0_229] : memref<7x1x32xf32, #tpu.memory_space<vmem>>, vector<1x1x32xf32>
    %266 = vector.shape_cast %265 : vector<1x1x32xf32> to vector<1x32xf32>
    %267 = vector.broadcast %266 : vector<1x32xf32> to vector<8x32xf32>
    %268 = arith.addf %264, %267 : vector<8x32xf32>
    %cst_230 = arith.constant 0.000000e+00 : f32
    %269 = vector.broadcast %cst_230 : f32 to vector<8x32xf32>
    %270 = arith.maximumf %268, %269 : vector<8x32xf32>
    %c0_231 = arith.constant 0 : index
    %c0_232 = arith.constant 0 : index
    %271 = vector.load %arg26[%c0_231, %c0_232] : memref<32x16xf32, #tpu.memory_space<vmem>>, vector<32x16xf32>
    %cst_233 = arith.constant dense<0.000000e+00> : vector<8x16xf32>
    %272 = tpu.matmul %270, %271, %cst_233 {dimension_numbers = #tpu.dot_dimension_numbers<[1], [0], [0], [1], [0, 0, 1, 1], [], []>} : vector<8x32xf32>, vector<32x16xf32>, vector<8x16xf32> -> vector<8x16xf32>
    %c0_234 = arith.constant 0 : index
    %c0_235 = arith.constant 0 : index
    %273 = vector.load %arg27[%c0_234, %c0_235] : memref<1x16xf32, #tpu.memory_space<vmem>>, vector<1x16xf32>
    %274 = vector.broadcast %273 : vector<1x16xf32> to vector<8x16xf32>
    %275 = arith.addf %272, %274 : vector<8x16xf32>
    %c0_236 = arith.constant 0 : index
    %c0_237 = arith.constant 0 : index
    %276 = vector.load %arg4[%c0_236, %c0_237] : memref<8x8xf32, #tpu.memory_space<vmem>>, vector<8x8xf32>
    %cst_238 = arith.constant dense<0.000000e+00> : vector<8x16xf32>
    %277 = tpu.matmul %276, %275, %cst_238 {dimension_numbers = #tpu.dot_dimension_numbers<[1], [0], [0], [1], [0, 0, 1, 1], [], []>} : vector<8x8xf32>, vector<8x16xf32>, vector<8x16xf32> -> vector<8x16xf32>
    %c0_239 = arith.constant 0 : index
    %c0_240 = arith.constant 0 : index
    %278 = vector.load %arg5[%c0_239, %c0_240] : memref<16x8xf32, #tpu.memory_space<vmem>>, vector<16x8xf32>
    %cst_241 = arith.constant dense<0.000000e+00> : vector<16x16xf32>
    %279 = tpu.matmul %278, %277, %cst_241 {dimension_numbers = #tpu.dot_dimension_numbers<[1], [0], [0], [1], [0, 0, 1, 1], [], []>} : vector<16x8xf32>, vector<8x16xf32>, vector<16x16xf32> -> vector<16x16xf32>
    %c0_242 = arith.constant 0 : index
    %c0_243 = arith.constant 0 : index
    %280 = vector.load %arg28[%c0_242, %c0_243] : memref<16x32xf32, #tpu.memory_space<vmem>>, vector<16x32xf32>
    %cst_244 = arith.constant dense<0.000000e+00> : vector<16x32xf32>
    %281 = tpu.matmul %137, %280, %cst_244 {dimension_numbers = #tpu.dot_dimension_numbers<[1], [0], [0], [1], [0, 0, 1, 1], [], []>} : vector<16x16xf32>, vector<16x32xf32>, vector<16x32xf32> -> vector<16x32xf32>
    %c0_245 = arith.constant 0 : index
    %c0_246 = arith.constant 0 : index
    %282 = vector.load %arg29[%c0_245, %c0_246] : memref<16x32xf32, #tpu.memory_space<vmem>>, vector<16x32xf32>
    %cst_247 = arith.constant dense<0.000000e+00> : vector<16x32xf32>
    %283 = tpu.matmul %279, %282, %cst_247 {dimension_numbers = #tpu.dot_dimension_numbers<[1], [0], [0], [1], [0, 0, 1, 1], [], []>} : vector<16x16xf32>, vector<16x32xf32>, vector<16x32xf32> -> vector<16x32xf32>
    %284 = arith.addf %281, %283 : vector<16x32xf32>
    %c0_248 = arith.constant 0 : index
    %c0_249 = arith.constant 0 : index
    %285 = vector.load %arg30[%c0_248, %c0_249] : memref<1x32xf32, #tpu.memory_space<vmem>>, vector<1x32xf32>
    %286 = vector.broadcast %285 : vector<1x32xf32> to vector<16x32xf32>
    %287 = arith.addf %284, %286 : vector<16x32xf32>
    %cst_250 = arith.constant 0.000000e+00 : f32
    %288 = vector.broadcast %cst_250 : f32 to vector<16x32xf32>
    %289 = arith.maximumf %287, %288 : vector<16x32xf32>
    %c0_251 = arith.constant 0 : index
    %c0_252 = arith.constant 0 : index
    %c0_253 = arith.constant 0 : index
    %290 = vector.load %arg31[%c0_251, %c0_252, %c0_253] : memref<14x32x32xf32, #tpu.memory_space<vmem>>, vector<1x32x32xf32>
    %291 = vector.shape_cast %290 : vector<1x32x32xf32> to vector<32x32xf32>
    %cst_254 = arith.constant dense<0.000000e+00> : vector<16x32xf32>
    %292 = tpu.matmul %289, %291, %cst_254 {dimension_numbers = #tpu.dot_dimension_numbers<[1], [0], [0], [1], [0, 0, 1, 1], [], []>} : vector<16x32xf32>, vector<32x32xf32>, vector<16x32xf32> -> vector<16x32xf32>
    %c0_255 = arith.constant 0 : index
    %c0_256 = arith.constant 0 : index
    %c0_257 = arith.constant 0 : index
    %293 = vector.load %arg32[%c0_255, %c0_256, %c0_257] : memref<14x1x32xf32, #tpu.memory_space<vmem>>, vector<1x1x32xf32>
    %294 = vector.shape_cast %293 : vector<1x1x32xf32> to vector<1x32xf32>
    %295 = vector.broadcast %294 : vector<1x32xf32> to vector<16x32xf32>
    %296 = arith.addf %292, %295 : vector<16x32xf32>
    %cst_258 = arith.constant 0.000000e+00 : f32
    %297 = vector.broadcast %cst_258 : f32 to vector<16x32xf32>
    %298 = arith.maximumf %296, %297 : vector<16x32xf32>
    %c1_259 = arith.constant 1 : index
    %c0_260 = arith.constant 0 : index
    %c0_261 = arith.constant 0 : index
    %299 = vector.load %arg31[%c1_259, %c0_260, %c0_261] : memref<14x32x32xf32, #tpu.memory_space<vmem>>, vector<1x32x32xf32>
    %300 = vector.shape_cast %299 : vector<1x32x32xf32> to vector<32x32xf32>
    %cst_262 = arith.constant dense<0.000000e+00> : vector<16x32xf32>
    %301 = tpu.matmul %298, %300, %cst_262 {dimension_numbers = #tpu.dot_dimension_numbers<[1], [0], [0], [1], [0, 0, 1, 1], [], []>} : vector<16x32xf32>, vector<32x32xf32>, vector<16x32xf32> -> vector<16x32xf32>
    %c1_263 = arith.constant 1 : index
    %c0_264 = arith.constant 0 : index
    %c0_265 = arith.constant 0 : index
    %302 = vector.load %arg32[%c1_263, %c0_264, %c0_265] : memref<14x1x32xf32, #tpu.memory_space<vmem>>, vector<1x1x32xf32>
    %303 = vector.shape_cast %302 : vector<1x1x32xf32> to vector<1x32xf32>
    %304 = vector.broadcast %303 : vector<1x32xf32> to vector<16x32xf32>
    %305 = arith.addf %301, %304 : vector<16x32xf32>
    %cst_266 = arith.constant 0.000000e+00 : f32
    %306 = vector.broadcast %cst_266 : f32 to vector<16x32xf32>
    %307 = arith.maximumf %305, %306 : vector<16x32xf32>
    %c2_267 = arith.constant 2 : index
    %c0_268 = arith.constant 0 : index
    %c0_269 = arith.constant 0 : index
    %308 = vector.load %arg31[%c2_267, %c0_268, %c0_269] : memref<14x32x32xf32, #tpu.memory_space<vmem>>, vector<1x32x32xf32>
    %309 = vector.shape_cast %308 : vector<1x32x32xf32> to vector<32x32xf32>
    %cst_270 = arith.constant dense<0.000000e+00> : vector<16x32xf32>
    %310 = tpu.matmul %307, %309, %cst_270 {dimension_numbers = #tpu.dot_dimension_numbers<[1], [0], [0], [1], [0, 0, 1, 1], [], []>} : vector<16x32xf32>, vector<32x32xf32>, vector<16x32xf32> -> vector<16x32xf32>
    %c2_271 = arith.constant 2 : index
    %c0_272 = arith.constant 0 : index
    %c0_273 = arith.constant 0 : index
    %311 = vector.load %arg32[%c2_271, %c0_272, %c0_273] : memref<14x1x32xf32, #tpu.memory_space<vmem>>, vector<1x1x32xf32>
    %312 = vector.shape_cast %311 : vector<1x1x32xf32> to vector<1x32xf32>
    %313 = vector.broadcast %312 : vector<1x32xf32> to vector<16x32xf32>
    %314 = arith.addf %310, %313 : vector<16x32xf32>
    %cst_274 = arith.constant 0.000000e+00 : f32
    %315 = vector.broadcast %cst_274 : f32 to vector<16x32xf32>
    %316 = arith.maximumf %314, %315 : vector<16x32xf32>
    %c3_275 = arith.constant 3 : index
    %c0_276 = arith.constant 0 : index
    %c0_277 = arith.constant 0 : index
    %317 = vector.load %arg31[%c3_275, %c0_276, %c0_277] : memref<14x32x32xf32, #tpu.memory_space<vmem>>, vector<1x32x32xf32>
    %318 = vector.shape_cast %317 : vector<1x32x32xf32> to vector<32x32xf32>
    %cst_278 = arith.constant dense<0.000000e+00> : vector<16x32xf32>
    %319 = tpu.matmul %316, %318, %cst_278 {dimension_numbers = #tpu.dot_dimension_numbers<[1], [0], [0], [1], [0, 0, 1, 1], [], []>} : vector<16x32xf32>, vector<32x32xf32>, vector<16x32xf32> -> vector<16x32xf32>
    %c3_279 = arith.constant 3 : index
    %c0_280 = arith.constant 0 : index
    %c0_281 = arith.constant 0 : index
    %320 = vector.load %arg32[%c3_279, %c0_280, %c0_281] : memref<14x1x32xf32, #tpu.memory_space<vmem>>, vector<1x1x32xf32>
    %321 = vector.shape_cast %320 : vector<1x1x32xf32> to vector<1x32xf32>
    %322 = vector.broadcast %321 : vector<1x32xf32> to vector<16x32xf32>
    %323 = arith.addf %319, %322 : vector<16x32xf32>
    %cst_282 = arith.constant 0.000000e+00 : f32
    %324 = vector.broadcast %cst_282 : f32 to vector<16x32xf32>
    %325 = arith.maximumf %323, %324 : vector<16x32xf32>
    %c4_283 = arith.constant 4 : index
    %c0_284 = arith.constant 0 : index
    %c0_285 = arith.constant 0 : index
    %326 = vector.load %arg31[%c4_283, %c0_284, %c0_285] : memref<14x32x32xf32, #tpu.memory_space<vmem>>, vector<1x32x32xf32>
    %327 = vector.shape_cast %326 : vector<1x32x32xf32> to vector<32x32xf32>
    %cst_286 = arith.constant dense<0.000000e+00> : vector<16x32xf32>
    %328 = tpu.matmul %325, %327, %cst_286 {dimension_numbers = #tpu.dot_dimension_numbers<[1], [0], [0], [1], [0, 0, 1, 1], [], []>} : vector<16x32xf32>, vector<32x32xf32>, vector<16x32xf32> -> vector<16x32xf32>
    %c4_287 = arith.constant 4 : index
    %c0_288 = arith.constant 0 : index
    %c0_289 = arith.constant 0 : index
    %329 = vector.load %arg32[%c4_287, %c0_288, %c0_289] : memref<14x1x32xf32, #tpu.memory_space<vmem>>, vector<1x1x32xf32>
    %330 = vector.shape_cast %329 : vector<1x1x32xf32> to vector<1x32xf32>
    %331 = vector.broadcast %330 : vector<1x32xf32> to vector<16x32xf32>
    %332 = arith.addf %328, %331 : vector<16x32xf32>
    %cst_290 = arith.constant 0.000000e+00 : f32
    %333 = vector.broadcast %cst_290 : f32 to vector<16x32xf32>
    %334 = arith.maximumf %332, %333 : vector<16x32xf32>
    %c5_291 = arith.constant 5 : index
    %c0_292 = arith.constant 0 : index
    %c0_293 = arith.constant 0 : index
    %335 = vector.load %arg31[%c5_291, %c0_292, %c0_293] : memref<14x32x32xf32, #tpu.memory_space<vmem>>, vector<1x32x32xf32>
    %336 = vector.shape_cast %335 : vector<1x32x32xf32> to vector<32x32xf32>
    %cst_294 = arith.constant dense<0.000000e+00> : vector<16x32xf32>
    %337 = tpu.matmul %334, %336, %cst_294 {dimension_numbers = #tpu.dot_dimension_numbers<[1], [0], [0], [1], [0, 0, 1, 1], [], []>} : vector<16x32xf32>, vector<32x32xf32>, vector<16x32xf32> -> vector<16x32xf32>
    %c5_295 = arith.constant 5 : index
    %c0_296 = arith.constant 0 : index
    %c0_297 = arith.constant 0 : index
    %338 = vector.load %arg32[%c5_295, %c0_296, %c0_297] : memref<14x1x32xf32, #tpu.memory_space<vmem>>, vector<1x1x32xf32>
    %339 = vector.shape_cast %338 : vector<1x1x32xf32> to vector<1x32xf32>
    %340 = vector.broadcast %339 : vector<1x32xf32> to vector<16x32xf32>
    %341 = arith.addf %337, %340 : vector<16x32xf32>
    %cst_298 = arith.constant 0.000000e+00 : f32
    %342 = vector.broadcast %cst_298 : f32 to vector<16x32xf32>
    %343 = arith.maximumf %341, %342 : vector<16x32xf32>
    %c6_299 = arith.constant 6 : index
    %c0_300 = arith.constant 0 : index
    %c0_301 = arith.constant 0 : index
    %344 = vector.load %arg31[%c6_299, %c0_300, %c0_301] : memref<14x32x32xf32, #tpu.memory_space<vmem>>, vector<1x32x32xf32>
    %345 = vector.shape_cast %344 : vector<1x32x32xf32> to vector<32x32xf32>
    %cst_302 = arith.constant dense<0.000000e+00> : vector<16x32xf32>
    %346 = tpu.matmul %343, %345, %cst_302 {dimension_numbers = #tpu.dot_dimension_numbers<[1], [0], [0], [1], [0, 0, 1, 1], [], []>} : vector<16x32xf32>, vector<32x32xf32>, vector<16x32xf32> -> vector<16x32xf32>
    %c6_303 = arith.constant 6 : index
    %c0_304 = arith.constant 0 : index
    %c0_305 = arith.constant 0 : index
    %347 = vector.load %arg32[%c6_303, %c0_304, %c0_305] : memref<14x1x32xf32, #tpu.memory_space<vmem>>, vector<1x1x32xf32>
    %348 = vector.shape_cast %347 : vector<1x1x32xf32> to vector<1x32xf32>
    %349 = vector.broadcast %348 : vector<1x32xf32> to vector<16x32xf32>
    %350 = arith.addf %346, %349 : vector<16x32xf32>
    %cst_306 = arith.constant 0.000000e+00 : f32
    %351 = vector.broadcast %cst_306 : f32 to vector<16x32xf32>
    %352 = arith.maximumf %350, %351 : vector<16x32xf32>
    %c7 = arith.constant 7 : index
    %c0_307 = arith.constant 0 : index
    %c0_308 = arith.constant 0 : index
    %353 = vector.load %arg31[%c7, %c0_307, %c0_308] : memref<14x32x32xf32, #tpu.memory_space<vmem>>, vector<1x32x32xf32>
    %354 = vector.shape_cast %353 : vector<1x32x32xf32> to vector<32x32xf32>
    %cst_309 = arith.constant dense<0.000000e+00> : vector<16x32xf32>
    %355 = tpu.matmul %352, %354, %cst_309 {dimension_numbers = #tpu.dot_dimension_numbers<[1], [0], [0], [1], [0, 0, 1, 1], [], []>} : vector<16x32xf32>, vector<32x32xf32>, vector<16x32xf32> -> vector<16x32xf32>
    %c7_310 = arith.constant 7 : index
    %c0_311 = arith.constant 0 : index
    %c0_312 = arith.constant 0 : index
    %356 = vector.load %arg32[%c7_310, %c0_311, %c0_312] : memref<14x1x32xf32, #tpu.memory_space<vmem>>, vector<1x1x32xf32>
    %357 = vector.shape_cast %356 : vector<1x1x32xf32> to vector<1x32xf32>
    %358 = vector.broadcast %357 : vector<1x32xf32> to vector<16x32xf32>
    %359 = arith.addf %355, %358 : vector<16x32xf32>
    %cst_313 = arith.constant 0.000000e+00 : f32
    %360 = vector.broadcast %cst_313 : f32 to vector<16x32xf32>
    %361 = arith.maximumf %359, %360 : vector<16x32xf32>
    %c8 = arith.constant 8 : index
    %c0_314 = arith.constant 0 : index
    %c0_315 = arith.constant 0 : index
    %362 = vector.load %arg31[%c8, %c0_314, %c0_315] : memref<14x32x32xf32, #tpu.memory_space<vmem>>, vector<1x32x32xf32>
    %363 = vector.shape_cast %362 : vector<1x32x32xf32> to vector<32x32xf32>
    %cst_316 = arith.constant dense<0.000000e+00> : vector<16x32xf32>
    %364 = tpu.matmul %361, %363, %cst_316 {dimension_numbers = #tpu.dot_dimension_numbers<[1], [0], [0], [1], [0, 0, 1, 1], [], []>} : vector<16x32xf32>, vector<32x32xf32>, vector<16x32xf32> -> vector<16x32xf32>
    %c8_317 = arith.constant 8 : index
    %c0_318 = arith.constant 0 : index
    %c0_319 = arith.constant 0 : index
    %365 = vector.load %arg32[%c8_317, %c0_318, %c0_319] : memref<14x1x32xf32, #tpu.memory_space<vmem>>, vector<1x1x32xf32>
    %366 = vector.shape_cast %365 : vector<1x1x32xf32> to vector<1x32xf32>
    %367 = vector.broadcast %366 : vector<1x32xf32> to vector<16x32xf32>
    %368 = arith.addf %364, %367 : vector<16x32xf32>
    %cst_320 = arith.constant 0.000000e+00 : f32
    %369 = vector.broadcast %cst_320 : f32 to vector<16x32xf32>
    %370 = arith.maximumf %368, %369 : vector<16x32xf32>
    %c9 = arith.constant 9 : index
    %c0_321 = arith.constant 0 : index
    %c0_322 = arith.constant 0 : index
    %371 = vector.load %arg31[%c9, %c0_321, %c0_322] : memref<14x32x32xf32, #tpu.memory_space<vmem>>, vector<1x32x32xf32>
    %372 = vector.shape_cast %371 : vector<1x32x32xf32> to vector<32x32xf32>
    %cst_323 = arith.constant dense<0.000000e+00> : vector<16x32xf32>
    %373 = tpu.matmul %370, %372, %cst_323 {dimension_numbers = #tpu.dot_dimension_numbers<[1], [0], [0], [1], [0, 0, 1, 1], [], []>} : vector<16x32xf32>, vector<32x32xf32>, vector<16x32xf32> -> vector<16x32xf32>
    %c9_324 = arith.constant 9 : index
    %c0_325 = arith.constant 0 : index
    %c0_326 = arith.constant 0 : index
    %374 = vector.load %arg32[%c9_324, %c0_325, %c0_326] : memref<14x1x32xf32, #tpu.memory_space<vmem>>, vector<1x1x32xf32>
    %375 = vector.shape_cast %374 : vector<1x1x32xf32> to vector<1x32xf32>
    %376 = vector.broadcast %375 : vector<1x32xf32> to vector<16x32xf32>
    %377 = arith.addf %373, %376 : vector<16x32xf32>
    %cst_327 = arith.constant 0.000000e+00 : f32
    %378 = vector.broadcast %cst_327 : f32 to vector<16x32xf32>
    %379 = arith.maximumf %377, %378 : vector<16x32xf32>
    %c10 = arith.constant 10 : index
    %c0_328 = arith.constant 0 : index
    %c0_329 = arith.constant 0 : index
    %380 = vector.load %arg31[%c10, %c0_328, %c0_329] : memref<14x32x32xf32, #tpu.memory_space<vmem>>, vector<1x32x32xf32>
    %381 = vector.shape_cast %380 : vector<1x32x32xf32> to vector<32x32xf32>
    %cst_330 = arith.constant dense<0.000000e+00> : vector<16x32xf32>
    %382 = tpu.matmul %379, %381, %cst_330 {dimension_numbers = #tpu.dot_dimension_numbers<[1], [0], [0], [1], [0, 0, 1, 1], [], []>} : vector<16x32xf32>, vector<32x32xf32>, vector<16x32xf32> -> vector<16x32xf32>
    %c10_331 = arith.constant 10 : index
    %c0_332 = arith.constant 0 : index
    %c0_333 = arith.constant 0 : index
    %383 = vector.load %arg32[%c10_331, %c0_332, %c0_333] : memref<14x1x32xf32, #tpu.memory_space<vmem>>, vector<1x1x32xf32>
    %384 = vector.shape_cast %383 : vector<1x1x32xf32> to vector<1x32xf32>
    %385 = vector.broadcast %384 : vector<1x32xf32> to vector<16x32xf32>
    %386 = arith.addf %382, %385 : vector<16x32xf32>
    %cst_334 = arith.constant 0.000000e+00 : f32
    %387 = vector.broadcast %cst_334 : f32 to vector<16x32xf32>
    %388 = arith.maximumf %386, %387 : vector<16x32xf32>
    %c11 = arith.constant 11 : index
    %c0_335 = arith.constant 0 : index
    %c0_336 = arith.constant 0 : index
    %389 = vector.load %arg31[%c11, %c0_335, %c0_336] : memref<14x32x32xf32, #tpu.memory_space<vmem>>, vector<1x32x32xf32>
    %390 = vector.shape_cast %389 : vector<1x32x32xf32> to vector<32x32xf32>
    %cst_337 = arith.constant dense<0.000000e+00> : vector<16x32xf32>
    %391 = tpu.matmul %388, %390, %cst_337 {dimension_numbers = #tpu.dot_dimension_numbers<[1], [0], [0], [1], [0, 0, 1, 1], [], []>} : vector<16x32xf32>, vector<32x32xf32>, vector<16x32xf32> -> vector<16x32xf32>
    %c11_338 = arith.constant 11 : index
    %c0_339 = arith.constant 0 : index
    %c0_340 = arith.constant 0 : index
    %392 = vector.load %arg32[%c11_338, %c0_339, %c0_340] : memref<14x1x32xf32, #tpu.memory_space<vmem>>, vector<1x1x32xf32>
    %393 = vector.shape_cast %392 : vector<1x1x32xf32> to vector<1x32xf32>
    %394 = vector.broadcast %393 : vector<1x32xf32> to vector<16x32xf32>
    %395 = arith.addf %391, %394 : vector<16x32xf32>
    %cst_341 = arith.constant 0.000000e+00 : f32
    %396 = vector.broadcast %cst_341 : f32 to vector<16x32xf32>
    %397 = arith.maximumf %395, %396 : vector<16x32xf32>
    %c12 = arith.constant 12 : index
    %c0_342 = arith.constant 0 : index
    %c0_343 = arith.constant 0 : index
    %398 = vector.load %arg31[%c12, %c0_342, %c0_343] : memref<14x32x32xf32, #tpu.memory_space<vmem>>, vector<1x32x32xf32>
    %399 = vector.shape_cast %398 : vector<1x32x32xf32> to vector<32x32xf32>
    %cst_344 = arith.constant dense<0.000000e+00> : vector<16x32xf32>
    %400 = tpu.matmul %397, %399, %cst_344 {dimension_numbers = #tpu.dot_dimension_numbers<[1], [0], [0], [1], [0, 0, 1, 1], [], []>} : vector<16x32xf32>, vector<32x32xf32>, vector<16x32xf32> -> vector<16x32xf32>
    %c12_345 = arith.constant 12 : index
    %c0_346 = arith.constant 0 : index
    %c0_347 = arith.constant 0 : index
    %401 = vector.load %arg32[%c12_345, %c0_346, %c0_347] : memref<14x1x32xf32, #tpu.memory_space<vmem>>, vector<1x1x32xf32>
    %402 = vector.shape_cast %401 : vector<1x1x32xf32> to vector<1x32xf32>
    %403 = vector.broadcast %402 : vector<1x32xf32> to vector<16x32xf32>
    %404 = arith.addf %400, %403 : vector<16x32xf32>
    %cst_348 = arith.constant 0.000000e+00 : f32
    %405 = vector.broadcast %cst_348 : f32 to vector<16x32xf32>
    %406 = arith.maximumf %404, %405 : vector<16x32xf32>
    %c13 = arith.constant 13 : index
    %c0_349 = arith.constant 0 : index
    %c0_350 = arith.constant 0 : index
    %407 = vector.load %arg31[%c13, %c0_349, %c0_350] : memref<14x32x32xf32, #tpu.memory_space<vmem>>, vector<1x32x32xf32>
    %408 = vector.shape_cast %407 : vector<1x32x32xf32> to vector<32x32xf32>
    %cst_351 = arith.constant dense<0.000000e+00> : vector<16x32xf32>
    %409 = tpu.matmul %406, %408, %cst_351 {dimension_numbers = #tpu.dot_dimension_numbers<[1], [0], [0], [1], [0, 0, 1, 1], [], []>} : vector<16x32xf32>, vector<32x32xf32>, vector<16x32xf32> -> vector<16x32xf32>
    %c13_352 = arith.constant 13 : index
    %c0_353 = arith.constant 0 : index
    %c0_354 = arith.constant 0 : index
    %410 = vector.load %arg32[%c13_352, %c0_353, %c0_354] : memref<14x1x32xf32, #tpu.memory_space<vmem>>, vector<1x1x32xf32>
    %411 = vector.shape_cast %410 : vector<1x1x32xf32> to vector<1x32xf32>
    %412 = vector.broadcast %411 : vector<1x32xf32> to vector<16x32xf32>
    %413 = arith.addf %409, %412 : vector<16x32xf32>
    %cst_355 = arith.constant 0.000000e+00 : f32
    %414 = vector.broadcast %cst_355 : f32 to vector<16x32xf32>
    %415 = arith.maximumf %413, %414 : vector<16x32xf32>
    %c0_356 = arith.constant 0 : index
    %c0_357 = arith.constant 0 : index
    %416 = vector.load %arg33[%c0_356, %c0_357] : memref<32x1xf32, #tpu.memory_space<vmem>>, vector<32x1xf32>
    %cst_358 = arith.constant dense<0.000000e+00> : vector<16x1xf32>
    %417 = tpu.matmul %415, %416, %cst_358 {dimension_numbers = #tpu.dot_dimension_numbers<[1], [0], [0], [1], [0, 0, 1, 1], [], []>} : vector<16x32xf32>, vector<32x1xf32>, vector<16x1xf32> -> vector<16x1xf32>
    %c0_359 = arith.constant 0 : index
    %c0_360 = arith.constant 0 : index
    %418 = vector.load %arg34[%c0_359, %c0_360] : memref<1x1xf32, #tpu.memory_space<vmem>>, vector<1x1xf32>
    %419 = vector.broadcast %418 : vector<1x1xf32> to vector<16x1xf32>
    %420 = arith.addf %417, %419 : vector<16x1xf32>
    %421 = arith.negf %420 : vector<16x1xf32>
    %422 = math.exp %421 : vector<16x1xf32>
    %cst_361 = arith.constant 1.000000e+00 : f32
    %423 = vector.broadcast %cst_361 : f32 to vector<16x1xf32>
    %424 = arith.addf %423, %422 : vector<16x1xf32>
    %425 = arith.divf %423, %424 : vector<16x1xf32>
    %c0_362 = arith.constant 0 : index
    %c0_363 = arith.constant 0 : index
    %426 = vector.load %arg35[%c0_362, %c0_363] : memref<16x1xf32, #tpu.memory_space<vmem>>, vector<16x1xf32>
    tpu.vector_store %arg35[%c0_362, %c0_363], %425 {strides = array<i32>} : memref<16x1xf32, #tpu.memory_space<vmem>>, vector<16x1xf32>,
    return
  }
}

</mosaic_0001>

<bundles_post_ra>
// kernel: iso_net_forward.1
= control target key start
LH: loop header
LB: loop body
LE: loop exit
PB: predicated region body
PF: predicated region fallthrough
CT: control target
= control target key end

     0   :  { %s6694_s6 = smov 1   ;;  %s6695_s10 = smov 2   ;;  %s7292_s0 = inlined_call_operand.smem [shape: u32[36], index: -1, kind: input, shape index: {}] }
   0x1   :  { %s6763_s5 = sld [smem:[%s7292_s0]]   ;;  %s6696_s14 = smov 3  }
   0x2   :  { %s6768_s9 = sld [smem:[%s7292_s0 + %s6694_s6]]   ;;  %s6697_s18 = smov 4  }
   0x3   :  { %s6773_s13 = sld [smem:[%s7292_s0 + %s6695_s10]]   ;;  %s6698_s22 = smov 5  }
   0x4   :  { %s6778_s17 = sld [smem:[%s7292_s0 + %s6696_s14]]   ;;  %s6699_s26 = smov 6  }
   0x5   :  { %s6783_s21 = sld [smem:[%s7292_s0 + %s6697_s18]]   ;;  %s6700_s30 = smov 7  }
   0x6   :  { %s6788_s25 = sld [smem:[%s7292_s0 + %s6698_s22]]   ;;  %s6701_s4 = smov 8  }
   0x7   :  { %7308 = sst [smem:[#allocation42_spill]] %s6763_s5  ;;  %s6702_s10 = smov 9  }
   0x8   :  { %7309 = sst [smem:[#allocation43_spill]] %s6768_s9  ;;  %s6703_s15 = smov 10  }
   0x9   :  { %7310 = sst [smem:[#allocation44_spill]] %s6773_s13  ;;  %s6704_s20 = smov 11  }
   0xa   :  { %7311 = sst [smem:[#allocation45_spill]] %s6778_s17  ;;  %s6706_s1 = smov 13  }
   0xb   :  { %7312 = sst [smem:[#allocation46_spill]] %s6783_s21  ;;  %s6707_s7 = smov 14  }
   0xc   :  { %7313 = sst [smem:[#allocation47_spill]] %s6788_s25  ;;  %s6709_s22 = smov 16  }
   0xd   :  { %s6793_s29 = sld [smem:[%s7292_s0 + %s6699_s26]]   ;;  %s6705_s26 = smov 12  }
   0xe   :  { %s6798_s3 = sld [smem:[%s7292_s0 + %s6700_s30]]   ;;  %s6710_s28 = smov 17  }
   0xf   :  { %s6803_s8 = sld [smem:[%s7292_s0 + %s6701_s4]]   ;;  %s6728_s16 = smov 35  }
  0x10   :  { %s6808_s14 = sld [smem:[%s7292_s0 + %s6702_s10]]  }
  0x11   :  { %s6813_s19 = sld [smem:[%s7292_s0 + %s6703_s15]]   ;;  %s6708_s15 = smov 15  }
  0x12   :  { %s6818_s24 = sld [smem:[%s7292_s0 + %s6704_s20]]  }
  0x13   :  { %s6823_s30 = sld [smem:[%s7292_s0 + %s6705_s26]]  }
  0x14   :  { %7314 = sst [smem:[#allocation48_spill]] %s6798_s3 }
  0x15   :  { %7315 = sst [smem:[#allocation49_spill]] %s6803_s8 }
  0x16   :  { %s6828_s6 = sld [smem:[%s7292_s0 + %s6706_s1]]  }
  0x17   :  { %7316 = sst [smem:[#allocation50_spill]] %s6813_s19 }
  0x18   :  { %s6833_s12 = sld [smem:[%s7292_s0 + %s6707_s7]]   ;;  %s6711_s7 = smov 18  }
  0x19   :  { %s6838_s20 = sld [smem:[%s7292_s0 + %s6708_s15]]   ;;  %s6712_s15 = smov 19  }
  0x1a   :  { %s6843_s27 = sld [smem:[%s7292_s0 + %s6709_s22]]   ;;  %s6713_s22 = smov 20  }
  0x1b   :  { %s6848_s4 = sld [smem:[%s7292_s0 + %s6710_s28]]   ;;  %s6714_s28 = smov 21  }
  0x1c   :  { %s6853_s25 = sld [smem:[%s7292_s0 + %s6711_s7]]   ;;  %s6715_s7 = smov 22  }
  0x1d   :  { %s6858_s21 = sld [smem:[%s7292_s0 + %s6712_s15]]   ;;  %s6716_s15 = smov 23  }
  0x1e   :  { %s6863_s17 = sld [smem:[%s7292_s0 + %s6713_s22]]   ;;  %s6717_s22 = smov 24  }
  0x1f   :  { %s6868_s13 = sld [smem:[%s7292_s0 + %s6714_s28]]   ;;  %s6718_s28 = smov 25  }
  0x20   :  { %s6873_s19 = sld [smem:[%s7292_s0 + %s6715_s7]]   ;;  %s6719_s7 = smov 26  }
  0x21   :  { %s6878_s3 = sld [smem:[%s7292_s0 + %s6716_s15]]   ;;  %s6720_s15 = smov 27  }
  0x22   :  { %s6888_s8 = sld [smem:[%s7292_s0 + %s6718_s28]]   ;;  %s6722_s28 = smov 29  }
  0x23   :  { %7317 = sst [smem:[#allocation51_spill]] %s6858_s21 }
  0x24   :  { %7318 = sst [smem:[#allocation52_spill]] %s6863_s17 }
  0x25   :  { %s6883_s17 = sld [smem:[%s7292_s0 + %s6717_s22]]   ;;  %s6721_s22 = smov 28  }
  0x26   :  { %7319 = sst [smem:[#allocation53_spill]] %s6873_s19 }
  0x27   :  { %7320 = sst [smem:[#allocation54_spill]] %s6878_s3 }
  0x28   :  { %7321 = sst [smem:[#allocation55_spill]] %s6888_s8 }
  0x29   :  { %s6893_s19 = sld [smem:[%s7292_s0 + %s6719_s7]]   ;;  %s6723_s7 = smov 30  }
  0x2a   :  { %s6898_s9 = sld [smem:[%s7292_s0 + %s6720_s15]]   ;;  %s6724_s15 = smov 31  }
  0x2b   :  { %s6903_s5 = sld [smem:[%s7292_s0 + %s6721_s22]]   ;;  %s6725_s22 = smov 32  }
  0x2c   :  { %s6908_s8 = sld [smem:[%s7292_s0 + %s6722_s28]]   ;;  %s6726_s28 = smov 33  }
  0x2d   :  { %s6918_s3 = sld [smem:[%s7292_s0 + %s6724_s15]]  }
  0x2e   :  { %s6936_s21 = sld [smem:[%s7292_s0 + %s6728_s16]]  }
  0x2f   :  { %7322 = sst [smem:[#allocation56_spill]] %s6893_s19 }
  0x30   :  { %s6913_s19 = sld [smem:[%s7292_s0 + %s6723_s7]]   ;;  %s6727_s7 = smov 34  }
  0x31   :  { %7323 = sst [smem:[#allocation57_spill]] %s6903_s5 }
  0x32   :  { %7324 = sst [smem:[#allocation58_spill]] %s6908_s8 }
  0x33   :  { %s6923_s5 = sld [smem:[%s7292_s0 + %s6725_s22]]  }
  0x34   :  { %s6928_s8 = sld [smem:[%s7292_s0 + %s6726_s28]]  }
  0x36   :  { %7325 = sst [smem:[#allocation59_spill]] %s6913_s19 }
  0x37   :  { %s4972_s19 = sld [smem:[%s7292_s0 + %s6727_s7]]  }
  0x3d   :  { %v76_v0 = vstv %s4972_s19 }
  0x3e   :  { %77 = vst [vmem:[#allocation2] sm:$0x1] %v76_v0 }
  0x3f   :  { %78 = vsyncpa [#allocation4], 0 }
  0x40   :  { %79 = vsyncpa [#allocation6], 0 }
  0x41   :  { %80 = vsyncpa [#allocation9], 0 }
  0x42   :  { %81 = vsyncpa [#allocation12], 0 }
  0x43   :  { %82 = vsyncpa [#allocation15], 0 }
  0x44   :  { %83 = vsyncpa [#allocation18], 0 }
  0x45   :  { %84 = vsyncpa [#allocation21], 0 }
  0x46   :  { %85 = vsyncpa [#allocation24], 0 }
  0x47   :  { %86 = vsyncpa [#allocation27], 0 }
  0x48   :  { %87 = vsyncpa [#allocation30], 0  ;;  %s6729_s22 = smov [#allocation5]   ;;  %s6256_s0 = scalar_lea.hbm %s6808_s14, 32 }
  0x49   :  { %s119_s23 = sshll.u32 %s6729_s22, 4  ;;  %p6257_p0 = scmp.ne.s32.totalorder %s6808_s14, %s6256_s0  ;;  %s120_s23 = int_to_ptr.vmem [resolvable:$true] %s119_s23 }
  0x4a   :  { %p6260_p1 = scmp.lt.u32.totalorder %s6256_s0, %s6808_s14 }
  0x4c   :  { %p6262_p2 = pnand %p6260_p1, %p6257_p0 }
  0x4e   :  { %6265 = shalt.err (!%p6262_p2)
}
  0x4f   :  { %s6266_s19 = scalar_lea.vmem %s120_s23, 32  ;;  %p6271_p4 = scmp.lt.s32.totalorder %s120_s23, %s120_s23 }
  0x50   :  { %p6267_p3 = scmp.ne.s32.totalorder %s120_s23, %s6266_s19  ;;  %p6272_p5 = scmp.lt.s32.totalorder %s6266_s19, %s6266_s19 }
  0x52   :  { %p6273_p6 = por %p6272_p5, %p6271_p4 }
  0x54   :  { %p6274_p7 = pnand %p6273_p6, %p6267_p3 }
  0x56   :  { %6277 = shalt.err (!%p6274_p7)
}
  0x57   :  { %s6730_s26 = smov 16   ;;  %s6731_s28 = smov 1  }
  0x58   :  { %125 = dma.hbm_to_vmem [thread:$0]  %s6808_s14, 32, %s120_s23, [#allocation6], %s6730_s26, %s6730_s26, %s6731_s28  }
  0x59   :  { %s6732_s1 = smov [#allocation8]   ;;  %s6733_s7 = smov [#allocation11]  }
  0x5a   :  { %s145_s2 = sshll.u32 %s6732_s1, 4  ;;  %s169_s10 = sshll.u32 %s6733_s7, 4  ;;  %s146_s2 = int_to_ptr.vmem [resolvable:$true] %s145_s2  ;;  %s170_s10 = int_to_ptr.vmem [resolvable:$true] %s169_s10 }
  0x5b   :  { %s6278_s11 = scalar_lea.hbm %s6823_s30, 32 }
  0x5c   :  { %p6279_p8 = scmp.ne.s32.totalorder %s6823_s30, %s6278_s11  ;;  %p6282_p9 = scmp.lt.u32.totalorder %s6278_s11, %s6823_s30 }
  0x5e   :  { %p6284_p10 = pnand %p6282_p9, %p6279_p8 }
  0x60   :  { %6287 = shalt.err (!%p6284_p10)
}
  0x61   :  { %s6288_s16 = scalar_lea.vmem %s146_s2, 32  ;;  %p6293_p12 = scmp.lt.s32.totalorder %s146_s2, %s146_s2 }
  0x62   :  { %p6289_p11 = scmp.ne.s32.totalorder %s146_s2, %s6288_s16  ;;  %p6294_p13 = scmp.lt.s32.totalorder %s6288_s16, %s6288_s16 }
  0x64   :  { %p6295_p0 = por %p6294_p13, %p6293_p12 }
  0x66   :  { %p6296_p1 = pnand %p6295_p0, %p6289_p11 }
  0x68   :  { %6299 = shalt.err (!%p6296_p1)
}
  0x69   :  { %151 = dma.hbm_to_vmem [thread:$0]  %s6823_s30, 32, %s146_s2, [#allocation9], %s6730_s26, %s6730_s26, %s6731_s28  }
  0x6a   :  { %s6300_s14 = scalar_lea.hbm %s6833_s12, 1024 }
  0x6b   :  { %p6301_p2 = scmp.ne.s32.totalorder %s6833_s12, %s6300_s14  ;;  %p6304_p3 = scmp.lt.u32.totalorder %s6300_s14, %s6833_s12 }
  0x6d   :  { %p6306_p4 = pnand %p6304_p3, %p6301_p2 }
  0x6f   :  { %6309 = shalt.err (!%p6306_p4)
}
  0x70   :  { %s6310_s15 = scalar_lea.vmem %s170_s10, 1024  ;;  %p6315_p6 = scmp.lt.s32.totalorder %s170_s10, %s170_s10 }
  0x71   :  { %p6311_p5 = scmp.ne.s32.totalorder %s170_s10, %s6310_s15  ;;  %p6316_p7 = scmp.lt.s32.totalorder %s6310_s15, %s6310_s15 }
  0x73   :  { %p6317_p8 = por %p6316_p7, %p6315_p6 }
  0x75   :  { %p6318_p9 = pnand %p6317_p8, %p6311_p5 }
  0x77   :  { %6321 = shalt.err (!%p6318_p9)
}
  0x78   :  { %s6734_s18 = smov 128   ;;  %s6735_s22 = smov 8  }
  0x79   :  { %175 = dma.hbm_to_vmem [thread:$0]  %s6833_s12, 1024, %s170_s10, [#allocation12], %s6734_s18, %s6734_s18, %s6735_s22  }
  0x7a   :  { %s6736_s30 = smov [#allocation14]   ;;  %s6737_s0 = smov [#allocation17]  }
  0x7b   :  { %s193_s23 = sshll.u32 %s6736_s30, 4  ;;  %s217_s19 = sshll.u32 %s6737_s0, 4  ;;  %s194_s23 = int_to_ptr.vmem [resolvable:$true] %s193_s23  ;;  %s218_s19 = int_to_ptr.vmem [resolvable:$true] %s217_s19 }
  0x7c   :  { %s6322_s1 = scalar_lea.hbm %s6843_s27, 1024 }
  0x7d   :  { %p6323_p10 = scmp.ne.s32.totalorder %s6843_s27, %s6322_s1  ;;  %p6326_p11 = scmp.lt.u32.totalorder %s6322_s1, %s6843_s27 }
  0x7f   :  { %p6328_p12 = pnand %p6326_p11, %p6323_p10 }
  0x81   :  { %6331 = shalt.err (!%p6328_p12)
}
  0x82   :  { %s6332_s2 = scalar_lea.vmem %s194_s23, 1024  ;;  %p6337_p0 = scmp.lt.s32.totalorder %s194_s23, %s194_s23 }
  0x83   :  { %p6333_p13 = scmp.ne.s32.totalorder %s194_s23, %s6332_s2  ;;  %p6338_p1 = scmp.lt.s32.totalorder %s6332_s2, %s6332_s2 }
  0x85   :  { %p6339_p2 = por %p6338_p1, %p6337_p0 }
  0x87   :  { %p6340_p3 = pnand %p6339_p2, %p6333_p13 }
  0x89   :  { %6343 = shalt.err (!%p6340_p3)
}
  0x8a   :  { %199 = dma.hbm_to_vmem [thread:$0]  %s6843_s27, 1024, %s194_s23, [#allocation15], %s6734_s18, %s6734_s18, %s6735_s22  }
  0x8b   :  { %s6344_s12 = scalar_lea.hbm %s6853_s25, 32 }
  0x8c   :  { %p6345_p4 = scmp.ne.s32.totalorder %s6853_s25, %s6344_s12  ;;  %p6348_p5 = scmp.lt.u32.totalorder %s6344_s12, %s6853_s25 }
  0x8e   :  { %p6350_p6 = pnand %p6348_p5, %p6345_p4 }
  0x90   :  { %6353 = shalt.err (!%p6350_p6)
}
  0x91   :  { %s6354_s7 = scalar_lea.vmem %s218_s19, 32  ;;  %p6359_p8 = scmp.lt.s32.totalorder %s218_s19, %s218_s19 }
  0x92   :  { %p6355_p7 = scmp.ne.s32.totalorder %s218_s19, %s6354_s7  ;;  %p6360_p9 = scmp.lt.s32.totalorder %s6354_s7, %s6354_s7 }
  0x94   :  { %p6361_p10 = por %p6360_p9, %p6359_p8 }
  0x96   :  { %p6362_p11 = pnand %p6361_p10, %p6355_p7 }
  0x98   :  { %6365 = shalt.err (!%p6362_p11)
}
  0x99   :  { %223 = dma.hbm_to_vmem [thread:$0]  %s6853_s25, 32, %s218_s19, [#allocation18], %s6730_s26, %s6730_s26, %s6731_s28  }
  0x9a   :  { %s6738_s27 = smov [#allocation20]   ;;  %s6739_s11 = smov [#allocation23]  }
  0x9b   :  { %s243_s10 = sshll.u32 %s6738_s27, 4  ;;  %s267_s16 = sshll.u32 %s6739_s11, 4  ;;  %s244_s10 = int_to_ptr.vmem [resolvable:$true] %s243_s10  ;;  %s268_s16 = int_to_ptr.vmem [resolvable:$true] %s267_s16 }
  0x9c   :  { %s6366_s14 = scalar_lea.hbm %s6868_s13, 112 }
  0x9d   :  { %p6367_p12 = scmp.ne.s32.totalorder %s6868_s13, %s6366_s14  ;;  %p6370_p13 = scmp.lt.u32.totalorder %s6366_s14, %s6868_s13 }
  0x9f   :  { %p6372_p0 = pnand %p6370_p13, %p6367_p12 }
  0xa1   :  { %6375 = shalt.err (!%p6372_p0)
}
  0xa2   :  { %s6376_s15 = scalar_lea.vmem %s244_s10, 112  ;;  %s6380_s30 = scalar_lea.vmem %s244_s10, 128 }
  0xa3   :  { %p6377_p1 = scmp.ne.s32.totalorder %s244_s10, %s6376_s15  ;;  %p6381_p2 = scmp.lt.s32.totalorder %s244_s10, %s244_s10 }
  0xa4   :  { %p6382_p3 = scmp.lt.s32.totalorder %s6380_s30, %s6376_s15 }
  0xa6   :  { %p6383_p4 = por %p6382_p3, %p6381_p2 }
  0xa8   :  { %p6384_p5 = pnand %p6383_p4, %p6377_p1 }
  0xaa   :  { %6387 = shalt.err (!%p6384_p5)
}
  0xab   :  { %249 = dma.hbm_to_vmem [thread:$0]  %s6868_s13, 112, %s244_s10, [#allocation21], %s6730_s26, %s6730_s26, %s6731_s28  }
  0xac   :  { %s6388_s25 = scalar_lea.hbm %s6883_s17, 3584 }
  0xad   :  { %p6389_p6 = scmp.ne.s32.totalorder %s6883_s17, %s6388_s25  ;;  %p6392_p7 = scmp.lt.u32.totalorder %s6388_s25, %s6883_s17 }
  0xaf   :  { %p6394_p8 = pnand %p6392_p7, %p6389_p6 }
  0xb1   :  { %6397 = shalt.err (!%p6394_p8)
}
  0xb2   :  { %s6398_s23 = scalar_lea.vmem %s268_s16, 3584  ;;  %p6403_p10 = scmp.lt.s32.totalorder %s268_s16, %s268_s16 }
  0xb3   :  { %p6399_p9 = scmp.ne.s32.totalorder %s268_s16, %s6398_s23  ;;  %p6404_p11 = scmp.lt.s32.totalorder %s6398_s23, %s6398_s23 }
  0xb5   :  { %p6405_p12 = por %p6404_p11, %p6403_p10 }
  0xb7   :  { %p6406_p13 = pnand %p6405_p12, %p6399_p9 }
  0xb9   :  { %6409 = shalt.err (!%p6406_p13)
}
  0xba   :  { %273 = dma.hbm_to_vmem [thread:$0]  %s6883_s17, 3584, %s268_s16, [#allocation24], %s6734_s18, %s6734_s18, %s6735_s22  }
  0xbb   :  { %s6740_s13 = smov [#allocation26]   ;;  %s6741_s19 = smov [#allocation29]  }
  0xbc   :  { %s294_s0 = sshll.u32 %s6740_s13, 4  ;;  %s317_s1 = sshll.u32 %s6741_s19, 4  ;;  %s295_s0 = int_to_ptr.vmem [resolvable:$true] %s294_s0  ;;  %s318_s1 = int_to_ptr.vmem [resolvable:$true] %s317_s1 }
  0xbd   :  { %s6410_s2 = scalar_lea.hbm %s6898_s9, 16 }
  0xbe   :  { %p6411_p0 = scmp.ne.s32.totalorder %s6898_s9, %s6410_s2  ;;  %p6414_p1 = scmp.lt.u32.totalorder %s6410_s2, %s6898_s9 }
  0xc0   :  { %p6416_p2 = pnand %p6414_p1, %p6411_p0 }
  0xc2   :  { %6419 = shalt.err (!%p6416_p2)
}
  0xc3   :  { %s6420_s12 = scalar_lea.vmem %s295_s0, 16  ;;  %s6424_s7 = scalar_lea.vmem %s295_s0, 32 }
  0xc4   :  { %p6421_p3 = scmp.ne.s32.totalorder %s295_s0, %s6420_s12  ;;  %p6425_p4 = scmp.lt.s32.totalorder %s295_s0, %s295_s0 }
  0xc5   :  { %p6426_p5 = scmp.lt.s32.totalorder %s6424_s7, %s6420_s12 }
  0xc7   :  { %p6427_p6 = por %p6426_p5, %p6425_p4 }
  0xc9   :  { %p6428_p7 = pnand %p6427_p6, %p6421_p3 }
  0xcb   :  { %6431 = shalt.err (!%p6428_p7)
}
  0xcc   :  { %297 = dma.hbm_to_vmem [thread:$0]  %s6898_s9, 16, %s295_s0, [#allocation27]  }
  0xcd   :  { %s6432_s17 = scalar_lea.hbm %s6918_s3, 7168 }
  0xce   :  { %p6433_p8 = scmp.ne.s32.totalorder %s6918_s3, %s6432_s17  ;;  %p6436_p9 = scmp.lt.u32.totalorder %s6432_s17, %s6918_s3 }
  0xd0   :  { %p6438_p10 = pnand %p6436_p9, %p6433_p8 }
  0xd2   :  { %6441 = shalt.err (!%p6438_p10)
}
  0xd3   :  { %s6442_s27 = scalar_lea.vmem %s318_s1, 7168  ;;  %p6447_p12 = scmp.lt.s32.totalorder %s318_s1, %s318_s1 }
  0xd4   :  { %p6443_p11 = scmp.ne.s32.totalorder %s318_s1, %s6442_s27  ;;  %p6448_p13 = scmp.lt.s32.totalorder %s6442_s27, %s6442_s27 }
  0xd6   :  { %p6449_p0 = por %p6448_p13, %p6447_p12 }
  0xd8   :  { %p6450_p1 = pnand %p6449_p0, %p6443_p11 }
  0xda   :  { %6453 = shalt.err (!%p6450_p1)
}
  0xdb   :  { %323 = dma.hbm_to_vmem [thread:$0]  %s6918_s3, 7168, %s318_s1, [#allocation30], %s6734_s18, %s6734_s18, %s6735_s22  }
  0xdc   :  { %s6742_s9 = smov [#allocation3]   ;;  %s6743_s11 = smov [#allocation7]  }
  0xdd   :  { %s106_s10 = sshll.u32 %s6742_s9, 4  ;;  %s133_s16 = sshll.u32 %s6743_s11, 4  ;;  %s107_s10 = int_to_ptr.vmem [resolvable:$true] %s106_s10  ;;  %s134_s16 = int_to_ptr.vmem [resolvable:$true] %s133_s16 }
  0xde   :  { %s6454_s14 = scalar_lea.hbm %s6793_s29, 128 }
  0xdf   :  { %p6455_p2 = scmp.ne.s32.totalorder %s6793_s29, %s6454_s14  ;;  %p6458_p3 = scmp.lt.u32.totalorder %s6454_s14, %s6793_s29 }
  0xe1   :  { %p6460_p4 = pnand %p6458_p3, %p6455_p2 }
  0xe3   :  { %6463 = shalt.err (!%p6460_p4)
}
  0xe4   :  { %s6464_s15 = scalar_lea.vmem %s107_s10, 128  ;;  %p6469_p6 = scmp.lt.s32.totalorder %s107_s10, %s107_s10 }
  0xe5   :  { %p6465_p5 = scmp.ne.s32.totalorder %s107_s10, %s6464_s15  ;;  %p6470_p7 = scmp.lt.s32.totalorder %s6464_s15, %s6464_s15 }
  0xe7   :  { %p6471_p8 = por %p6470_p7, %p6469_p6 }
  0xe9   :  { %p6472_p9 = pnand %p6471_p8, %p6465_p5 }
  0xeb   :  { %6475 = shalt.err (!%p6472_p9)
}
  0xec   :  { %109 = dma.hbm_to_vmem [thread:$0]  %s6793_s29, 128, %s107_s10, [#allocation4]  }
  0xed   :  { %s6476_s3 = scalar_lea.hbm %s6818_s24, 32 }
  0xee   :  { %p6477_p10 = scmp.ne.s32.totalorder %s6818_s24, %s6476_s3  ;;  %p6480_p11 = scmp.lt.u32.totalorder %s6476_s3, %s6818_s24 }
  0xf0   :  { %p6482_p12 = pnand %p6480_p11, %p6477_p10 }
  0xf2   :  { %6485 = shalt.err (!%p6482_p12)
}
  0xf3   :  { %s6486_s18 = scalar_lea.vmem %s134_s16, 32  ;;  %p6491_p0 = scmp.lt.s32.totalorder %s134_s16, %s134_s16 }
  0xf4   :  { %p6487_p13 = scmp.ne.s32.totalorder %s134_s16, %s6486_s18  ;;  %p6492_p1 = scmp.lt.s32.totalorder %s6486_s18, %s6486_s18 }
  0xf6   :  { %p6493_p2 = por %p6492_p1, %p6491_p0 }
  0xf8   :  { %p6494_p3 = pnand %p6493_p2, %p6487_p13 }
  0xfa   :  { %6497 = shalt.err (!%p6494_p3)
}
  0xfb   :  { %139 = dma.hbm_to_vmem [thread:$0]  %s6818_s24, 32, %s134_s16, [#allocation6], %s6730_s26, %s6730_s26, %s6731_s28  }
  0xfc   :  { %s6744_s29 = smov [#allocation10]   ;;  %s6745_s30 = smov [#allocation13]  }
  0xfd   :  { %s157_s22 = sshll.u32 %s6744_s29, 4  ;;  %s181_s25 = sshll.u32 %s6745_s30, 4  ;;  %s158_s22 = int_to_ptr.vmem [resolvable:$true] %s157_s22  ;;  %s182_s25 = int_to_ptr.vmem [resolvable:$true] %s181_s25 }
  0xfe   :  { %s6498_s23 = scalar_lea.hbm %s6828_s6, 32 }
  0xff   :  { %p6499_p4 = scmp.ne.s32.totalorder %s6828_s6, %s6498_s23  ;;  %p6502_p5 = scmp.lt.u32.totalorder %s6498_s23, %s6828_s6 }
 0x101   :  { %p6504_p6 = pnand %p6502_p5, %p6499_p4 }
 0x103   :  { %6507 = shalt.err (!%p6504_p6)
}
 0x104   :  { %s6508_s13 = scalar_lea.vmem %s158_s22, 32  ;;  %p6513_p8 = scmp.lt.s32.totalorder %s158_s22, %s158_s22 }
 0x105   :  { %p6509_p7 = scmp.ne.s32.totalorder %s158_s22, %s6508_s13  ;;  %p6514_p9 = scmp.lt.s32.totalorder %s6508_s13, %s6508_s13 }
 0x107   :  { %p6515_p10 = por %p6514_p9, %p6513_p8 }
 0x109   :  { %p6516_p11 = pnand %p6515_p10, %p6509_p7 }
 0x10b   :  { %6519 = shalt.err (!%p6516_p11)
}
 0x10c   :  { %163 = dma.hbm_to_vmem [thread:$0]  %s6828_s6, 32, %s158_s22, [#allocation9], %s6730_s26, %s6730_s26, %s6731_s28  }
 0x10d   :  { %s6520_s24 = scalar_lea.hbm %s6838_s20, 32 }
 0x10e   :  { %p6521_p12 = scmp.ne.s32.totalorder %s6838_s20, %s6520_s24  ;;  %p6524_p13 = scmp.lt.u32.totalorder %s6520_s24, %s6838_s20 }
 0x110   :  { %p6526_p0 = pnand %p6524_p13, %p6521_p12 }
 0x112   :  { %6529 = shalt.err (!%p6526_p0)
}
 0x113   :  { %s6530_s0 = scalar_lea.vmem %s182_s25, 32  ;;  %p6535_p2 = scmp.lt.s32.totalorder %s182_s25, %s182_s25 }
 0x114   :  { %p6531_p1 = scmp.ne.s32.totalorder %s182_s25, %s6530_s0  ;;  %p6536_p3 = scmp.lt.s32.totalorder %s6530_s0, %s6530_s0 }
 0x116   :  { %p6537_p4 = por %p6536_p3, %p6535_p2 }
 0x118   :  { %p6538_p5 = pnand %p6537_p4, %p6531_p1 }
 0x11a   :  { %6541 = shalt.err (!%p6538_p5)
}
 0x11b   :  { %187 = dma.hbm_to_vmem [thread:$0]  %s6838_s20, 32, %s182_s25, [#allocation12], %s6730_s26, %s6730_s26, %s6731_s28  }
 0x11c   :  { %s6746_s6 = smov [#allocation16]   ;;  %s6747_s1 = smov [#allocation19]  }
 0x11d   :  { %s205_s19 = sshll.u32 %s6746_s6, 4  ;;  %s229_s2 = sshll.u32 %s6747_s1, 4  ;;  %s206_s19 = int_to_ptr.vmem [resolvable:$true] %s205_s19  ;;  %s230_s2 = int_to_ptr.vmem [resolvable:$true] %s229_s2 }
 0x11e   :  { %s6542_s12 = scalar_lea.hbm %s6848_s4, 32 }
 0x11f   :  { %p6543_p6 = scmp.ne.s32.totalorder %s6848_s4, %s6542_s12  ;;  %p6546_p7 = scmp.lt.u32.totalorder %s6542_s12, %s6848_s4 }
 0x121   :  { %p6548_p8 = pnand %p6546_p7, %p6543_p6 }
 0x123   :  { %6551 = shalt.err (!%p6548_p8)
}
 0x124   :  { %s6552_s7 = scalar_lea.vmem %s206_s19, 32  ;;  %p6557_p10 = scmp.lt.s32.totalorder %s206_s19, %s206_s19 }
 0x125   :  { %p6553_p9 = scmp.ne.s32.totalorder %s206_s19, %s6552_s7  ;;  %p6558_p11 = scmp.lt.s32.totalorder %s6552_s7, %s6552_s7 }
 0x127   :  { %p6559_p12 = por %p6558_p11, %p6557_p10 }
 0x129   :  { %p6560_p13 = pnand %p6559_p12, %p6553_p9 }
 0x12b   :  { %6563 = shalt.err (!%p6560_p13)
}
 0x12c   :  { %s7326_s20 = sld [smem:[#allocation51_spill]] }
 0x12d   :  { %211 = dma.hbm_to_vmem [thread:$0]  %s6848_s4, 32, %s206_s19, [#allocation15], %s6730_s26, %s6730_s26, %s6731_s28  }
 0x132   :  { %s6564_s17 = scalar_lea.hbm %s7326_s20, 32 }
 0x133   :  { %p6565_p0 = scmp.ne.s32.totalorder %s7326_s20, %s6564_s17  ;;  %p6568_p1 = scmp.lt.u32.totalorder %s6564_s17, %s7326_s20 }
 0x135   :  { %p6570_p2 = pnand %p6568_p1, %p6565_p0 }
 0x137   :  { %6573 = shalt.err (!%p6570_p2)
}
 0x138   :  { %s6574_s27 = scalar_lea.vmem %s230_s2, 32  ;;  %p6579_p4 = scmp.lt.s32.totalorder %s230_s2, %s230_s2 }
 0x139   :  { %p6575_p3 = scmp.ne.s32.totalorder %s230_s2, %s6574_s27  ;;  %p6580_p5 = scmp.lt.s32.totalorder %s6574_s27, %s6574_s27 }
 0x13b   :  { %p6581_p6 = por %p6580_p5, %p6579_p4 }
 0x13d   :  { %p6582_p7 = pnand %p6581_p6, %p6575_p3 }
 0x13f   :  { %6585 = shalt.err (!%p6582_p7)
}
 0x140   :  { %s7327_s9 = sld [smem:[#allocation54_spill]]  ;;  %s6748_s4 = smov [#allocation22]  }
 0x141   :  { %235 = dma.hbm_to_vmem [thread:$0]  %s7326_s20, 32, %s230_s2, [#allocation18], %s6730_s26, %s6730_s26, %s6731_s28  }
 0x142   :  { %s258_s10 = sshll.u32 %s6748_s4, 4  ;;  %s6749_s11 = smov [#allocation25]   ;;  %s259_s10 = int_to_ptr.vmem [resolvable:$true] %s258_s10 }
 0x143   :  { %s279_s16 = sshll.u32 %s6749_s11, 4  ;;  %s280_s16 = int_to_ptr.vmem [resolvable:$true] %s279_s16 }
 0x146   :  { %s6586_s14 = scalar_lea.hbm %s7327_s9, 16 }
 0x147   :  { %p6587_p8 = scmp.ne.s32.totalorder %s7327_s9, %s6586_s14  ;;  %p6590_p9 = scmp.lt.u32.totalorder %s6586_s14, %s7327_s9 }
 0x149   :  { %p6592_p10 = pnand %p6590_p9, %p6587_p8 }
 0x14b   :  { %6595 = shalt.err (!%p6592_p10)
}
 0x14c   :  { %s6596_s15 = scalar_lea.vmem %s259_s10, 16  ;;  %s6600_s3 = scalar_lea.vmem %s259_s10, 32 }
 0x14d   :  { %p6597_p11 = scmp.ne.s32.totalorder %s259_s10, %s6596_s15  ;;  %p6601_p12 = scmp.lt.s32.totalorder %s259_s10, %s259_s10 }
 0x14e   :  { %p6602_p13 = scmp.lt.s32.totalorder %s6600_s3, %s6596_s15 }
 0x150   :  { %p6603_p0 = por %p6602_p13, %p6601_p12 }
 0x152   :  { %p6604_p1 = pnand %p6603_p0, %p6597_p11 }
 0x154   :  { %6607 = shalt.err (!%p6604_p1)
}
 0x155   :  { %s7328_s18 = sld [smem:[#allocation55_spill]] }
 0x156   :  { %261 = dma.hbm_to_vmem [thread:$0]  %s7327_s9, 16, %s259_s10, [#allocation21]  }
 0x15b   :  { %s6608_s29 = scalar_lea.hbm %s7328_s18, 112 }
 0x15c   :  { %p6609_p2 = scmp.ne.s32.totalorder %s7328_s18, %s6608_s29  ;;  %p6612_p3 = scmp.lt.u32.totalorder %s6608_s29, %s7328_s18 }
 0x15e   :  { %p6614_p4 = pnand %p6612_p3, %p6609_p2 }
 0x160   :  { %6617 = shalt.err (!%p6614_p4)
}
 0x161   :  { %s6618_s22 = scalar_lea.vmem %s280_s16, 112  ;;  %s6622_s30 = scalar_lea.vmem %s280_s16, 128 }
 0x162   :  { %p6619_p5 = scmp.ne.s32.totalorder %s280_s16, %s6618_s22  ;;  %p6623_p6 = scmp.lt.s32.totalorder %s280_s16, %s280_s16 }
 0x163   :  { %p6624_p7 = scmp.lt.s32.totalorder %s6622_s30, %s6618_s22 }
 0x165   :  { %p6625_p8 = por %p6624_p7, %p6623_p6 }
 0x167   :  { %p6626_p9 = pnand %p6625_p8, %p6619_p5 }
 0x169   :  { %6629 = shalt.err (!%p6626_p9)
}
 0x16a   :  { %s7329_s25 = sld [smem:[#allocation59_spill]]  ;;  %s6750_s23 = smov [#allocation28]  }
 0x16b   :  { %285 = dma.hbm_to_vmem [thread:$0]  %s7328_s18, 112, %s280_s16, [#allocation24], %s6730_s26, %s6730_s26, %s6731_s28  }
 0x16c   :  { %s308_s13 = sshll.u32 %s6750_s23, 4  ;;  %s6751_s24 = smov [#allocation31]   ;;  %s309_s13 = int_to_ptr.vmem [resolvable:$true] %s308_s13 }
 0x16d   :  { %s329_s0 = sshll.u32 %s6751_s24, 4  ;;  %s330_s0 = int_to_ptr.vmem [resolvable:$true] %s329_s0 }
 0x170   :  { %s6630_s6 = scalar_lea.hbm %s7329_s25, 16 }
 0x171   :  { %p6631_p10 = scmp.ne.s32.totalorder %s7329_s25, %s6630_s6  ;;  %p6634_p11 = scmp.lt.u32.totalorder %s6630_s6, %s7329_s25 }
 0x173   :  { %p6636_p12 = pnand %p6634_p11, %p6631_p10 }
 0x175   :  { %6639 = shalt.err (!%p6636_p12)
}
 0x176   :  { %s6640_s19 = scalar_lea.vmem %s309_s13, 16  ;;  %s6644_s1 = scalar_lea.vmem %s309_s13, 32 }
 0x177   :  { %p6641_p13 = scmp.ne.s32.totalorder %s309_s13, %s6640_s19  ;;  %p6645_p0 = scmp.lt.s32.totalorder %s309_s13, %s309_s13 }
 0x178   :  { %p6646_p1 = scmp.lt.s32.totalorder %s6644_s1, %s6640_s19 }
 0x17a   :  { %p6647_p2 = por %p6646_p1, %p6645_p0 }
 0x17c   :  { %p6648_p3 = pnand %p6647_p2, %p6641_p13 }
 0x17e   :  { %6651 = shalt.err (!%p6648_p3)
}
 0x17f   :  { %311 = dma.hbm_to_vmem [thread:$0]  %s7329_s25, 16, %s309_s13, [#allocation27]  }
 0x180   :  { %s6652_s2 = scalar_lea.hbm %s6923_s5, 224 }
 0x181   :  { %p6653_p4 = scmp.ne.s32.totalorder %s6923_s5, %s6652_s2  ;;  %p6656_p5 = scmp.lt.u32.totalorder %s6652_s2, %s6923_s5 }
 0x183   :  { %p6658_p6 = pnand %p6656_p5, %p6653_p4 }
 0x185   :  { %6661 = shalt.err (!%p6658_p6)
}
 0x186   :  { %s6662_s12 = scalar_lea.vmem %s330_s0, 224  ;;  %p6667_p8 = scmp.lt.s32.totalorder %s330_s0, %s330_s0 }
 0x187   :  { %p6663_p7 = scmp.ne.s32.totalorder %s330_s0, %s6662_s12  ;;  %p6668_p9 = scmp.lt.s32.totalorder %s6662_s12, %s6662_s12 }
 0x189   :  { %p6669_p10 = por %p6668_p9, %p6667_p8 }
 0x18b   :  { %p6670_p11 = pnand %p6669_p10, %p6663_p7 }
 0x18d   :  { %6673 = shalt.err (!%p6670_p11)
}
 0x18e   :  { %335 = dma.hbm_to_vmem [thread:$0]  %s6923_s5, 224, %s330_s0, [#allocation30], %s6730_s26, %s6730_s26, %s6731_s28  }
 0x18f   :  { %6674 = dma.done.wait [#allocation4], 128  }
 0x190   :  { %6675 = vsyncadd [#allocation4], 4294967168 }
 0x191   :  { %6676 = dma.done.wait [#allocation6], 64  }
 0x192   :  { %6677 = vsyncadd [#allocation6], 4294967232 }
 0x193   :  { %6678 = dma.done.wait [#allocation9], 64  }
 0x194   :  { %6679 = vsyncadd [#allocation9], 4294967232 }
 0x195   :  { %6680 = dma.done.wait [#allocation12], 1056  }
 0x196   :  { %6681 = vsyncadd [#allocation12], 4294966240 }
 0x197   :  { %6682 = dma.done.wait [#allocation15], 1056  }
 0x198   :  { %6683 = vsyncadd [#allocation15], 4294966240 }
 0x199   :  { %6684 = dma.done.wait [#allocation18], 64  }
 0x19a   :  { %6685 = vsyncadd [#allocation18], 4294967232 }
 0x19b   :  { %6686 = dma.done.wait [#allocation21], 128  }
 0x19c   :  { %6687 = vsyncadd [#allocation21], 4294967168 }
 0x19d   :  { %6688 = dma.done.wait [#allocation24], 3696  }
 0x19e   :  { %6689 = vsyncadd [#allocation24], 4294963600 }
 0x19f   :  { %6690 = dma.done.wait [#allocation27], 32  }
 0x1a0   :  { %6691 = vsyncadd [#allocation27], 4294967264 }
 0x1a1   :  { %6692 = dma.done.wait [#allocation30], 7392  }
 0x1a2   :  { %6693 = vsyncadd [#allocation30], 4294959904  ;;  %s7330_s5 = sld [smem:[#allocation42_spill]]  ;;  %s7331_s26 = sld [smem:[#allocation43_spill]]  ;;  %vm407_vm0 = vcmask 64512   ;;  %v7059_v1 = vld [vmem:[#allocation3] sm:$0xff] }
 0x1a3   :  { %s7332_s28 = sld [smem:[#allocation49_spill]]  ;;  %5394 = vmatprep.subr.mxu0 %v7059_v1  ;;  %s7333_s7 = sld [smem:[#allocation48_spill]]  ;;  %vm491_vm1 = vcmask 130048   ;;  %vm584_vm2 = vcmask 261120   ;;  %v4979_v26 = vld [vmem:[#allocation5] ss:$0 sm:$0xff] }
 0x1a4   :  { %5395 = vmatpush3.msra.mxu0 %v7059_v1  ;;  %s7334_s20 = sld [smem:[#allocation50_spill]]  ;;  %v4982_v40 = vld [vmem:[#allocation7] ss:$0 sm:$0xff]  ;;  %v4985_v44 = vld [vmem:[#allocation8] ss:$0 sm:$0xff]  ;;  %s7335_s17 = sld [smem:[#allocation52_spill]] }
 0x1a5   :  { %v4986_v47 = vld [vmem:[#allocation10] ss:$0 sm:$0xff]  ;;  %s7336_s27 = sld [smem:[#allocation53_spill]]  ;;  %s7337_s9 = sld [smem:[#allocation44_spill]]  ;;  %vm6753_vm3 = vmmov 0   ;;  %vm4922_vm4 = vcmask 7168  }
 0x1a6   :  { %s7338_s4 = sld [smem:[#allocation45_spill]]  ;;  %s7339_s10 = sld [smem:[#allocation56_spill]] }
 0x1a7   :  { %s7340_s11 = sld [smem:[#allocation46_spill]]  ;;  %s7341_s16 = sld [smem:[#allocation47_spill]] }
 0x1a8   :  { %v397_v2 = vld [vmem:[%s7330_s5] sm:$0xff]  ;;  %v398_v3 = vld [vmem:[%s7330_s5 + $0x8] sm:$0xff]  ;;  %v4987_v33 = vld [vmem:[%s7331_s26 + $0x10] sm:$0xff]  ;;  %s7342_s14 = sld [smem:[#allocation58_spill]]  ;;  %s7343_s15 = sld [smem:[#allocation57_spill]] }
 0x1a9   :  { %5396 = vmatprep.mubr.msk.f32.mxu0 %vm407_vm0, %v397_v2  ;;  %v489_v4 = vld [vmem:[%s7331_s26] sm:$0xff]  ;;  %v574_v6 = vld [vmem:[%s7332_s28 + $0x8] sm:$0xff]  ;;  %v575_v7 = vld [vmem:[%s7332_s28 + $0x10] sm:$0xff] }
 0x1aa   :  { %5397 = vmatmul.mubr.msk.f32.vlgmr.msra.gmra.mrb[0].mxu0 %vm407_vm0, %v398_v3  ;;  %5403 = vmatprep.mubr.msk.f32.mxu1 %vm491_vm1, %v489_v4  ;;  %v573_v5 = vld [vmem:[%s7332_s28] sm:$0xff]  ;;  %v576_v9 = vld [vmem:[%s7332_s28 + $0x18] sm:$0xff]  ;;  %v490_v17 = vld [vmem:[%s7331_s26 + $0x8] sm:$0xff] }
 0x1ab   :  { %v5885_v8 = vpack.c.bf16 %v574_v6, %v573_v5  ;;  %v5889_v10 = vpack.c.bf16 %v576_v9, %v575_v7  ;;  %v7074_v11 = vld [vmem:[%s7333_s7] ss:$0 sm:$0xff]  ;;  %v669_v19 = vld [vmem:[%s7334_s20 + $0x8] sm:$0xff]  ;;  %v670_v23 = vld [vmem:[%s7334_s20 + $0x10] sm:$0xff] }
 0x1ac   :  { %v668_v18 = vld [vmem:[%s7334_s20] sm:$0xff]  ;;  %v671_v24 = vld [vmem:[%s7334_s20 + $0x18] sm:$0xff]  ;;  %v4992_v35 = vld [vmem:[%s7332_s28 + $0x28] sm:$0xff] }
 0x1ad   :  { %5886 = vmatprep.subr.bf16.mxu0 %v5885_v8  ;;  %v5893_v20 = vpack.c.bf16 %v669_v19, %v668_v18  ;;  %v5897_v25 = vpack.c.bf16 %v671_v24, %v670_v23  ;;  %v4991_v34 = vld [vmem:[%s7332_s28 + $0x20] sm:$0xff]  ;;  %v4993_v36 = vld [vmem:[%s7332_s28 + $0x30] sm:$0xff]  ;;  %v4994_v38 = vld [vmem:[%s7332_s28 + $0x38] sm:$0xff] }
 0x1ae   :  { %5888 = vmatpush3.bf16.msra.mxu0 %v5885_v8  ;;  %v5905_v37 = vpack.c.bf16 %v4992_v35, %v4991_v34  ;;  %v5909_v39 = vpack.c.bf16 %v4994_v38, %v4993_v36  ;;  %v4988_v58 = vld [vmem:[%s7331_s26 + $0x18] sm:$0xff]  ;;  %v4998_v59 = vld [vmem:[%s7334_s20 + $0x20] sm:$0xff]  ;;  %v4999_v60 = vld [vmem:[%s7334_s20 + $0x28] sm:$0xff] }
 0x1af   :  { %5890 = vmatprep.subr.bf16.mxu0 %v5889_v10  ;;  %v5913_v61 = vpack.c.bf16 %v4999_v60, %v4998_v59  ;;  %v5000_v0 = vld [vmem:[%s7334_s20 + $0x30] sm:$0xff]  ;;  %v5001_v2 = vld [vmem:[%s7334_s20 + $0x38] sm:$0xff]  ;;  %v4995_v4 = vld [vmem:[#allocation5 + $0x1] ss:$0 sm:$0xff] }
 0x1b0   :  { %v5917_v3 = vpack.c.bf16 %v5001_v2, %v5000_v0  ;;  %v5010_v18 = vld [vmem:[%s7335_s17 + $0x20] sm:$0xff]  ;;  %v5011_v19 = vld [vmem:[%s7335_s17 + $0x28] sm:$0xff]  ;;  %v5012_v38 = vld [vmem:[%s7335_s17 + $0x30] sm:$0xff] }
 0x1b1   :  { %v5026_v0 = vld [vmem:[%s7335_s17 + $0x70] sm:$0xff]  ;;  %v5027_v2 = vld [vmem:[%s7335_s17 + $0x78] sm:$0xff] }
 0x1b2   :  { %5892 = vmatpush3.bf16.msra.mxu0 %v5889_v10 }
 0x27d   :  { %v5398_v12 = vpop.f32.mrb[0].mxu0 }
 0x27e   :  { %v486_v13 = vadd.f32 %v5398_v12, %v7074_v11  ;;  %v480_v14 = vpop.f32.mrb[1].mxu0  ;;  %v1084_v12 = vld [vmem:[%s7335_s17] sm:$0xff] }
 0x27f   :  { %v481_v15 = vadd.f32 %v7074_v11, %v480_v14 }
 0x281   :  { %v5881_v16 = vpack.c.bf16 %v486_v13, %v481_v15 }
 0x283   :  { %5882 = vmatprep.subr.bf16.mxu1 %v5881_v16 }
 0x284   :  { %5884 = vmatpush3.bf16.msra.mxu1 %v5881_v16  ;;  %v1087_v16 = vld [vmem:[%s7335_s17 + $0x18] sm:$0xff] }
 0x285   :  { %5894 = vmatprep.subr.bf16.mxu1 %v5893_v20 }
 0x287   :  { %5404 = vmatmul.mubr.msk.f32.vlgmr.msra.gmra.mrb[0].mxu1 %vm491_vm1, %v490_v17 }
 0x288   :  { %5896 = vmatpush3.bf16.msra.mxu1 %v5893_v20  ;;  %v5929_v20 = vpack.c.bf16 %v5011_v19, %v5010_v18  ;;  %v5038_v18 = vld [vmem:[%s7335_s17 + $0xa0] sm:$0xff]  ;;  %v5039_v19 = vld [vmem:[%s7335_s17 + $0xa8] sm:$0xff] }
 0x289   :  { %5898 = vmatprep.subr.bf16.mxu1 %v5897_v25 }
 0x28c   :  { %5900 = vmatpush3.bf16.msra.mxu1 %v5897_v25  ;;  %v5005_v25 = vld [vmem:[#allocation8 + $0x1] ss:$0 sm:$0xff] }
 0x28d   :  { %5906 = vmatprep.subr.bf16.mxu1 %v5905_v37 }
 0x35a   :  { %v5405_v21 = vpop.f32.mrb[0].mxu1 }
 0x35b   :  { %v564_v22 = vpop.f32.mrb[1].mxu1 }
 0x35c   :  { %5414 = vmatprep.mubr.msk.f32.mxu0 %vm584_vm2, %v564_v22 }
 0x35d   :  { %5415 = vmatmul.mubr.msk.f32.vlgmr.msra.gmra.mrb[2].mxu0 %vm584_vm2, %v5405_v21  ;;  %v5002_v21 = vld [vmem:[#allocation7 + $0x1] ss:$0 sm:$0xff] }
 0x35e   :  { %5432 = vmatprep.mubr.msk.f32.mxu0 %vm491_vm1, %v4987_v33 }
 0x430   :  { %v5416_v27 = vpop.f32.mrb[2].mxu0 }
 0x431   :  { %v663_v28 = vadd.f32 %v5416_v27, %v4979_v26  ;;  %v657_v29 = vpop.f32.mrb[3].mxu0 }
 0x432   :  { %v658_v30 = vadd.f32 %v4979_v26, %v657_v29 }
 0x433   :  { %v667_v32 = vmax.f32 %v663_v28, 0.0  ;;  %v5006_v28 = vld [vmem:[#allocation10 + $0x1] ss:$0 sm:$0xff] }
 0x434   :  { %v666_v31 = vmax.f32 %v658_v30, 0.0 }
 0x436   :  { %5425 = vmatprep.mubr.msk.f32.mxu1 %vm584_vm2, %v666_v31 }
 0x437   :  { %5426 = vmatmul.mubr.msk.f32.vlgmr.msra.gmra.mrb[2].mxu1 %vm584_vm2, %v667_v32 }
 0x438   :  { %5908 = vmatpush3.bf16.msra.mxu1 %v5905_v37 }
 0x439   :  { %5910 = vmatprep.subr.bf16.mxu1 %v5909_v39 }
 0x43c   :  { %5912 = vmatpush3.bf16.msra.mxu1 %v5909_v39  ;;  %v5013_v39 = vld [vmem:[%s7335_s17 + $0x38] sm:$0xff] }
 0x50a   :  { %v5427_v41 = vpop.f32.mrb[2].mxu1 }
 0x50b   :  { %v757_v42 = vadd.f32 %v5427_v41, %v4982_v40  ;;  %v751_v43 = vpop.f32.mrb[3].mxu1  ;;  %v5017_v41 = vld [vmem:[%s7335_s17 + $0x40] sm:$0xff] }
 0x50c   :  { %v752_v45 = vadd.f32 %v4982_v40, %v751_v43  ;;  %v5933_v40 = vpack.c.bf16 %v5013_v39, %v5012_v38 }
 0x50d   :  { %v761_v46 = vmax.f32 %v757_v42, 0.0  ;;  %v5018_v42 = vld [vmem:[%s7335_s17 + $0x48] sm:$0xff] }
 0x50e   :  { %v760_v48 = vmax.f32 %v752_v45, 0.0  ;;  %v5937_v43 = vpack.c.bf16 %v5018_v42, %v5017_v41  ;;  %v5047_v41 = vld [vmem:[%s7335_s17 + $0xd0] sm:$0xff]  ;;  %v5048_v42 = vld [vmem:[%s7335_s17 + $0xd8] sm:$0xff] }
 0x50f   :  { %v770_v49 = vmul.f32 %v4985_v44, %v761_v46 }
 0x510   :  { %v769_v50 = vmul.f32 %v4985_v44, %v760_v48  ;;  %v5007_v44 = vld [vmem:[#allocation20] ss:$0 sm:$0xff] }
 0x511   :  { %v779_v51 = vadd.f32 %v4986_v47, %v770_v49 }
 0x512   :  { %v778_v52 = vadd.f32 %v4986_v47, %v769_v50 }
 0x513   :  { %v781_v53 = vmax.f32 %v779_v51, 0.0  ;;  %v5019_v51 = vld [vmem:[%s7335_s17 + $0x50] sm:$0xff] }
 0x514   :  { %v780_v54 = vmax.f32 %v778_v52, 0.0  ;;  %v5020_v52 = vld [vmem:[%s7335_s17 + $0x58] sm:$0xff] }
 0x515   :  { %v783_v55 = vadd.f32 %v781_v53, %v486_v13  ;;  %v1085_v13 = vld [vmem:[%s7335_s17 + $0x8] sm:$0xff]  ;;  %v5941_v53 = vpack.c.bf16 %v5020_v52, %v5019_v51 }
 0x516   :  { %v782_v56 = vadd.f32 %v780_v54, %v481_v15  ;;  %v5921_v14 = vpack.c.bf16 %v1085_v13, %v1084_v12  ;;  %v1086_v15 = vld [vmem:[%s7335_s17 + $0x10] sm:$0xff]  ;;  %v5024_v54 = vld [vmem:[%s7335_s17 + $0x60] sm:$0xff] }
 0x517   :  { %v5925_v17 = vpack.c.bf16 %v1087_v16, %v1086_v15  ;;  %v5033_v15 = vld [vmem:[%s7335_s17 + $0x90] sm:$0xff]  ;;  %v5034_v16 = vld [vmem:[%s7335_s17 + $0x98] sm:$0xff] }
 0x518   :  { %v5901_v57 = vpack.c.bf16 %v783_v55, %v782_v56  ;;  %5922 = vmatprep.subr.bf16.mxu1 %v5921_v14 }
 0x51a   :  { %5902 = vmatprep.subr.bf16.mxu0 %v5901_v57 }
 0x51b   :  { %5904 = vmatpush3.bf16.msra.mxu0 %v5901_v57  ;;  %v5014_v57 = vld [vmem:[#allocation20 + $0x1] ss:$0 sm:$0xff] }
 0x51c   :  { %5914 = vmatprep.subr.bf16.mxu0 %v5913_v61 }
 0x51e   :  { %5433 = vmatmul.mubr.msk.f32.vlgmr.msra.gmra.mrb[4].mxu0 %vm491_vm1, %v4988_v58 }
 0x51f   :  { %5916 = vmatpush3.bf16.msra.mxu0 %v5913_v61 }
 0x520   :  { %5918 = vmatprep.subr.bf16.mxu0 %v5917_v3 }
 0x523   :  { %5920 = vmatpush3.bf16.msra.mxu0 %v5917_v3  ;;  %v5949_v3 = vpack.c.bf16 %v5027_v2, %v5026_v0 }
 0x524   :  { %5930 = vmatprep.subr.bf16.mxu0 %v5929_v20 }
 0x5f1   :  { %v5434_v62 = vpop.f32.mrb[4].mxu0 }
 0x5f2   :  { %v859_v63 = vpop.f32.mrb[5].mxu0 }
 0x5f3   :  { %5443 = vmatprep.mubr.msk.f32.mxu1 %vm584_vm2, %v859_v63 }
 0x5f4   :  { %5444 = vmatmul.mubr.msk.f32.vlgmr.msra.gmra.mrb[4].mxu1 %vm584_vm2, %v5434_v62 }
 0x5f5   :  { %5924 = vmatpush3.bf16.msra.mxu1 %v5921_v14 }
 0x5f6   :  { %5926 = vmatprep.subr.bf16.mxu1 %v5925_v17 }
 0x5f9   :  { %5928 = vmatpush3.bf16.msra.mxu1 %v5925_v17  ;;  %v5957_v17 = vpack.c.bf16 %v5034_v16, %v5033_v15 }
 0x5fa   :  { %5938 = vmatprep.subr.bf16.mxu1 %v5937_v43 }
 0x6c7   :  { %v5445_v5 = vpop.f32.mrb[4].mxu1 }
 0x6c8   :  { %v959_v6 = vadd.f32 %v5445_v5, %v4995_v4  ;;  %v953_v7 = vpop.f32.mrb[5].mxu1  ;;  %v5032_v5 = vld [vmem:[%s7335_s17 + $0x88] sm:$0xff] }
 0x6c9   :  { %v954_v8 = vadd.f32 %v4995_v4, %v953_v7  ;;  %v5031_v4 = vld [vmem:[%s7335_s17 + $0x80] sm:$0xff]  ;;  %v5021_v7 = vld [vmem:[#allocation20 + $0x2] ss:$0 sm:$0xff] }
 0x6ca   :  { %v963_v10 = vmax.f32 %v959_v6, 0.0  ;;  %v5953_v6 = vpack.c.bf16 %v5032_v5, %v5031_v4 }
 0x6cb   :  { %v962_v9 = vmax.f32 %v954_v8, 0.0 }
 0x6cd   :  { %5454 = vmatprep.mubr.msk.f32.mxu0 %vm584_vm2, %v962_v9 }
 0x6ce   :  { %5455 = vmatmul.mubr.msk.f32.vlgmr.msra.gmra.mrb[6].mxu0 %vm584_vm2, %v963_v10 }
 0x6cf   :  { %5932 = vmatpush3.bf16.msra.mxu0 %v5929_v20  ;;  %v5961_v20 = vpack.c.bf16 %v5039_v19, %v5038_v18 }
 0x6d0   :  { %5934 = vmatprep.subr.bf16.mxu0 %v5933_v40 }
 0x6d3   :  { %5936 = vmatpush3.bf16.msra.mxu0 %v5933_v40 }
 0x7a1   :  { %v5456_v22 = vpop.f32.mrb[6].mxu0 }
 0x7a2   :  { %v1055_v23 = vadd.f32 %v5456_v22, %v5002_v21  ;;  %v1049_v24 = vpop.f32.mrb[7].mxu0 }
 0x7a3   :  { %v1050_v26 = vadd.f32 %v5002_v21, %v1049_v24  ;;  %v5028_v21 = vld [vmem:[#allocation20 + $0x3] ss:$0 sm:$0xff] }
 0x7a4   :  { %v1059_v27 = vmax.f32 %v1055_v23, 0.0 }
 0x7a5   :  { %v1058_v29 = vmax.f32 %v1050_v26, 0.0 }
 0x7a6   :  { %v1069_v30 = vmul.f32 %v5005_v25, %v1059_v27 }
 0x7a7   :  { %v1068_v31 = vmul.f32 %v5005_v25, %v1058_v29  ;;  %v5041_v29 = vld [vmem:[%s7335_s17 + $0xb8] sm:$0xff] }
 0x7a8   :  { %v1079_v32 = vadd.f32 %v5006_v28, %v1069_v30 }
 0x7a9   :  { %v1078_v33 = vadd.f32 %v5006_v28, %v1068_v31  ;;  %v5040_v28 = vld [vmem:[%s7335_s17 + $0xb0] sm:$0xff]  ;;  %v5045_v31 = vld [vmem:[%s7335_s17 + $0xc0] sm:$0xff] }
 0x7aa   :  { %v1081_v34 = vmax.f32 %v1079_v32, 0.0  ;;  %v5965_v30 = vpack.c.bf16 %v5041_v29, %v5040_v28  ;;  %v5046_v32 = vld [vmem:[%s7335_s17 + $0xc8] sm:$0xff]  ;;  %v2258_v28 = vld [vmem:[#allocation11 + $0x20] sm:$0xff]  ;;  %v2259_v29 = vld [vmem:[#allocation11 + $0x28] sm:$0xff] }
 0x7ab   :  { %v1080_v35 = vmax.f32 %v1078_v33, 0.0  ;;  %v5969_v33 = vpack.c.bf16 %v5046_v32, %v5045_v31  ;;  %v5998_v31 = vpack.c.bf16 %v2259_v29, %v2258_v28  ;;  %v2261_v32 = vld [vmem:[#allocation11 + $0x38] sm:$0xff] }
 0x7ac   :  { %v1083_v37 = vadd.f32 %v1081_v34, %v783_v55  ;;  %v5025_v55 = vld [vmem:[%s7335_s17 + $0x68] sm:$0xff]  ;;  %v5035_v34 = vld [vmem:[#allocation20 + $0x4] ss:$0 sm:$0xff] }
 0x7ad   :  { %v1082_v36 = vadd.f32 %v1080_v35, %v782_v56  ;;  %v5945_v56 = vpack.c.bf16 %v5025_v55, %v5024_v54  ;;  %v1846_v55 = vld [vmem:[%s7337_s9] sm:$0xff] }
 0x7af   :  { %5465 = vmatprep.mubr.msk.f32.mxu1 %vm584_vm2, %v1082_v36  ;;  %5946 = vmatprep.subr.bf16.mxu0 %v5945_v56 }
 0x7b0   :  { %5466 = vmatmul.mubr.msk.f32.vlgmr.msra.gmra.mrb[6].mxu1 %vm584_vm2, %v1083_v37 }
 0x7b1   :  { %5940 = vmatpush3.bf16.msra.mxu1 %v5937_v43  ;;  %v5973_v43 = vpack.c.bf16 %v5048_v42, %v5047_v41 }
 0x7b2   :  { %5942 = vmatprep.subr.bf16.mxu1 %v5941_v53 }
 0x7b5   :  { %5944 = vmatpush3.bf16.msra.mxu1 %v5941_v53 }
 0x7b6   :  { %5954 = vmatprep.subr.bf16.mxu1 %v5953_v6 }
 0x883   :  { %v5467_v45 = vpop.f32.mrb[6].mxu1 }
 0x884   :  { %v1173_v46 = vadd.f32 %v5467_v45, %v5007_v44  ;;  %v1167_v47 = vpop.f32.mrb[7].mxu1  ;;  %v1754_v45 = vld [vmem:[%s7336_s27] sm:$0xff] }
 0x885   :  { %v1168_v48 = vadd.f32 %v5007_v44, %v1167_v47  ;;  %v6752_v44 = vmov 0.0  }
 0x886   :  { %v1177_v50 = vmax.f32 %v1173_v46, 0.0  ;;  %v1755_v46 = vld [vmem:[%s7336_s27 + $0x8] sm:$0xff] }
 0x887   :  { %v1176_v49 = vmax.f32 %v1168_v48, 0.0  ;;  %v5977_v47 = vpack.c.bf16 %v1755_v46, %v1754_v45  ;;  %v5042_v48 = vld [vmem:[#allocation20 + $0x5] ss:$0 sm:$0xff]  ;;  %v5063_v46 = vld [vmem:[%s7338_s4 + $0x8] sm:$0xff] }
 0x889   :  { %5476 = vmatprep.mubr.msk.f32.mxu0 %vm584_vm2, %v1176_v49 }
 0x88a   :  { %5477 = vmatmul.mubr.msk.f32.vlgmr.msra.gmra.mrb[8].mxu0 %vm584_vm2, %v1177_v50 }
 0x88b   :  { %5948 = vmatpush3.bf16.msra.mxu0 %v5945_v56  ;;  %v1756_v56 = vld [vmem:[%s7336_s27 + $0x10] sm:$0xff] }
 0x88c   :  { %5950 = vmatprep.subr.bf16.mxu0 %v5949_v3 }
 0x88f   :  { %5952 = vmatpush3.bf16.msra.mxu0 %v5949_v3 }
 0x890   :  { %5962 = vmatprep.subr.bf16.mxu0 %v5961_v20 }
 0x95d   :  { %v5478_v58 = vpop.f32.mrb[8].mxu0 }
 0x95e   :  { %v1269_v59 = vadd.f32 %v5478_v58, %v5014_v57  ;;  %v1263_v60 = vpop.f32.mrb[9].mxu0 }
 0x95f   :  { %v1264_v61 = vadd.f32 %v5014_v57, %v1263_v60  ;;  %v1757_v57 = vld [vmem:[%s7336_s27 + $0x18] sm:$0xff] }
 0x960   :  { %v1273_v63 = vmax.f32 %v1269_v59, 0.0  ;;  %v5981_v58 = vpack.c.bf16 %v1757_v57, %v1756_v56  ;;  %v1994_v59 = vld [vmem:[#allocation11] sm:$0xff]  ;;  %v1995_v60 = vld [vmem:[#allocation11 + $0x8] sm:$0xff] }
 0x961   :  { %v1272_v62 = vmax.f32 %v1264_v61, 0.0  ;;  %v5986_v61 = vpack.c.bf16 %v1995_v60, %v1994_v59  ;;  %v2451_v60 = vld [vmem:[#allocation23] sm:$0xff] }
 0x963   :  { %5487 = vmatprep.mubr.msk.f32.mxu1 %vm584_vm2, %v1272_v62  ;;  %v5049_v62 = vld [vmem:[#allocation20 + $0x6] ss:$0 sm:$0xff] }
 0x964   :  { %5488 = vmatmul.mubr.msk.f32.vlgmr.msra.gmra.mrb[8].mxu1 %vm584_vm2, %v1273_v63 }
 0x965   :  { %5956 = vmatpush3.bf16.msra.mxu1 %v5953_v6 }
 0x966   :  { %5958 = vmatprep.subr.bf16.mxu1 %v5957_v17 }
 0x969   :  { %5960 = vmatpush3.bf16.msra.mxu1 %v5957_v17 }
 0x96a   :  { %5970 = vmatprep.subr.bf16.mxu1 %v5969_v33 }
 0xa37   :  { %v5489_v8 = vpop.f32.mrb[8].mxu1 }
 0xa38   :  { %v1365_v9 = vadd.f32 %v5489_v8, %v5021_v7  ;;  %v1359_v10 = vpop.f32.mrb[9].mxu1 }
 0xa39   :  { %v1360_v12 = vadd.f32 %v5021_v7, %v1359_v10  ;;  %v1996_v10 = vld [vmem:[#allocation11 + $0x10] sm:$0xff] }
 0xa3a   :  { %v1369_v14 = vmax.f32 %v1365_v9, 0.0  ;;  %v1920_v9 = vld [vmem:[%s7338_s4] sm:$0xff] }
 0xa3b   :  { %v1368_v13 = vmax.f32 %v1360_v12, 0.0  ;;  %v1997_v12 = vld [vmem:[#allocation11 + $0x18] sm:$0xff] }
 0xa3d   :  { %5498 = vmatprep.mubr.msk.f32.mxu0 %vm584_vm2, %v1368_v13  ;;  %v2079_v13 = vld [vmem:[#allocation14] sm:$0xff] }
 0xa3e   :  { %5499 = vmatmul.mubr.msk.f32.vlgmr.msra.gmra.mrb[10].mxu0 %vm584_vm2, %v1369_v14  ;;  %v2080_v14 = vld [vmem:[#allocation14 + $0x8] sm:$0xff] }
 0xa3f   :  { %5964 = vmatpush3.bf16.msra.mxu0 %v5961_v20  ;;  %v5992_v15 = vpack.c.bf16 %v2080_v14, %v2079_v13  ;;  %v2081_v20 = vld [vmem:[#allocation14 + $0x10] sm:$0xff] }
 0xa40   :  { %5966 = vmatprep.subr.bf16.mxu0 %v5965_v30 }
 0xa43   :  { %5968 = vmatpush3.bf16.msra.mxu0 %v5965_v30  ;;  %v2260_v30 = vld [vmem:[#allocation11 + $0x30] sm:$0xff] }
 0xa44   :  { %5978 = vmatprep.subr.bf16.mxu0 %v5977_v47 }
 0xb11   :  { %v5500_v22 = vpop.f32.mrb[10].mxu0 }
 0xb12   :  { %v1461_v23 = vadd.f32 %v5500_v22, %v5028_v21  ;;  %v1455_v24 = vpop.f32.mrb[11].mxu0 }
 0xb13   :  { %v1456_v25 = vadd.f32 %v5028_v21, %v1455_v24  ;;  %v2082_v21 = vld [vmem:[#allocation14 + $0x18] sm:$0xff] }
 0xb14   :  { %v1465_v27 = vmax.f32 %v1461_v23, 0.0  ;;  %v5995_v22 = vpack.c.bf16 %v2082_v21, %v2081_v20  ;;  %v5057_v23 = vld [vmem:[#allocation13] ss:$0 sm:$0xff]  ;;  %v2540_v20 = vld [vmem:[#allocation23 + $0x38] sm:$0xff] }
 0xb15   :  { %v1464_v26 = vmax.f32 %v1456_v25, 0.0 }
 0xb17   :  { %5509 = vmatprep.mubr.msk.f32.mxu1 %vm584_vm2, %v1464_v26 }
 0xb18   :  { %5510 = vmatmul.mubr.msk.f32.vlgmr.msra.gmra.mrb[10].mxu1 %vm584_vm2, %v1465_v27 }
 0xb19   :  { %5972 = vmatpush3.bf16.msra.mxu1 %v5969_v33  ;;  %v6001_v33 = vpack.c.bf16 %v2261_v32, %v2260_v30  ;;  %v2626_v30 = vld [vmem:[#allocation23 + $0x50] sm:$0xff] }
 0xb1a   :  { %5974 = vmatprep.subr.bf16.mxu1 %v5973_v43 }
 0xb1d   :  { %5976 = vmatpush3.bf16.msra.mxu1 %v5973_v43 }
 0xb1e   :  { %5545 = vmatprep.subr.mxu1 %v6752_v44 }
 0xbeb   :  { %v5511_v35 = vpop.f32.mrb[10].mxu1 }
 0xbec   :  { %v1557_v36 = vadd.f32 %v5511_v35, %v5035_v34  ;;  %v1551_v37 = vpop.f32.mrb[11].mxu1 }
 0xbed   :  { %v1552_v38 = vadd.f32 %v5035_v34, %v1551_v37  ;;  %v5059_v34 = vld [vmem:[#allocation16] ss:$0 sm:$0xff] }
 0xbee   :  { %v1561_v40 = vmax.f32 %v1557_v36, 0.0 }
 0xbef   :  { %v1560_v39 = vmax.f32 %v1552_v38, 0.0  ;;  %v5061_v38 = vld [vmem:[#allocation17] ss:$0 sm:$0xff] }
 0xbf1   :  { %5520 = vmatprep.mubr.msk.f32.mxu0 %vm584_vm2, %v1560_v39 }
 0xbf2   :  { %5521 = vmatmul.mubr.msk.f32.vlgmr.msra.gmra.mrb[12].mxu0 %vm584_vm2, %v1561_v40  ;;  %v5062_v40 = vld [vmem:[#allocation19] ss:$0 sm:$0xff] }
 0xbf3   :  { %5980 = vmatpush3.bf16.msra.mxu0 %v5977_v47  ;;  %v2345_v47 = vld [vmem:[#allocation14 + $0x20] sm:$0xff] }
 0xbf4   :  { %5982 = vmatprep.subr.bf16.mxu0 %v5981_v58 }
 0xbf7   :  { %5984 = vmatpush3.bf16.msra.mxu0 %v5981_v58 }
 0xbf8   :  { %5550 = vmatprep.subr.mxu0 %v6752_v44 }
 0xcc5   :  { %v5522_v49 = vpop.f32.mrb[12].mxu0 }
 0xcc6   :  { %v1653_v50 = vadd.f32 %v5522_v49, %v5042_v48  ;;  %v1647_v51 = vpop.f32.mrb[13].mxu0 }
 0xcc7   :  { %v1648_v52 = vadd.f32 %v5042_v48, %v1647_v51  ;;  %v2346_v48 = vld [vmem:[#allocation14 + $0x28] sm:$0xff] }
 0xcc8   :  { %v1657_v54 = vmax.f32 %v1653_v50, 0.0  ;;  %v6004_v49 = vpack.c.bf16 %v2346_v48, %v2345_v47  ;;  %v5075_v48 = vld [vmem:[#allocation25 + $0x2] ss:$0 sm:$0xff] }
 0xcc9   :  { %v1656_v53 = vmax.f32 %v1648_v52, 0.0  ;;  %v2347_v52 = vld [vmem:[#allocation14 + $0x30] sm:$0xff] }
 0xccb   :  { %5531 = vmatprep.mubr.msk.f32.mxu1 %vm584_vm2, %v1656_v53  ;;  %v2348_v53 = vld [vmem:[#allocation14 + $0x38] sm:$0xff] }
 0xccc   :  { %5532 = vmatmul.mubr.msk.f32.vlgmr.msra.gmra.mrb[12].mxu1 %vm584_vm2, %v1657_v54  ;;  %v6007_v54 = vpack.c.bf16 %v2348_v53, %v2347_v52  ;;  %v2800_v53 = vld [vmem:[#allocation23 + $0x90] sm:$0xff] }
 0xccd   :  { %5546 = vmatpush3.msra.mxu1 %v7059_v1  ;;  %5547 = vmatprep.mubr.msk.f32.mxu1 %vm6753_vm3, %v6752_v44  ;;  %v6754_v1 = vmov 0.0|0.0  }
 0xcce   :  { %5985 = vmatprep.subr.bf16.mxu1 %v6754_v1 }
 0xcd0   :  { %5548 = vmatmul.mubr.msk.f32.vlgmr.msra.gmra.mrb[14].mxu1 %vm407_vm0, %v1846_v55  ;;  %v5065_v55 = vld [vmem:[#allocation13 + $0x1] ss:$0 sm:$0xff] }
 0xcd1   :  { %5563 = vmatprep.mubr.msk.f32.mxu1 %vm6753_vm3, %v6752_v44  ;;  %5987 = vmatpush3.bf16.msra.mxu1 %v5986_v61  ;;  %v2452_v61 = vld [vmem:[#allocation23 + $0x8] sm:$0xff] }
 0xcd2   :  { %5988 = vmatprep.subr.bf16.mxu1 %v6754_v1 }
 0xd9f   :  { %v5533_v63 = vpop.f32.mrb[12].mxu1 }
 0xda0   :  { %v1749_v0 = vadd.f32 %v5533_v63, %v5049_v62  ;;  %v1743_v2 = vpop.f32.mrb[13].mxu1  ;;  %v2453_v63 = vld [vmem:[#allocation23 + $0x10] sm:$0xff] }
 0xda1   :  { %v1744_v3 = vadd.f32 %v5049_v62, %v1743_v2  ;;  %v6010_v62 = vpack.c.bf16 %v2452_v61, %v2451_v60 }
 0xda2   :  { %v1753_v6 = vmax.f32 %v1749_v0, 0.0  ;;  %v2454_v0 = vld [vmem:[#allocation23 + $0x18] sm:$0xff] }
 0xda3   :  { %v1752_v4 = vmax.f32 %v1744_v3, 0.0  ;;  %v1916_v5 = vpop.f32.mrb[14].mxu1  ;;  %v6013_v2 = vpack.c.bf16 %v2454_v0, %v2453_v63  ;;  %v2537_v3 = vld [vmem:[#allocation23 + $0x20] sm:$0xff]  ;;  %v2887_v0 = vld [vmem:[#allocation23 + $0xb0] sm:$0xff] }
 0xda4   :  { %v1917_v7 = vadd.f32 %v7074_v11, %v1916_v5  ;;  %v5549_v8 = vpop.f32.mrb[15].mxu1  ;;  %v5989_v11 = vpack.c.bf16 %v1997_v12, %v1996_v10  ;;  %v5069_v10 = vld [vmem:[#allocation17 + $0x1] ss:$0 sm:$0xff] }
 0xda5   :  { %5542 = vmatprep.mubr.msk.f32.mxu0 %vm584_vm2, %v1752_v4  ;;  %v2538_v4 = vld [vmem:[#allocation23 + $0x28] sm:$0xff] }
 0xda6   :  { %5543 = vmatmul.mubr.msk.f32.vlgmr.msra.gmra.mrb[14].mxu0 %vm584_vm2, %v1753_v6  ;;  %5990 = vmatpush3.bf16.msra.mxu1 %v5989_v11  ;;  %v6016_v5 = vpack.c.bf16 %v2538_v4, %v2537_v3  ;;  %v5067_v6 = vld [vmem:[#allocation16 + $0x1] ss:$0 sm:$0xff]  ;;  %v5070_v11 = vld [vmem:[#allocation19 + $0x1] ss:$0 sm:$0xff]  ;;  %v2972_v4 = vld [vmem:[#allocation23 + $0xc0] sm:$0xff] }
 0xda7   :  { %5551 = vmatpush3.msra.mxu0 %v1917_v7  ;;  %5552 = vmatprep.mubr.msk.f32.mxu0 %vm6753_vm3, %v6752_v44 }
 0xda8   :  { %5991 = vmatprep.subr.bf16.mxu0 %v6754_v1  ;;  %5577 = vmatprep.subr.mxu1 %v6752_v44 }
 0xdaa   :  { %5553 = vmatmul.mubr.msk.f32.vlgmr.msra.gmra.mrb[16].mxu0 %vm407_vm0, %v1920_v9 }
 0xdab   :  { %5574 = vmatprep.mubr.msk.f32.mxu0 %vm6753_vm3, %v6752_v44  ;;  %5993 = vmatpush3.bf16.msra.mxu0 %v5992_v15 }
 0xdac   :  { %5994 = vmatprep.subr.bf16.mxu0 %v6754_v1 }
 0xdaf   :  { %5996 = vmatpush3.bf16.msra.mxu0 %v5995_v22  ;;  %v2624_v22 = vld [vmem:[#allocation23 + $0x40] sm:$0xff] }
 0xdb0   :  { %5997 = vmatprep.subr.bf16.mxu0 %v6754_v1 }
 0xe79   :  { %v7173_v16 = vpop.f32.mrb[14].mxu0 }
 0xe7a   :  { %v7175_v17 = vpop.f32.mrb[15].mxu0 }
 0xe7d   :  { %v1990_v18 = vpop.f32.mrb[16].mxu0 }
 0xe7e   :  { %v5554_v19 = vpop.f32.mrb[17].mxu0  ;;  %5564 = vmatmul.mubr.msk.f32.vlgmr.msra.gmra.mrb[16].mxu1 %vm584_vm2, %v1990_v18 }
 0xe7f   :  { %5579 = vmatprep.mubr.msk.f32.mxu1 %vm6753_vm3, %v6752_v44  ;;  %v2539_v19 = vld [vmem:[#allocation23 + $0x30] sm:$0xff] }
 0xe80   :  { %v6019_v21 = vpack.c.bf16 %v2540_v20, %v2539_v19  ;;  %v5081_v20 = vld [vmem:[#allocation25 + $0x5] ss:$0 sm:$0xff] }
 0xf51   :  { %v2074_v24 = vpop.f32.mrb[16].mxu1 }
 0xf52   :  { %v2075_v25 = vadd.f32 %v5057_v23, %v2074_v24  ;;  %v5565_v26 = vpop.f32.mrb[17].mxu1  ;;  %v2625_v23 = vld [vmem:[#allocation23 + $0x48] sm:$0xff] }
 0xf53   :  { %v6022_v24 = vpack.c.bf16 %v2625_v23, %v2624_v22 }
 0xf54   :  { %v2078_v27 = vmax.f32 %v2075_v25, 0.0  ;;  %v5071_v25 = vld [vmem:[#allocation25] ss:$0 sm:$0xff] }
 0xf56   :  { %5575 = vmatmul.mubr.msk.f32.vlgmr.msra.gmra.mrb[18].mxu0 %vm584_vm2, %v2078_v27 }
 0xf57   :  { %5590 = vmatprep.mubr.msk.f32.mxu0 %vm6753_vm3, %v6752_v44  ;;  %5999 = vmatpush3.bf16.msra.mxu0 %v5998_v31  ;;  %v2627_v31 = vld [vmem:[#allocation23 + $0x58] sm:$0xff] }
 0xf58   :  { %6000 = vmatprep.subr.bf16.mxu0 %v6754_v1  ;;  %v6025_v32 = vpack.c.bf16 %v2627_v31, %v2626_v30 }
 0xf5b   :  { %6002 = vmatpush3.bf16.msra.mxu0 %v6001_v33  ;;  %v2711_v33 = vld [vmem:[#allocation23 + $0x60] sm:$0xff] }
 0xf5c   :  { %6009 = vmatprep.subr.bf16.mxu0 %v6754_v1 }
0x1029   :  { %v2159_v35 = vpop.f32.mrb[18].mxu0 }
0x102a   :  { %v2160_v36 = vadd.f32 %v5059_v34, %v2159_v35  ;;  %v5576_v37 = vpop.f32.mrb[19].mxu0  ;;  %v2712_v34 = vld [vmem:[#allocation23 + $0x68] sm:$0xff] }
0x102b   :  { %v6028_v35 = vpack.c.bf16 %v2712_v34, %v2711_v33 }
0x102c   :  { %v2163_v39 = vmax.f32 %v2160_v36, 0.0  ;;  %v5073_v36 = vld [vmem:[#allocation25 + $0x1] ss:$0 sm:$0xff] }
0x102e   :  { %v2171_v41 = vmul.f32 %v5061_v38, %v2163_v39 }
0x1030   :  { %v2179_v42 = vadd.f32 %v5062_v40, %v2171_v41  ;;  %v2713_v41 = vld [vmem:[#allocation23 + $0x70] sm:$0xff] }
0x1032   :  { %v2180_v43 = vmax.f32 %v2179_v42, 0.0  ;;  %v2714_v42 = vld [vmem:[#allocation23 + $0x78] sm:$0xff] }
0x1034   :  { %v2181_v45 = vadd.f32 %v2180_v43, %v1917_v7  ;;  %v6031_v43 = vpack.c.bf16 %v2714_v42, %v2713_v41  ;;  %v3217_v41 = vld [vmem:[%s7341_s16 + $0x8] sm:$0xff] }
0x1036   :  { %5578 = vmatpush3.msra.mxu1 %v2181_v45 }
0x1037   :  { %5580 = vmatmul.mubr.msk.f32.vlgmr.msra.gmra.mrb[18].mxu1 %vm407_vm0, %v5063_v46  ;;  %6003 = vmatprep.subr.bf16.mxu1 %v6754_v1  ;;  %v2799_v46 = vld [vmem:[#allocation23 + $0x88] sm:$0xff] }
0x1038   :  { %5601 = vmatprep.mubr.msk.f32.mxu1 %vm6753_vm3, %v6752_v44  ;;  %6005 = vmatpush3.bf16.msra.mxu1 %v6004_v49 }
0x1039   :  { %6006 = vmatprep.subr.bf16.mxu1 %v6754_v1 }
0x103c   :  { %6008 = vmatpush3.bf16.msra.mxu1 %v6007_v54  ;;  %v2801_v54 = vld [vmem:[#allocation23 + $0x98] sm:$0xff] }
0x103d   :  { %6015 = vmatprep.subr.bf16.mxu1 %v6754_v1 }
0x110a   :  { %v2253_v50 = vpop.f32.mrb[18].mxu1 }
0x110b   :  { %v5581_v51 = vpop.f32.mrb[19].mxu1  ;;  %5591 = vmatmul.mubr.msk.f32.vlgmr.msra.gmra.mrb[20].mxu0 %vm584_vm2, %v2253_v50 }
0x110c   :  { %5612 = vmatprep.mubr.msk.f32.mxu0 %vm6753_vm3, %v6752_v44  ;;  %6011 = vmatpush3.bf16.msra.mxu0 %v6010_v62 }
0x110d   :  { %6012 = vmatprep.subr.bf16.mxu0 %v6754_v1 }
0x1110   :  { %6014 = vmatpush3.bf16.msra.mxu0 %v6013_v2  ;;  %v2888_v2 = vld [vmem:[#allocation23 + $0xb8] sm:$0xff] }
0x1111   :  { %6021 = vmatprep.subr.bf16.mxu0 %v6754_v1  ;;  %v6043_v3 = vpack.c.bf16 %v2888_v2, %v2887_v0 }
0x11de   :  { %v2339_v56 = vpop.f32.mrb[20].mxu0 }
0x11df   :  { %v2340_v57 = vadd.f32 %v5065_v55, %v2339_v56  ;;  %v5592_v58 = vpop.f32.mrb[21].mxu0  ;;  %v6037_v55 = vpack.c.bf16 %v2801_v54, %v2800_v53  ;;  %v2885_v56 = vld [vmem:[#allocation23 + $0xa0] sm:$0xff] }
0x11e1   :  { %v2343_v59 = vmax.f32 %v2340_v57, 0.0  ;;  %v2886_v57 = vld [vmem:[#allocation23 + $0xa8] sm:$0xff] }
0x11e2   :  { %v6040_v58 = vpack.c.bf16 %v2886_v57, %v2885_v56  ;;  %v3479_v56 = vld [vmem:[#allocation29 + $0x18] sm:$0xff] }
0x11e3   :  { %5602 = vmatmul.mubr.msk.f32.vlgmr.msra.gmra.mrb[20].mxu1 %vm584_vm2, %v2343_v59  ;;  %v5077_v59 = vld [vmem:[#allocation25 + $0x3] ss:$0 sm:$0xff] }
0x11e4   :  { %5623 = vmatprep.mubr.msk.f32.mxu1 %vm6753_vm3, %v6752_v44  ;;  %6017 = vmatpush3.bf16.msra.mxu1 %v6016_v5  ;;  %v2973_v5 = vld [vmem:[#allocation23 + $0xc8] sm:$0xff] }
0x11e5   :  { %6018 = vmatprep.subr.bf16.mxu1 %v6754_v1 }
0x11e8   :  { %6020 = vmatpush3.bf16.msra.mxu1 %v6019_v21 }
0x11e9   :  { %6027 = vmatprep.subr.bf16.mxu1 %v6754_v1 }
0x12b6   :  { %v2426_v7 = vpop.f32.mrb[20].mxu1 }
0x12b7   :  { %v2427_v8 = vadd.f32 %v5067_v6, %v2426_v7  ;;  %v5603_v9 = vpop.f32.mrb[21].mxu1  ;;  %v6046_v6 = vpack.c.bf16 %v2973_v5, %v2972_v4  ;;  %v5079_v7 = vld [vmem:[#allocation25 + $0x4] ss:$0 sm:$0xff] }
0x12b8   :  { %v3574_v4 = vld [vmem:[#allocation29 + $0x38] sm:$0xff] }
0x12b9   :  { %v2430_v12 = vmax.f32 %v2427_v8, 0.0 }
0x12bb   :  { %v2439_v13 = vmul.f32 %v5069_v10, %v2430_v12 }
0x12bd   :  { %v2448_v14 = vadd.f32 %v5070_v11, %v2439_v13  ;;  %v2974_v11 = vld [vmem:[#allocation23 + $0xd0] sm:$0xff]  ;;  %v2975_v13 = vld [vmem:[#allocation23 + $0xd8] sm:$0xff] }
0x12bf   :  { %v2449_v15 = vmax.f32 %v2448_v14, 0.0  ;;  %v6049_v14 = vpack.c.bf16 %v2975_v13, %v2974_v11 }
0x12c1   :  { %v2450_v18 = vadd.f32 %v2449_v15, %v2181_v45  ;;  %v2798_v45 = vld [vmem:[#allocation23 + $0x80] sm:$0xff] }
0x12c2   :  { %v6034_v47 = vpack.c.bf16 %v2799_v46, %v2798_v45  ;;  %v3058_v15 = vld [vmem:[%s7339_s10] sm:$0xff]  ;;  %v3300_v45 = vld [vmem:[%s7343_s15 + $0x8] sm:$0xff] }
0x12c3   :  { %5613 = vmatmul.mubr.msk.f32.vlgmr.msra.gmra.mrb[22].mxu0 %vm584_vm2, %v2450_v18  ;;  %v3059_v18 = vld [vmem:[%s7339_s10 + $0x8] sm:$0xff] }
0x12c4   :  { %5634 = vmatprep.mubr.msk.f32.mxu0 %vm6753_vm3, %v6752_v44  ;;  %6023 = vmatpush3.bf16.msra.mxu0 %v6022_v24  ;;  %v6052_v19 = vpack.c.bf16 %v3059_v18, %v3058_v15  ;;  %v3669_v18 = vld [vmem:[#allocation29 + $0x50] sm:$0xff] }
0x12c5   :  { %6024 = vmatprep.subr.bf16.mxu0 %v6754_v1 }
0x12c8   :  { %6026 = vmatpush3.bf16.msra.mxu0 %v6025_v32  ;;  %v5085_v32 = vld [vmem:[#allocation26] ss:$0 sm:$0xff] }
0x12c9   :  { %6033 = vmatprep.subr.bf16.mxu0 %v6754_v1 }
0x1396   :  { %v2531_v26 = vpop.f32.mrb[22].mxu0 }
0x1397   :  { %v2532_v27 = vadd.f32 %v5071_v25, %v2531_v26  ;;  %v5614_v28 = vpop.f32.mrb[23].mxu0  ;;  %v3060_v25 = vld [vmem:[%s7339_s10 + $0x10] sm:$0xff]  ;;  %v3061_v26 = vld [vmem:[%s7339_s10 + $0x18] sm:$0xff] }
0x1398   :  { %v5083_v28 = vld [vmem:[#allocation25 + $0x6] ss:$0 sm:$0xff] }
0x1399   :  { %v2535_v29 = vmax.f32 %v2532_v27, 0.0  ;;  %v6055_v27 = vpack.c.bf16 %v3061_v26, %v3060_v25 }
0x139b   :  { %5624 = vmatmul.mubr.msk.f32.vlgmr.msra.gmra.mrb[22].mxu1 %vm584_vm2, %v2535_v29 }
0x139c   :  { %5645 = vmatprep.mubr.msk.f32.mxu1 %vm6753_vm3, %v6752_v44  ;;  %6029 = vmatpush3.bf16.msra.mxu1 %v6028_v35 }
0x139d   :  { %6030 = vmatprep.subr.bf16.mxu1 %v6754_v1 }
0x13a0   :  { %6032 = vmatpush3.bf16.msra.mxu1 %v6031_v43  ;;  %v3299_v43 = vld [vmem:[%s7343_s15] sm:$0xff] }
0x13a1   :  { %6039 = vmatprep.subr.bf16.mxu1 %v6754_v1  ;;  %v6061_v46 = vpack.c.bf16 %v3300_v45, %v3299_v43  ;;  %v3862_v43 = vld [vmem:[#allocation29 + $0x98] sm:$0xff] }
0x146e   :  { %v2618_v37 = vpop.f32.mrb[22].mxu1 }
0x146f   :  { %v2619_v38 = vadd.f32 %v5073_v36, %v2618_v37  ;;  %v5625_v39 = vpop.f32.mrb[23].mxu1  ;;  %v3216_v36 = vld [vmem:[%s7341_s16] sm:$0xff] }
0x1470   :  { %v3301_v37 = vld [vmem:[%s7342_s14] sm:$0xff] }
0x1471   :  { %v2622_v40 = vmax.f32 %v2619_v38, 0.0  ;;  %v3302_v38 = vld [vmem:[%s7342_s14 + $0x8] sm:$0xff] }
0x1472   :  { %v6057_v39 = vpack.c.bf16 %v3302_v38, %v3301_v37 }
0x1473   :  { %5635 = vmatmul.mubr.msk.f32.vlgmr.msra.gmra.mrb[24].mxu0 %vm584_vm2, %v2622_v40 }
0x1474   :  { %5656 = vmatprep.mubr.msk.f32.mxu0 %vm6753_vm3, %v6752_v44  ;;  %6035 = vmatpush3.bf16.msra.mxu0 %v6034_v47  ;;  %v3476_v47 = vld [vmem:[#allocation29] sm:$0xff] }
0x1475   :  { %6036 = vmatprep.subr.bf16.mxu0 %v6754_v1 }
0x1478   :  { %6038 = vmatpush3.bf16.msra.mxu0 %v6037_v55  ;;  %v3478_v55 = vld [vmem:[#allocation29 + $0x10] sm:$0xff] }
0x1479   :  { %6045 = vmatprep.subr.bf16.mxu0 %v6754_v1  ;;  %v6069_v57 = vpack.c.bf16 %v3479_v56, %v3478_v55  ;;  %v3957_v56 = vld [vmem:[#allocation29 + $0xb0] sm:$0xff] }
0x1546   :  { %v2705_v49 = vpop.f32.mrb[24].mxu0 }
0x1547   :  { %v2706_v50 = vadd.f32 %v5075_v48, %v2705_v49  ;;  %v5636_v51 = vpop.f32.mrb[25].mxu0  ;;  %v3477_v48 = vld [vmem:[#allocation29 + $0x8] sm:$0xff] }
0x1548   :  { %v6065_v49 = vpack.c.bf16 %v3477_v48, %v3476_v47  ;;  %v3956_v47 = vld [vmem:[#allocation29 + $0xa8] sm:$0xff] }
0x1549   :  { %v2709_v52 = vmax.f32 %v2706_v50, 0.0  ;;  %v5052_v50 = vld [vmem:[#allocation22] ss:$0 sm:$0xff] }
0x154a   :  { %v1838_v53 = vadd.f32 %v5052_v50, %v7175_v17  ;;  %v1843_v54 = vadd.f32 %v7173_v16, %v5052_v50  ;;  %v5094_v17 = vld [vmem:[#allocation28] ss:$0 sm:$0xff]  ;;  %v3573_v16 = vld [vmem:[#allocation29 + $0x30] sm:$0xff] }
0x154b   :  { %5646 = vmatmul.mubr.msk.f32.vlgmr.msra.gmra.mrb[24].mxu1 %vm584_vm2, %v2709_v52  ;;  %v6077_v5 = vpack.c.bf16 %v3574_v4, %v3573_v16  ;;  %v4053_v4 = vld [vmem:[#allocation29 + $0xd0] sm:$0xff] }
0x154c   :  { %5667 = vmatprep.mubr.msk.f32.mxu1 %vm6753_vm3, %v6752_v44  ;;  %6041 = vmatpush3.bf16.msra.mxu1 %v6040_v58  ;;  %v3571_v58 = vld [vmem:[#allocation29 + $0x20] sm:$0xff] }
0x154d   :  { %6042 = vmatprep.subr.bf16.mxu1 %v6754_v1 }
0x1550   :  { %6044 = vmatpush3.bf16.msra.mxu1 %v6043_v3 }
0x1551   :  { %6051 = vmatprep.subr.bf16.mxu1 %v6754_v1 }
0x161e   :  { %v2792_v60 = vpop.f32.mrb[24].mxu1 }
0x161f   :  { %v2793_v61 = vadd.f32 %v5077_v59, %v2792_v60  ;;  %v5647_v62 = vpop.f32.mrb[25].mxu1  ;;  %v3572_v59 = vld [vmem:[#allocation29 + $0x28] sm:$0xff] }
0x1620   :  { %v6073_v60 = vpack.c.bf16 %v3572_v59, %v3571_v58  ;;  %v4051_v59 = vld [vmem:[#allocation29 + $0xc0] sm:$0xff] }
0x1621   :  { %v2796_v63 = vmax.f32 %v2793_v61, 0.0 }
0x1623   :  { %5657 = vmatmul.mubr.msk.f32.vlgmr.msra.gmra.mrb[26].mxu0 %vm584_vm2, %v2796_v63 }
0x1624   :  { %5678 = vmatprep.mubr.msk.f32.mxu0 %vm6753_vm3, %v6752_v44  ;;  %6047 = vmatpush3.bf16.msra.mxu0 %v6046_v6  ;;  %v3667_v6 = vld [vmem:[#allocation29 + $0x40] sm:$0xff] }
0x1625   :  { %6048 = vmatprep.subr.bf16.mxu0 %v6754_v1 }
0x1628   :  { %6050 = vmatpush3.bf16.msra.mxu0 %v6049_v14 }
0x1629   :  { %5692 = vmatprep.subr.mxu0 %v6752_v44 }
0x16f6   :  { %v2879_v8 = vpop.f32.mrb[26].mxu0 }
0x16f7   :  { %v2880_v9 = vadd.f32 %v5079_v7, %v2879_v8  ;;  %v5658_v10 = vpop.f32.mrb[27].mxu0  ;;  %v3668_v7 = vld [vmem:[#allocation29 + $0x48] sm:$0xff] }
0x16f8   :  { %v6081_v8 = vpack.c.bf16 %v3668_v7, %v3667_v6  ;;  %v4147_v7 = vld [vmem:[#allocation29 + $0xe0] sm:$0xff] }
0x16f9   :  { %v2883_v12 = vmax.f32 %v2880_v9, 0.0  ;;  %v5095_v9 = vld [vmem:[#allocation31] ss:$0 sm:$0xff] }
0x16fb   :  { %5668 = vmatmul.mubr.msk.f32.vlgmr.msra.gmra.mrb[26].mxu1 %vm584_vm2, %v2883_v12 }
0x16fc   :  { %5689 = vmatprep.mubr.msk.f32.mxu1 %vm6753_vm3, %v6752_v44  ;;  %6053 = vmatpush3.bf16.msra.mxu1 %v6052_v19  ;;  %v3670_v19 = vld [vmem:[#allocation29 + $0x58] sm:$0xff] }
0x16fd   :  { %6054 = vmatprep.subr.bf16.mxu1 %v6754_v1 }
0x1700   :  { %6056 = vmatpush3.bf16.msra.mxu1 %v6055_v27 }
0x17ce   :  { %v2966_v21 = vpop.f32.mrb[26].mxu1 }
0x17cf   :  { %v2967_v22 = vadd.f32 %v5081_v20, %v2966_v21  ;;  %v5669_v23 = vpop.f32.mrb[27].mxu1  ;;  %v6085_v20 = vpack.c.bf16 %v3670_v19, %v3669_v18  ;;  %v3763_v21 = vld [vmem:[#allocation29 + $0x60] sm:$0xff]  ;;  %v4149_v19 = vld [vmem:[#allocation29 + $0xf0] sm:$0xff] }
0x17d1   :  { %v2970_v24 = vmax.f32 %v2967_v22, 0.0  ;;  %v3764_v22 = vld [vmem:[#allocation29 + $0x68] sm:$0xff] }
0x17d2   :  { %v6089_v23 = vpack.c.bf16 %v3764_v22, %v3763_v21  ;;  %v4243_v22 = vld [vmem:[#allocation29 + $0x100] sm:$0xff] }
0x17d3   :  { %5679 = vmatmul.mubr.msk.f32.vlgmr.msra.gmra.mrb[28].mxu0 %vm584_vm2, %v2970_v24  ;;  %v5098_v24 = vld [vmem:[#allocation31 + $0x1] ss:$0 sm:$0xff] }
0x17d4   :  { %5694 = vmatprep.mubr.msk.f32.mxu0 %vm6753_vm3, %v6752_v44  ;;  %v3142_v44 = vld [vmem:[%s7340_s11] sm:$0xff] }
0x18a6   :  { %v3053_v1 = vpop.f32.mrb[28].mxu0 }
0x18a7   :  { %v3054_v29 = vadd.f32 %v5083_v28, %v3053_v1  ;;  %v5680_v30 = vpop.f32.mrb[29].mxu0 }
0x18a8   :  { %v3765_v30 = vld [vmem:[#allocation29 + $0x70] sm:$0xff] }
0x18a9   :  { %v3057_v31 = vmax.f32 %v3054_v29, 0.0 }
0x18ab   :  { %5690 = vmatmul.mubr.msk.f32.vlgmr.msra.gmra.mrb[28].mxu1 %vm584_vm2, %v3057_v31  ;;  %v3766_v31 = vld [vmem:[#allocation29 + $0x78] sm:$0xff] }
0x18ac   :  { %5699 = vmatprep.mubr.msk.f32.mxu1 %vm407_vm0, %v3216_v36 }
0x197e   :  { %v3138_v33 = vpop.f32.mrb[28].mxu1 }
0x197f   :  { %v3139_v34 = vadd.f32 %v5085_v32, %v3138_v33  ;;  %v5691_v35 = vpop.f32.mrb[29].mxu1  ;;  %v6093_v32 = vpack.c.bf16 %v3766_v31, %v3765_v30  ;;  %v3859_v33 = vld [vmem:[#allocation29 + $0x80] sm:$0xff]  ;;  %v4245_v31 = vld [vmem:[#allocation29 + $0x110] sm:$0xff] }
0x1981   :  { %5693 = vmatpush3.msra.mxu0 %v3139_v34  ;;  %v3860_v34 = vld [vmem:[#allocation29 + $0x88] sm:$0xff] }
0x1982   :  { %5695 = vmatmul.mubr.msk.f32.vlgmr.msra.gmra.mrb[30].mxu0 %vm407_vm0, %v3142_v44  ;;  %6058 = vmatprep.subr.bf16.mxu0 %v6057_v39  ;;  %v6097_v35 = vpack.c.bf16 %v3860_v34, %v3859_v33  ;;  %v5101_v44 = vld [vmem:[#allocation31 + $0x2] ss:$0 sm:$0xff] }
0x1983   :  { %6060 = vmatpush3.bf16.msra.mxu0 %v6057_v39  ;;  %v4339_v34 = vld [vmem:[#allocation29 + $0x120] sm:$0xff] }
0x1984   :  { %6062 = vmatprep.subr.bf16.mxu0 %v6061_v46 }
0x1a55   :  { %v3212_v40 = vpop.f32.mrb[30].mxu0 }
0x1a56   :  { %v5696_v42 = vpop.f32.mrb[31].mxu0  ;;  %5697 = vmatprep.subr.mxu1 %v3212_v40 }
0x1a57   :  { %5698 = vmatpush3.msra.mxu1 %v3212_v40  ;;  %v3861_v42 = vld [vmem:[#allocation29 + $0x90] sm:$0xff] }
0x1a58   :  { %5700 = vmatmul.mubr.msk.f32.vlgmr.msra.gmra.mrb[30].mxu1 %vm407_vm0, %v3217_v41  ;;  %6066 = vmatprep.subr.bf16.mxu1 %v6065_v49  ;;  %v6101_v45 = vpack.c.bf16 %v3862_v43, %v3861_v42  ;;  %v4341_v43 = vld [vmem:[#allocation29 + $0x130] sm:$0xff] }
0x1a59   :  { %6068 = vmatpush3.bf16.msra.mxu1 %v6065_v49  ;;  %v5104_v49 = vld [vmem:[#allocation31 + $0x3] ss:$0 sm:$0xff] }
0x1a5a   :  { %6070 = vmatprep.subr.bf16.mxu1 %v6069_v57 }
0x1a5d   :  { %6072 = vmatpush3.bf16.msra.mxu1 %v6069_v57  ;;  %v3958_v57 = vld [vmem:[#allocation29 + $0xb8] sm:$0xff] }
0x1a5e   :  { %6082 = vmatprep.subr.bf16.mxu1 %v6081_v8  ;;  %v6109_v58 = vpack.c.bf16 %v3958_v57, %v3957_v56  ;;  %v4437_v57 = vld [vmem:[#allocation29 + $0x150] sm:$0xff] }
0x1b2b   :  { %v5701_v51 = vpop.f32.mrb[30].mxu1 }
0x1b2c   :  { %v3290_v52 = vpop.f32.mrb[31].mxu1 }
0x1b2d   :  { %5706 = vmatprep.mubr.msk.f32.mxu0 %vm491_vm1, %v3290_v52 }
0x1b2e   :  { %5707 = vmatmul.mubr.msk.f32.vlgmr.msra.gmra.mrb[32].mxu0 %vm491_vm1, %v5701_v51 }
0x1b2f   :  { %5713 = vmatprep.mubr.msk.f32.mxu0 %vm491_vm1, %v1838_v53  ;;  %6064 = vmatpush3.bf16.msra.mxu0 %v6061_v46  ;;  %v3955_v46 = vld [vmem:[#allocation29 + $0xa0] sm:$0xff] }
0x1b30   :  { %6074 = vmatprep.subr.bf16.mxu0 %v6073_v60  ;;  %v6105_v48 = vpack.c.bf16 %v3956_v47, %v3955_v46  ;;  %v4435_v47 = vld [vmem:[#allocation29 + $0x140] sm:$0xff] }
0x1b36   :  { %5714 = vmatmul.mubr.msk.f32.vlgmr.msra.gmra.mrb[32].mxu0 %vm491_vm1, %v1843_v54 }
0x1b37   :  { %6076 = vmatpush3.bf16.msra.mxu0 %v6073_v60  ;;  %v4052_v60 = vld [vmem:[#allocation29 + $0xc8] sm:$0xff] }
0x1b38   :  { %6078 = vmatprep.subr.bf16.mxu0 %v6077_v5 }
0x1b3b   :  { %6080 = vmatpush3.bf16.msra.mxu0 %v6077_v5  ;;  %v4054_v5 = vld [vmem:[#allocation29 + $0xd8] sm:$0xff] }
0x1b3c   :  { %6090 = vmatprep.subr.bf16.mxu0 %v6089_v23  ;;  %v6117_v6 = vpack.c.bf16 %v4054_v5, %v4053_v4  ;;  %v4533_v5 = vld [vmem:[#allocation29 + $0x170] sm:$0xff] }
0x1c09   :  { %v5715_v61 = vpop.f32.mrb[32].mxu0 }
0x1c0a   :  { %v3473_v62 = vadd.f32 %v5715_v61, %v5094_v17  ;;  %v3456_v63 = vpop.f32.mrb[33].mxu0  ;;  %v5107_v61 = vld [vmem:[#allocation31 + $0x4] ss:$0 sm:$0xff] }
0x1c0b   :  { %v3472_v0 = vadd.f32 %v5094_v17, %v3456_v63  ;;  %v6113_v17 = vpack.c.bf16 %v4052_v60, %v4051_v59  ;;  %v4531_v60 = vld [vmem:[#allocation29 + $0x160] sm:$0xff] }
0x1c0c   :  { %v3475_v3 = vmax.f32 %v3473_v62, 0.0 }
0x1c0d   :  { %v3474_v2 = vmax.f32 %v3472_v0, 0.0 }
0x1c0f   :  { %5724 = vmatprep.mubr.msk.f32.mxu1 %vm584_vm2, %v3474_v2 }
0x1c10   :  { %5725 = vmatmul.mubr.msk.f32.vlgmr.msra.gmra.mrb[32].mxu1 %vm584_vm2, %v3475_v3 }
0x1c11   :  { %6084 = vmatpush3.bf16.msra.mxu1 %v6081_v8  ;;  %v4148_v8 = vld [vmem:[#allocation29 + $0xe8] sm:$0xff] }
0x1c12   :  { %6086 = vmatprep.subr.bf16.mxu1 %v6085_v20 }
0x1c15   :  { %6088 = vmatpush3.bf16.msra.mxu1 %v6085_v20  ;;  %v4150_v20 = vld [vmem:[#allocation29 + $0xf8] sm:$0xff] }
0x1c16   :  { %6098 = vmatprep.subr.bf16.mxu1 %v6097_v35  ;;  %v6125_v21 = vpack.c.bf16 %v4150_v20, %v4149_v19  ;;  %v4629_v20 = vld [vmem:[#allocation29 + $0x190] sm:$0xff] }
0x1ce3   :  { %v5726_v10 = vpop.f32.mrb[32].mxu1 }
0x1ce4   :  { %v3565_v12 = vadd.f32 %v5726_v10, %v5095_v9  ;;  %v3559_v11 = vpop.f32.mrb[33].mxu1  ;;  %v5110_v10 = vld [vmem:[#allocation31 + $0x5] ss:$0 sm:$0xff] }
0x1ce5   :  { %v3560_v13 = vadd.f32 %v5095_v9, %v3559_v11  ;;  %v6121_v9 = vpack.c.bf16 %v4148_v8, %v4147_v7  ;;  %v4627_v8 = vld [vmem:[#allocation29 + $0x180] sm:$0xff] }
0x1ce6   :  { %v3569_v15 = vmax.f32 %v3565_v12, 0.0 }
0x1ce7   :  { %v3568_v14 = vmax.f32 %v3560_v13, 0.0 }
0x1ce9   :  { %5735 = vmatprep.mubr.msk.f32.mxu0 %vm584_vm2, %v3568_v14 }
0x1cea   :  { %5736 = vmatmul.mubr.msk.f32.vlgmr.msra.gmra.mrb[34].mxu0 %vm584_vm2, %v3569_v15 }
0x1ceb   :  { %6092 = vmatpush3.bf16.msra.mxu0 %v6089_v23  ;;  %v4244_v23 = vld [vmem:[#allocation29 + $0x108] sm:$0xff] }
0x1cec   :  { %6094 = vmatprep.subr.bf16.mxu0 %v6093_v32 }
0x1cef   :  { %6096 = vmatpush3.bf16.msra.mxu0 %v6093_v32  ;;  %v4246_v32 = vld [vmem:[#allocation29 + $0x118] sm:$0xff] }
0x1cf0   :  { %6106 = vmatprep.subr.bf16.mxu0 %v6105_v48  ;;  %v6133_v33 = vpack.c.bf16 %v4246_v32, %v4245_v31  ;;  %v4725_v32 = vld [vmem:[#allocation29 + $0x1b0] sm:$0xff] }
0x1dbd   :  { %v5737_v25 = vpop.f32.mrb[34].mxu0 }
0x1dbe   :  { %v3661_v26 = vadd.f32 %v5737_v25, %v5098_v24  ;;  %v3655_v27 = vpop.f32.mrb[35].mxu0  ;;  %v5113_v25 = vld [vmem:[#allocation31 + $0x6] ss:$0 sm:$0xff] }
0x1dbf   :  { %v3656_v28 = vadd.f32 %v5098_v24, %v3655_v27  ;;  %v6129_v24 = vpack.c.bf16 %v4244_v23, %v4243_v22  ;;  %v4723_v23 = vld [vmem:[#allocation29 + $0x1a0] sm:$0xff] }
0x1dc0   :  { %v3665_v29 = vmax.f32 %v3661_v26, 0.0 }
0x1dc1   :  { %v3664_v1 = vmax.f32 %v3656_v28, 0.0 }
0x1dc3   :  { %5746 = vmatprep.mubr.msk.f32.mxu1 %vm584_vm2, %v3664_v1 }
0x1dc4   :  { %5747 = vmatmul.mubr.msk.f32.vlgmr.msra.gmra.mrb[34].mxu1 %vm584_vm2, %v3665_v29 }
0x1dc5   :  { %6100 = vmatpush3.bf16.msra.mxu1 %v6097_v35  ;;  %v4340_v35 = vld [vmem:[#allocation29 + $0x128] sm:$0xff] }
0x1dc6   :  { %6102 = vmatprep.subr.bf16.mxu1 %v6101_v45 }
0x1dc9   :  { %6104 = vmatpush3.bf16.msra.mxu1 %v6101_v45  ;;  %v4342_v45 = vld [vmem:[#allocation29 + $0x138] sm:$0xff] }
0x1dca   :  { %6114 = vmatprep.subr.bf16.mxu1 %v6113_v17  ;;  %v6141_v46 = vpack.c.bf16 %v4342_v45, %v4341_v43  ;;  %v4820_v45 = vld [vmem:[%s6928_s8 + $0x10] sm:$0xff] }
0x1e97   :  { %v5748_v36 = vpop.f32.mrb[34].mxu1 }
0x1e98   :  { %v3757_v37 = vadd.f32 %v5748_v36, %v5101_v44  ;;  %v3751_v38 = vpop.f32.mrb[35].mxu1  ;;  %v5116_v36 = vld [vmem:[#allocation31 + $0x7] ss:$0 sm:$0xff] }
0x1e99   :  { %v3752_v39 = vadd.f32 %v5101_v44, %v3751_v38  ;;  %v6137_v44 = vpack.c.bf16 %v4340_v35, %v4339_v34  ;;  %v4818_v35 = vld [vmem:[%s6928_s8] sm:$0xff] }
0x1e9a   :  { %v3761_v41 = vmax.f32 %v3757_v37, 0.0 }
0x1e9b   :  { %v3760_v40 = vmax.f32 %v3752_v39, 0.0 }
0x1e9d   :  { %5757 = vmatprep.mubr.msk.f32.mxu0 %vm584_vm2, %v3760_v40 }
0x1e9e   :  { %5758 = vmatmul.mubr.msk.f32.vlgmr.msra.gmra.mrb[36].mxu0 %vm584_vm2, %v3761_v41 }
0x1e9f   :  { %6108 = vmatpush3.bf16.msra.mxu0 %v6105_v48  ;;  %v4436_v48 = vld [vmem:[#allocation29 + $0x148] sm:$0xff] }
0x1ea0   :  { %6110 = vmatprep.subr.bf16.mxu0 %v6109_v58 }
0x1ea3   :  { %6112 = vmatpush3.bf16.msra.mxu0 %v6109_v58  ;;  %v4438_v58 = vld [vmem:[#allocation29 + $0x158] sm:$0xff] }
0x1ea4   :  { %6122 = vmatprep.subr.bf16.mxu0 %v6121_v9  ;;  %v6149_v59 = vpack.c.bf16 %v4438_v58, %v4437_v57 }
0x1f71   :  { %v5759_v50 = vpop.f32.mrb[36].mxu0 }
0x1f72   :  { %v3853_v51 = vadd.f32 %v5759_v50, %v5104_v49  ;;  %v3847_v52 = vpop.f32.mrb[37].mxu0  ;;  %v5119_v50 = vld [vmem:[#allocation31 + $0x8] ss:$0 sm:$0xff] }
0x1f73   :  { %v3848_v53 = vadd.f32 %v5104_v49, %v3847_v52  ;;  %v6145_v49 = vpack.c.bf16 %v4436_v48, %v4435_v47  ;;  %v5134_v48 = vld [vmem:[#allocation31 + $0xd] ss:$0 sm:$0xff] }
0x1f74   :  { %v3857_v55 = vmax.f32 %v3853_v51, 0.0 }
0x1f75   :  { %v3856_v54 = vmax.f32 %v3848_v53, 0.0 }
0x1f77   :  { %5768 = vmatprep.mubr.msk.f32.mxu1 %vm584_vm2, %v3856_v54 }
0x1f78   :  { %5769 = vmatmul.mubr.msk.f32.vlgmr.msra.gmra.mrb[36].mxu1 %vm584_vm2, %v3857_v55 }
0x1f79   :  { %6116 = vmatpush3.bf16.msra.mxu1 %v6113_v17  ;;  %v4532_v17 = vld [vmem:[#allocation29 + $0x168] sm:$0xff] }
0x1f7a   :  { %6118 = vmatprep.subr.bf16.mxu1 %v6117_v6 }
0x1f7d   :  { %6120 = vmatpush3.bf16.msra.mxu1 %v6117_v6  ;;  %v4534_v6 = vld [vmem:[#allocation29 + $0x178] sm:$0xff] }
0x1f7e   :  { %6130 = vmatprep.subr.bf16.mxu1 %v6129_v24  ;;  %v6157_v7 = vpack.c.bf16 %v4534_v6, %v4533_v5 }
0x204b   :  { %v5770_v62 = vpop.f32.mrb[36].mxu1 }
0x204c   :  { %v3949_v63 = vadd.f32 %v5770_v62, %v5107_v61  ;;  %v3943_v0 = vpop.f32.mrb[37].mxu1  ;;  %v5122_v62 = vld [vmem:[#allocation31 + $0x9] ss:$0 sm:$0xff] }
0x204d   :  { %v3944_v2 = vadd.f32 %v5107_v61, %v3943_v0  ;;  %v6153_v61 = vpack.c.bf16 %v4532_v17, %v4531_v60 }
0x204e   :  { %v3953_v16 = vmax.f32 %v3949_v63, 0.0 }
0x204f   :  { %v3952_v3 = vmax.f32 %v3944_v2, 0.0 }
0x2051   :  { %5779 = vmatprep.mubr.msk.f32.mxu0 %vm584_vm2, %v3952_v3 }
0x2052   :  { %5780 = vmatmul.mubr.msk.f32.vlgmr.msra.gmra.mrb[38].mxu0 %vm584_vm2, %v3953_v16 }
0x2053   :  { %6124 = vmatpush3.bf16.msra.mxu0 %v6121_v9  ;;  %v4628_v9 = vld [vmem:[#allocation29 + $0x188] sm:$0xff] }
0x2054   :  { %6126 = vmatprep.subr.bf16.mxu0 %v6125_v21 }
0x2057   :  { %6128 = vmatpush3.bf16.msra.mxu0 %v6125_v21  ;;  %v4630_v21 = vld [vmem:[#allocation29 + $0x198] sm:$0xff] }
0x2058   :  { %6138 = vmatprep.subr.bf16.mxu0 %v6137_v44  ;;  %v6165_v22 = vpack.c.bf16 %v4630_v21, %v4629_v20 }
0x2125   :  { %v5781_v12 = vpop.f32.mrb[38].mxu0 }
0x2126   :  { %v4045_v11 = vadd.f32 %v5781_v12, %v5110_v10  ;;  %v4039_v13 = vpop.f32.mrb[39].mxu0  ;;  %v5125_v12 = vld [vmem:[#allocation31 + $0xa] ss:$0 sm:$0xff] }
0x2127   :  { %v4040_v14 = vadd.f32 %v5110_v10, %v4039_v13  ;;  %v6161_v10 = vpack.c.bf16 %v4628_v9, %v4627_v8 }
0x2128   :  { %v4049_v18 = vmax.f32 %v4045_v11, 0.0 }
0x2129   :  { %v4048_v15 = vmax.f32 %v4040_v14, 0.0 }
0x212b   :  { %5790 = vmatprep.mubr.msk.f32.mxu1 %vm584_vm2, %v4048_v15 }
0x212c   :  { %5791 = vmatmul.mubr.msk.f32.vlgmr.msra.gmra.mrb[38].mxu1 %vm584_vm2, %v4049_v18 }
0x212d   :  { %6132 = vmatpush3.bf16.msra.mxu1 %v6129_v24  ;;  %v4724_v24 = vld [vmem:[#allocation29 + $0x1a8] sm:$0xff] }
0x212e   :  { %6134 = vmatprep.subr.bf16.mxu1 %v6133_v33 }
0x2131   :  { %6136 = vmatpush3.bf16.msra.mxu1 %v6133_v33  ;;  %v4726_v33 = vld [vmem:[#allocation29 + $0x1b8] sm:$0xff] }
0x2132   :  { %6146 = vmatprep.subr.bf16.mxu1 %v6145_v49  ;;  %v6173_v34 = vpack.c.bf16 %v4726_v33, %v4725_v32 }
0x21ff   :  { %v5792_v26 = vpop.f32.mrb[38].mxu1 }
0x2200   :  { %v4141_v27 = vadd.f32 %v5792_v26, %v5113_v25  ;;  %v4135_v28 = vpop.f32.mrb[39].mxu1  ;;  %v5128_v26 = vld [vmem:[#allocation31 + $0xb] ss:$0 sm:$0xff] }
0x2201   :  { %v4136_v1 = vadd.f32 %v5113_v25, %v4135_v28  ;;  %v6169_v25 = vpack.c.bf16 %v4724_v24, %v4723_v23 }
0x2202   :  { %v4145_v30 = vmax.f32 %v4141_v27, 0.0 }
0x2203   :  { %v4144_v29 = vmax.f32 %v4136_v1, 0.0 }
0x2205   :  { %5801 = vmatprep.mubr.msk.f32.mxu0 %vm584_vm2, %v4144_v29 }
0x2206   :  { %5802 = vmatmul.mubr.msk.f32.vlgmr.msra.gmra.mrb[40].mxu0 %vm584_vm2, %v4145_v30 }
0x2207   :  { %6140 = vmatpush3.bf16.msra.mxu0 %v6137_v44  ;;  %v4819_v44 = vld [vmem:[%s6928_s8 + $0x8] sm:$0xff] }
0x2208   :  { %6142 = vmatprep.subr.bf16.mxu0 %v6141_v46 }
0x220b   :  { %6144 = vmatpush3.bf16.msra.mxu0 %v6141_v46  ;;  %v4821_v46 = vld [vmem:[%s6928_s8 + $0x18] sm:$0xff] }
0x220c   :  { %6154 = vmatprep.subr.bf16.mxu0 %v6153_v61  ;;  %v6181_v47 = vpack.c.bf16 %v4821_v46, %v4820_v45 }
0x22d9   :  { %v5803_v37 = vpop.f32.mrb[40].mxu0 }
0x22da   :  { %v4237_v38 = vadd.f32 %v5803_v37, %v5116_v36  ;;  %v4231_v39 = vpop.f32.mrb[41].mxu0  ;;  %v5131_v37 = vld [vmem:[#allocation31 + $0xc] ss:$0 sm:$0xff] }
0x22db   :  { %v4232_v40 = vadd.f32 %v5116_v36, %v4231_v39  ;;  %v6177_v36 = vpack.c.bf16 %v4819_v44, %v4818_v35 }
0x22dc   :  { %v4241_v42 = vmax.f32 %v4237_v38, 0.0 }
0x22dd   :  { %v4240_v41 = vmax.f32 %v4232_v40, 0.0 }
0x22df   :  { %5812 = vmatprep.mubr.msk.f32.mxu1 %vm584_vm2, %v4240_v41 }
0x22e0   :  { %5813 = vmatmul.mubr.msk.f32.vlgmr.msra.gmra.mrb[40].mxu1 %vm584_vm2, %v4241_v42 }
0x22e1   :  { %6148 = vmatpush3.bf16.msra.mxu1 %v6145_v49 }
0x22e2   :  { %6150 = vmatprep.subr.bf16.mxu1 %v6149_v59 }
0x22e5   :  { %6152 = vmatpush3.bf16.msra.mxu1 %v6149_v59 }
0x22e6   :  { %6162 = vmatprep.subr.bf16.mxu1 %v6161_v10 }
0x23b3   :  { %v5814_v51 = vpop.f32.mrb[40].mxu1 }
0x23b4   :  { %v4333_v52 = vadd.f32 %v5814_v51, %v5119_v50  ;;  %v4327_v53 = vpop.f32.mrb[41].mxu1 }
0x23b5   :  { %v4328_v54 = vadd.f32 %v5119_v50, %v4327_v53 }
0x23b6   :  { %v4337_v56 = vmax.f32 %v4333_v52, 0.0 }
0x23b7   :  { %v4336_v55 = vmax.f32 %v4328_v54, 0.0 }
0x23b9   :  { %5823 = vmatprep.mubr.msk.f32.mxu0 %vm584_vm2, %v4336_v55  ;;  %v5137_v55 = vld [vmem:[#allocation2] ss:$0 sm:$0xff] }
0x23ba   :  { %5824 = vmatmul.mubr.msk.f32.vlgmr.msra.gmra.mrb[42].mxu0 %vm584_vm2, %v4337_v56 }
0x23bb   :  { %6156 = vmatpush3.bf16.msra.mxu0 %v6153_v61 }
0x23bc   :  { %6158 = vmatprep.subr.bf16.mxu0 %v6157_v7 }
0x23bf   :  { %6160 = vmatpush3.bf16.msra.mxu0 %v6157_v7 }
0x23c0   :  { %6170 = vmatprep.subr.bf16.mxu0 %v6169_v25 }
0x248d   :  { %v5825_v63 = vpop.f32.mrb[42].mxu0 }
0x248e   :  { %v4429_v0 = vadd.f32 %v5825_v63, %v5122_v62  ;;  %v4423_v2 = vpop.f32.mrb[43].mxu0 }
0x248f   :  { %v4424_v3 = vadd.f32 %v5122_v62, %v4423_v2 }
0x2490   :  { %v4433_v4 = vmax.f32 %v4429_v0, 0.0 }
0x2491   :  { %v4432_v16 = vmax.f32 %v4424_v3, 0.0 }
0x2493   :  { %5834 = vmatprep.mubr.msk.f32.mxu1 %vm584_vm2, %v4432_v16 }
0x2494   :  { %5835 = vmatmul.mubr.msk.f32.vlgmr.msra.gmra.mrb[42].mxu1 %vm584_vm2, %v4433_v4 }
0x2495   :  { %6164 = vmatpush3.bf16.msra.mxu1 %v6161_v10 }
0x2496   :  { %6166 = vmatprep.subr.bf16.mxu1 %v6165_v22 }
0x2499   :  { %6168 = vmatpush3.bf16.msra.mxu1 %v6165_v22 }
0x249a   :  { %6178 = vmatprep.subr.bf16.mxu1 %v6177_v36 }
0x2567   :  { %v5836_v11 = vpop.f32.mrb[42].mxu1 }
0x2568   :  { %v4525_v13 = vadd.f32 %v5836_v11, %v5125_v12  ;;  %v4519_v14 = vpop.f32.mrb[43].mxu1 }
0x2569   :  { %v4520_v15 = vadd.f32 %v5125_v12, %v4519_v14 }
0x256a   :  { %v4529_v19 = vmax.f32 %v4525_v13, 0.0 }
0x256b   :  { %v4528_v18 = vmax.f32 %v4520_v15, 0.0 }
0x256d   :  { %5845 = vmatprep.mubr.msk.f32.mxu0 %vm584_vm2, %v4528_v18 }
0x256e   :  { %5846 = vmatmul.mubr.msk.f32.vlgmr.msra.gmra.mrb[44].mxu0 %vm584_vm2, %v4529_v19 }
0x256f   :  { %6172 = vmatpush3.bf16.msra.mxu0 %v6169_v25 }
0x2570   :  { %6174 = vmatprep.subr.bf16.mxu0 %v6173_v34 }
0x2573   :  { %6176 = vmatpush3.bf16.msra.mxu0 %v6173_v34 }
0x2641   :  { %v5847_v27 = vpop.f32.mrb[44].mxu0 }
0x2642   :  { %v4621_v28 = vadd.f32 %v5847_v27, %v5128_v26  ;;  %v4615_v1 = vpop.f32.mrb[45].mxu0 }
0x2643   :  { %v4616_v29 = vadd.f32 %v5128_v26, %v4615_v1 }
0x2644   :  { %v4625_v31 = vmax.f32 %v4621_v28, 0.0 }
0x2645   :  { %v4624_v30 = vmax.f32 %v4616_v29, 0.0 }
0x2647   :  { %5856 = vmatprep.mubr.msk.f32.mxu1 %vm584_vm2, %v4624_v30 }
0x2648   :  { %5857 = vmatmul.mubr.msk.f32.vlgmr.msra.gmra.mrb[44].mxu1 %vm584_vm2, %v4625_v31 }
0x2649   :  { %6180 = vmatpush3.bf16.msra.mxu1 %v6177_v36 }
0x264a   :  { %6182 = vmatprep.subr.bf16.mxu1 %v6181_v47 }
0x264d   :  { %6184 = vmatpush3.bf16.msra.mxu1 %v6181_v47 }
0x271b   :  { %v5858_v38 = vpop.f32.mrb[44].mxu1 }
0x271c   :  { %v4717_v39 = vadd.f32 %v5858_v38, %v5131_v37  ;;  %v4711_v40 = vpop.f32.mrb[45].mxu1 }
0x271d   :  { %v4712_v41 = vadd.f32 %v5131_v37, %v4711_v40 }
0x271e   :  { %v4721_v43 = vmax.f32 %v4717_v39, 0.0 }
0x271f   :  { %v4720_v42 = vmax.f32 %v4712_v41, 0.0 }
0x2721   :  { %5867 = vmatprep.mubr.msk.f32.mxu0 %vm584_vm2, %v4720_v42 }
0x2722   :  { %5868 = vmatmul.mubr.msk.f32.vlgmr.msra.gmra.mrb[46].mxu0 %vm584_vm2, %v4721_v43 }
0x27f5   :  { %v5869_v49 = vpop.f32.mrb[46].mxu0 }
0x27f6   :  { %v4813_v50 = vadd.f32 %v5869_v49, %v5134_v48  ;;  %v4807_v51 = vpop.f32.mrb[47].mxu0 }
0x27f7   :  { %v4808_v52 = vadd.f32 %v5134_v48, %v4807_v51 }
0x27f8   :  { %v4817_v54 = vmax.f32 %v4813_v50, 0.0 }
0x27f9   :  { %v4816_v53 = vmax.f32 %v4808_v52, 0.0 }
0x27fb   :  { %5878 = vmatprep.mubr.msk.f32.mxu1 %vm584_vm2, %v4816_v53 }
0x27fc   :  { %5879 = vmatmul.mubr.msk.f32.vlgmr.msra.gmra.mrb[46].mxu1 %vm584_vm2, %v4817_v54 }
0x28cf   :  { %v5880_v56 = vpop.f32.mrb[46].mxu1 }
0x28d0   :  { %v4907_v57 = vadd.f32 %v5880_v56, %v5137_v55  ;;  %v4901_v58 = vpop.f32.mrb[47].mxu1 }
0x28d1   :  { %v4902_v59 = vadd.f32 %v5137_v55, %v4901_v58 }
0x28d2   :  { %v5141_v60 = vmul.f32 -1.442695, %v4907_v57 }
0x28d3   :  { %v5140_v17 = vmul.f32 -1.442695, %v4902_v59 }
0x28d4   :  { %6248 = vpow2.f32 %v5141_v60 }
0x28d5   :  { %6250 = vpow2.f32 %v5140_v17 }
0x28de   :  { %v6249_v61 = vpop.eup %6248 }
0x28df   :  { %v6251_v62 = vpop.eup %6250  ;;  %v4917_v63 = vadd.f32 1.0, %v6249_v61 }
0x28e0   :  { %v4916_v0 = vadd.f32 1.0, %v6251_v62 }
0x28e1   :  { %6252 = vrcp.f32 %v4917_v63 }
0x28e2   :  { %6254 = vrcp.f32 %v4916_v0 }
0x28eb   :  { %v6253_v2 = vpop.eup %6252 }
0x28ec   :  { %v6255_v3 = vpop.eup %6254  ;;  %4924 = vst.msk [vmem:[%s6936_s21 + $0x8] sm:$0xff] %vm4922_vm4, %v6253_v2 }
0x28ed   :  { %4923 = vst.msk [vmem:[%s6936_s21] sm:$0xff] %vm4922_vm4, %v6255_v3 }
0x28ee   :  { %4929 = vsyncpa [#allocation4], 1 }
0x28ef   :  { %4930 = vsyncpa [#allocation6], 1 }
0x28f0   :  { %4931 = vsyncpa [#allocation9], 1 }
0x28f1   :  { %4932 = vsyncpa [#allocation12], 1 }
0x28f2   :  { %4933 = vsyncpa [#allocation15], 1 }
0x28f3   :  { %4934 = vsyncpa [#allocation18], 1 }
0x28f4   :  { %4935 = vsyncpa [#allocation21], 1 }
0x28f5   :  { %4936 = vsyncpa [#allocation24], 1 }
0x28f6   :  { %4937 = vsyncpa [#allocation27], 1 }
0x28f7   :  { %4938 = vsyncpa [#allocation30], 1 }

</bundles_post_ra>
